<compile_context>
chip_gen: v7x
topology: tpu7x:2x2x1
jax: 0.10.0
libtpu: 0.0.40
codegen_flags: <defaults>
</compile_context>

<pallas_src>
import math
import functools

import numpy as np
import jax
import jax.numpy as jnp
from jax import lax
from jax.experimental import pallas as pl
from jax.experimental.pallas import tpu as pltpu


# ----------------------------------------------------------------------------
# Per-generation knobs
# ----------------------------------------------------------------------------
# v5e/v6e (128 MiB VMEM): tile targets can be raised to 512/1024.
# v7x (64 MiB VMEM): keep tk/tf targets <= 256 at large d_model.
_VMEM_LIMIT_BYTES = 48 * 1024 * 1024   # > v5e(16)/v6e(32) scoped defaults, < v7x 64 MiB
_TM_TARGET = 256
_TN_TARGET = 512
_TK_TARGET = 512
_TF_TARGET = 512


def _compiler_params(dim_sems):
    return pltpu.CompilerParams(dimension_semantics=dim_sems,
                                vmem_limit_bytes=_VMEM_LIMIT_BYTES)


# ----------------------------------------------------------------------------
# Tile-size selection
# ----------------------------------------------------------------------------

def _pick_tile(dim, target, mult):
    """Largest divisor of `dim` that is <= target and a multiple of `mult`.

    Falls back to the full dim (which always satisfies the (8,128) block rule).
    """
    if dim <= target:
        return dim
    for t in range(target, 0, -1):
        if dim % t == 0 and t % mult == 0:
            return t
    return dim


def _pick_parallel_tile(dim, target, mult):
    """Like _pick_tile but prefers >=2 blocks so both v7x TensorCores get work."""
    t = _pick_tile(dim, target, mult)
    if dim // t >= 2 or dim < 2 * mult:
        return t
    return _pick_tile(dim, max(dim // 2, mult), mult)


# ----------------------------------------------------------------------------
# Pallas kernels
# ----------------------------------------------------------------------------

def _linear_kernel(x_ref, w_ref, b_ref, o_ref, acc_ref):
    # y = x @ W + b, tiled over (M, N, K); K is the reduction axis. W is bf16.
    k = pl.program_id(2)

    @pl.when(k == 0)
    def _():
        acc_ref[...] = jnp.zeros_like(acc_ref)

    acc_ref[...] += jnp.dot(x_ref[...].astype(jnp.bfloat16), w_ref[...],
                            preferred_element_type=jnp.float32)

    @pl.when(k == pl.num_programs(2) - 1)
    def _():
        o_ref[...] = acc_ref[...] + b_ref[...]


def linear(x2d, w, b, *, tm_target=_TM_TARGET, tn_target=_TN_TARGET,
           tk_target=_TK_TARGET):
    M, K = x2d.shape
    N = w.shape[1]
    tm = _pick_parallel_tile(M, tm_target, 8)
    tn = _pick_tile(N, tn_target, 128)
    tk = _pick_tile(K, tk_target, 128)
    grid = (M // tm, N // tn, K // tk)
    return pl.pallas_call(
        _linear_kernel,
        out_shape=jax.ShapeDtypeStruct((M, N), jnp.float32),
        grid_spec=pltpu.PrefetchScalarGridSpec(
            num_scalar_prefetch=0, grid=grid,
            in_specs=[pl.BlockSpec((tm, tk), lambda i, j, k: (i, k)),
                      pl.BlockSpec((tk, tn), lambda i, j, k: (k, j)),
                      pl.BlockSpec((1, tn), lambda i, j, k: (0, j))],
            out_specs=pl.BlockSpec((tm, tn), lambda i, j, k: (i, j)),
            scratch_shapes=[pltpu.VMEM((tm, tn), jnp.float32)]),
        compiler_params=_compiler_params(("parallel", "parallel", "arbitrary")),
    )(x2d, w, b)


def _norm_epilogue(y, alpha, bias, eps, d_model):
    # PyTorch Norm: alpha * (x - mean) / (std_unbiased + eps) + bias
    mean = jnp.mean(y, axis=-1, keepdims=True)
    yc = y - mean
    var = jnp.sum(yc * yc, axis=-1, keepdims=True) * (1.0 / (d_model - 1))
    inv = pl.reciprocal(jnp.sqrt(var) + eps, approx=False)   # EUP, not VPU divide
    return alpha * yc * inv + bias


def _matmul_add_norm_kernel(x_ref, w_ref, b_ref, res_ref, alpha_ref, bias_ref,
                            o_ref, acc_ref, *, eps, d_model):
    # o = Norm((x @ W + b) + res); tiled over (M, K); full d_model on lanes.
    k = pl.program_id(1)

    @pl.when(k == 0)
    def _():
        acc_ref[...] = jnp.zeros_like(acc_ref)

    acc_ref[...] += jnp.dot(x_ref[...].astype(jnp.bfloat16), w_ref[...],
                            preferred_element_type=jnp.float32)

    @pl.when(k == pl.num_programs(1) - 1)
    def _():
        y = acc_ref[...] + b_ref[...] + res_ref[...]
        o_ref[...] = _norm_epilogue(y, alpha_ref[...], bias_ref[...], eps, d_model)


def matmul_add_norm(x2d, w, b, res2d, alpha, bias, eps=1e-6, *,
                    tm_target=_TM_TARGET, tk_target=_TK_TARGET):
    M, K = x2d.shape
    D = w.shape[1]
    tm = _pick_parallel_tile(M, tm_target, 8)
    tk = _pick_tile(K, tk_target, 128)
    grid = (M // tm, K // tk)
    kern = functools.partial(_matmul_add_norm_kernel, eps=eps, d_model=D)
    return pl.pallas_call(
        kern,
        out_shape=jax.ShapeDtypeStruct((M, D), jnp.float32),
        grid_spec=pltpu.PrefetchScalarGridSpec(
            num_scalar_prefetch=0, grid=grid,
            in_specs=[pl.BlockSpec((tm, tk), lambda i, k: (i, k)),
                      pl.BlockSpec((tk, D), lambda i, k: (k, 0)),
                      pl.BlockSpec((1, D), lambda i, k: (0, 0)),
                      pl.BlockSpec((tm, D), lambda i, k: (i, 0)),
                      pl.BlockSpec((1, D), lambda i, k: (0, 0)),
                      pl.BlockSpec((1, D), lambda i, k: (0, 0))],
            out_specs=pl.BlockSpec((tm, D), lambda i, k: (i, 0)),
            scratch_shapes=[pltpu.VMEM((tm, D), jnp.float32)]),
        compiler_params=_compiler_params(("parallel", "arbitrary")),
    )(x2d, w, b, res2d, alpha, bias)


def _ffn_add_norm_kernel(x_ref, w1_ref, b1_ref, w2_ref, b2_ref, res_ref,
                         alpha_ref, bias_ref, o_ref, acc_ref, *, eps, d_model):
    # o = Norm(relu(x @ W1 + b1) @ W2 + b2 + res)
    # Tiled over (M, F): only a [tm, tf] slice of the hidden is ever live.
    f = pl.program_id(1)

    @pl.when(f == 0)
    def _():
        acc_ref[...] = jnp.zeros_like(acc_ref)

    h = jnp.dot(x_ref[...].astype(jnp.bfloat16), w1_ref[...],
                preferred_element_type=jnp.float32) + b1_ref[...]
    h = jnp.maximum(h, 0.0)
    acc_ref[...] += jnp.dot(h.astype(jnp.bfloat16), w2_ref[...],
                            preferred_element_type=jnp.float32)

    @pl.when(f == pl.num_programs(1) - 1)
    def _():
        y = acc_ref[...] + b2_ref[...] + res_ref[...]
        o_ref[...] = _norm_epilogue(y, alpha_ref[...], bias_ref[...], eps, d_model)


def ffn_add_norm(x2d, w1, b1, w2, b2, res2d, alpha, bias, eps=1e-6, *,
                 tm_target=_TM_TARGET, tf_target=_TF_TARGET):
    M, D = x2d.shape
    F = w1.shape[1]
    tm = _pick_parallel_tile(M, tm_target, 8)
    tf = _pick_tile(F, tf_target, 128)
    grid = (M // tm, F // tf)
    kern = functools.partial(_ffn_add_norm_kernel, eps=eps, d_model=D)
    return pl.pallas_call(
        kern,
        out_shape=jax.ShapeDtypeStruct((M, D), jnp.float32),
        grid_spec=pltpu.PrefetchScalarGridSpec(
            num_scalar_prefetch=0, grid=grid,
            in_specs=[pl.BlockSpec((tm, D), lambda i, f: (i, 0)),
                      pl.BlockSpec((D, tf), lambda i, f: (0, f)),
                      pl.BlockSpec((1, tf), lambda i, f: (0, f)),
                      pl.BlockSpec((tf, D), lambda i, f: (f, 0)),
                      pl.BlockSpec((1, D), lambda i, f: (0, 0)),
                      pl.BlockSpec((tm, D), lambda i, f: (i, 0)),
                      pl.BlockSpec((1, D), lambda i, f: (0, 0)),
                      pl.BlockSpec((1, D), lambda i, f: (0, 0))],
            out_specs=pl.BlockSpec((tm, D), lambda i, f: (i, 0)),
            scratch_shapes=[pltpu.VMEM((tm, D), jnp.float32)]),
        compiler_params=_compiler_params(("parallel", "arbitrary")),
    )(x2d, w1, b1, w2, b2, res2d, alpha, bias)


def _log_softmax_kernel(y_ref, o_ref):
    y = y_ref[...]
    m = jnp.max(y, axis=-1, keepdims=True)
    s = y - m
    lse = jnp.log(jnp.sum(jnp.exp(s), axis=-1, keepdims=True))
    o_ref[...] = s - lse


def log_softmax(y2d, *, block_bytes=2 << 20):
    # Row-tiled log_softmax over the vocab (lane) axis; M tile sized so the
    # (tm, V) f32 block stays under `block_bytes` even for large vocabularies.
    M, V = y2d.shape
    tm_target = max(8, min(_TM_TARGET, block_bytes // (V * 4)))
    tm = _pick_parallel_tile(M, tm_target, 8)
    grid = (M // tm,)
    return pl.pallas_call(
        _log_softmax_kernel,
        out_shape=jax.ShapeDtypeStruct((M, V), jnp.float32),
        grid_spec=pltpu.PrefetchScalarGridSpec(
            num_scalar_prefetch=0, grid=grid,
            in_specs=[pl.BlockSpec((tm, V), lambda i: (i, 0))],
            out_specs=pl.BlockSpec((tm, V), lambda i: (i, 0))),
        compiler_params=_compiler_params(("parallel",)),
    )(y2d)


def _attn_kernel(q_ref, k_ref, v_ref, o_ref):
    # One batch element, ALL heads: q:[T,H,dk]  k,v:[S,H,dk]  ->  o:[T, H*dk].
    # Scale 1/sqrt(dk) is pre-folded into the Q projection weights.
    T, H, dk = q_ref.shape
    q = q_ref[...].astype(jnp.bfloat16)
    k = k_ref[...].astype(jnp.bfloat16)
    v = v_ref[...].astype(jnp.bfloat16)
    # scores [H, T, S]: batch over heads, contract dk.
    s = lax.dot_general(q, k, (((2,), (2,)), ((1,), (1,))),
                        preferred_element_type=jnp.float32)
    m = jnp.max(s, axis=-1, keepdims=True)
    p = jnp.exp(s - m)
    denom = jnp.sum(p, axis=-1, keepdims=True)
    # out [H, T, dk]: batch over heads, contract S.
    o = lax.dot_general(p.astype(jnp.bfloat16), v, (((2,), (0,)), ((0,), (1,))),
                        preferred_element_type=jnp.float32)
    o = o * pl.reciprocal(denom, approx=True)
    # lane-dense store: [T, D] with D = H*dk on the lane axis.
    o_ref[...] = jnp.transpose(o, (1, 0, 2)).reshape(T, H * dk)


def self_attention(qkv5):
    # qkv5: [B, T, 3, H, dk] (free reshape of the fused QKV projection output).
    B, T, _, H, dk = qkv5.shape
    D = H * dk
    return pl.pallas_call(
        _attn_kernel,
        out_shape=jax.ShapeDtypeStruct((B, T, D), jnp.float32),
        grid_spec=pltpu.PrefetchScalarGridSpec(
            num_scalar_prefetch=0, grid=(B,),
            in_specs=[
                pl.BlockSpec((None, T, None, H, dk), lambda b: (b, 0, 0, 0, 0)),
                pl.BlockSpec((None, T, None, H, dk), lambda b: (b, 0, 1, 0, 0)),
                pl.BlockSpec((None, T, None, H, dk), lambda b: (b, 0, 2, 0, 0)),
            ],
            out_specs=pl.BlockSpec((None, T, D), lambda b: (b, 0, 0))),
        compiler_params=_compiler_params(("parallel",)),
    )(qkv5, qkv5, qkv5)


def cross_attention(q4, kv5):
    # q4: [B, T, H, dk], kv5: [B, S, 2, H, dk] (free reshapes, no transposes).
    B, T, H, dk = q4.shape
    S = kv5.shape[1]
    D = H * dk
    return pl.pallas_call(
        _attn_kernel,
        out_shape=jax.ShapeDtypeStruct((B, T, D), jnp.float32),
        grid_spec=pltpu.PrefetchScalarGridSpec(
            num_scalar_prefetch=0, grid=(B,),
            in_specs=[
                pl.BlockSpec((None, T, H, dk), lambda b: (b, 0, 0, 0)),
                pl.BlockSpec((None, S, None, H, dk), lambda b: (b, 0, 0, 0, 0)),
                pl.BlockSpec((None, S, None, H, dk), lambda b: (b, 0, 1, 0, 0)),
            ],
            out_specs=pl.BlockSpec((None, T, D), lambda b: (b, 0, 0))),
        compiler_params=_compiler_params(("parallel",)),
    )(q4, kv5, kv5)


# ----------------------------------------------------------------------------
# Module composition (glue in plain JAX, compute in Pallas)
# ----------------------------------------------------------------------------

def decoder_layer(x2d, enc2d, B, T, S, p, num_heads, eps=1e-6):
    D = x2d.shape[1]
    H = num_heads
    dk = D // H

    # --- self-attention (fused QKV projection, heads stay together) ----------
    a1 = p["attn1"]
    qkv = linear(x2d, a1["wqkv"], a1["bqkv"])                       # [B*T, 3D]
    att1 = self_attention(qkv.reshape(B, T, 3, H, dk))              # [B, T, D]
    o1 = matmul_add_norm(att1.reshape(B * T, D), a1["wo"], a1["bo"], x2d,
                         p["norm1_alpha"], p["norm1_bias"], eps)

    # --- cross-attention (fused KV projection) --------------------------------
    a2 = p["attn2"]
    q2 = linear(o1, a2["wq"], a2["bq"])                             # [B*T, D]
    kv2 = linear(enc2d, a2["wkv"], a2["bkv"])                       # [B*S, 2D]
    att2 = cross_attention(q2.reshape(B, T, H, dk),
                           kv2.reshape(B, S, 2, H, dk))             # [B, T, D]
    o2 = matmul_add_norm(att2.reshape(B * T, D), a2["wo"], a2["bo"], o1,
                         p["norm2_alpha"], p["norm2_bias"], eps)

    # --- feed-forward (F-tiled, hidden never materialized) + add & norm ------
    o3 = ffn_add_norm(o2, p["ff_w1"], p["ff_b1"], p["ff_w2"], p["ff_b2"], o2,
                      p["norm3_alpha"], p["norm3_bias"], eps)
    return o3


def decoder_stack_forward(tokens, encoder_output, params, num_heads):
    # tokens: [B, L] int32; training path (is_predict=False): use tokens[:, :-1]
    tok = tokens[:, :-1]
    B, T = tok.shape
    D = params["embedding"].shape[1]
    S = encoder_output.shape[1]
    out = jnp.take(params["embedding"], tok, axis=0)                # [B, T, D]
    out = out + params["pe"][None, :T, :]                           # positional encoding
    # input_dropout: identity (eval)
    x2d = out.reshape(B * T, D)
    enc2d = encoder_output.reshape(B * S, D)
    for lp in params["layers"]:
        x2d = decoder_layer(x2d, enc2d, B, T, S, lp, num_heads)
    logits = linear(x2d, params["fc_w"], params["fc_b"])            # [B*T, V]
    logp = log_softmax(logits)
    V = logp.shape[1]
    return logp.reshape(B, T, V)


# ----------------------------------------------------------------------------
# Deterministic parameter initialization
# ----------------------------------------------------------------------------

def _lin_init(key, din, dout, scale=None):
    kw, kb = jax.random.split(key)
    if scale is None:
        scale = 1.0 / math.sqrt(din)
    w = jax.random.normal(kw, (din, dout), jnp.float32) * scale
    b = jax.random.normal(kb, (1, dout), jnp.float32) * 0.01
    return w, b


def _attn_init(key, D, num_heads):
    k1, k2, k3, k4 = jax.random.split(key, 4)
    xav = math.sqrt(2.0 / (D + D))  # xavier_normal for q/k/v
    wq, bq = _lin_init(k1, D, D, xav)
    wk, bk = _lin_init(k2, D, D, xav)
    wv, bv = _lin_init(k3, D, D, xav)
    wo, bo = _lin_init(k4, D, D)
    # fold the 1/sqrt(d_k) attention scale into the Q projection
    scale = 1.0 / math.sqrt(D // num_heads)
    wq, bq = wq * scale, bq * scale
    bf = jnp.bfloat16
    return dict(
        wqkv=jnp.concatenate([wq, wk, wv], axis=1).astype(bf),
        bqkv=jnp.concatenate([bq, bk, bv], axis=1),
        wq=wq.astype(bf), bq=bq,
        wkv=jnp.concatenate([wk, wv], axis=1).astype(bf),
        bkv=jnp.concatenate([bk, bv], axis=1),
        wo=wo.astype(bf), bo=bo,
    )


def _layer_init(key, D, num_heads):
    k1, k2, k3, k4 = jax.random.split(key, 4)
    w1, b1 = _lin_init(k1, D, 4 * D)
    w2, b2 = _lin_init(k2, 4 * D, D)
    return dict(
        attn1=_attn_init(k3, D, num_heads),
        attn2=_attn_init(k4, D, num_heads),
        ff_w1=w1.astype(jnp.bfloat16), ff_b1=b1,
        ff_w2=w2.astype(jnp.bfloat16), ff_b2=b2,
        norm1_alpha=jnp.ones((1, D), jnp.float32), norm1_bias=jnp.zeros((1, D), jnp.float32),
        norm2_alpha=jnp.ones((1, D), jnp.float32), norm2_bias=jnp.zeros((1, D), jnp.float32),
        norm3_alpha=jnp.ones((1, D), jnp.float32), norm3_bias=jnp.zeros((1, D), jnp.float32),
    )


def make_positional_encoding(max_len, d_model):
    pe = np.zeros((max_len, d_model), dtype=np.float32)
    for pos in range(max_len):
        for i in range(0, d_model, 2):
            pe[pos, i] = np.sin(pos / 10000 ** (i / d_model))
            if i + 1 < d_model:
                pe[pos, i + 1] = np.cos(pos / 10000 ** (i / d_model))
    return jnp.asarray(pe)


def init_params(key, d_model, num_heads, num_layers, max_len, vocab_size):
    keys = jax.random.split(key, num_layers + 2)
    emb = jax.random.normal(keys[0], (vocab_size, d_model), jnp.float32) * 0.1
    fc_w, fc_b = _lin_init(keys[1], d_model, vocab_size)
    layers = [_layer_init(keys[2 + l], d_model, num_heads) for l in range(num_layers)]
    return dict(
        embedding=emb,
        pe=make_positional_encoding(max_len, d_model),
        layers=layers,
        fc_w=fc_w.astype(jnp.bfloat16), fc_b=fc_b,
    )


# ----------------------------------------------------------------------------

if __name__ == "__main__":
    d_model, num_heads, num_layers = 32, 4, 2
    max_len, vocab_size = 16, 32
    sos_id, eos_id = 1, 2  # noqa: F841 (unused in training-path forward)
    B, L, S_enc = 2, 9, 8  # tokens [B, L] -> effective target length T = L - 1 = 8

    key = jax.random.PRNGKey(0)
    kp, kt, ke = jax.random.split(key, 3)

    params = init_params(kp, d_model, num_heads, num_layers, max_len, vocab_size)
    tokens = jax.random.randint(kt, (B, L), 0, vocab_size, dtype=jnp.int32)
    encoder_output = jax.random.normal(ke, (B, S_enc, d_model), jnp.float32)

    fwd = jax.jit(functools.partial(decoder_stack_forward, num_heads=num_heads))
    out = fwd(tokens, encoder_output, params)
    out = jax.block_until_ready(out)

    assert out.shape == (B, L - 1, vocab_size), out.shape
    assert bool(jnp.all(jnp.isfinite(out)))
    print("KERNEL_OK")
</pallas_src>

<mosaic_0001>
module attributes {stable_mosaic.version = 11 : i64} {
  func.func @_attn_kernel(%arg0: i32, %arg1: memref<1x8x1x4x8xf32, #tpu.memory_space<vmem>>, %arg2: memref<1x8x1x4x8xf32, #tpu.memory_space<vmem>>, %arg3: memref<1x8x1x4x8xf32, #tpu.memory_space<vmem>>, %arg4: memref<1x8x32xf32, #tpu.memory_space<vmem>>) attributes {dimension_semantics = [#tpu.dimension_semantics<parallel>], iteration_bounds = array<i64: 2>, scalar_prefetch = 0 : i64, scratch_operands = 0 : i64, tpu.core_type = #tpu.core_type<tc>, window_params = [{transform_indices = @transform_0, window_bounds = array<i64: 1, 8, 1, 4, 8>}, {transform_indices = @transform_1, window_bounds = array<i64: 1, 8, 1, 4, 8>}, {transform_indices = @transform_2, window_bounds = array<i64: 1, 8, 1, 4, 8>}, {transform_indices = @transform_3, window_bounds = array<i64: 1, 8, 32>}]} {
    %c0 = arith.constant 0 : index
    %c0_0 = arith.constant 0 : index
    %c0_1 = arith.constant 0 : index
    %c0_2 = arith.constant 0 : index
    %c0_3 = arith.constant 0 : index
    %0 = vector.load %arg1[%c0, %c0_0, %c0_1, %c0_2, %c0_3] : memref<1x8x1x4x8xf32, #tpu.memory_space<vmem>>, vector<1x8x1x4x8xf32>
    %1 = vector.shape_cast %0 : vector<1x8x1x4x8xf32> to vector<8x4x8xf32>
    %2 = arith.truncf %1 : vector<8x4x8xf32> to vector<8x4x8xbf16>
    %c0_4 = arith.constant 0 : index
    %c0_5 = arith.constant 0 : index
    %c0_6 = arith.constant 0 : index
    %c0_7 = arith.constant 0 : index
    %c0_8 = arith.constant 0 : index
    %3 = vector.load %arg2[%c0_4, %c0_5, %c0_6, %c0_7, %c0_8] : memref<1x8x1x4x8xf32, #tpu.memory_space<vmem>>, vector<1x8x1x4x8xf32>
    %4 = vector.shape_cast %3 : vector<1x8x1x4x8xf32> to vector<8x4x8xf32>
    %5 = arith.truncf %4 : vector<8x4x8xf32> to vector<8x4x8xbf16>
    %c0_9 = arith.constant 0 : index
    %c0_10 = arith.constant 0 : index
    %c0_11 = arith.constant 0 : index
    %c0_12 = arith.constant 0 : index
    %c0_13 = arith.constant 0 : index
    %6 = vector.load %arg3[%c0_9, %c0_10, %c0_11, %c0_12, %c0_13] : memref<1x8x1x4x8xf32, #tpu.memory_space<vmem>>, vector<1x8x1x4x8xf32>
    %7 = vector.shape_cast %6 : vector<1x8x1x4x8xf32> to vector<8x4x8xf32>
    %8 = arith.truncf %7 : vector<8x4x8xf32> to vector<8x4x8xbf16>
    %cst = arith.constant dense<0.000000e+00> : vector<4x8x8xf32>
    %9 = tpu.matmul %2, %5, %cst {dimension_numbers = #tpu.dot_dimension_numbers<[2], [2], [0], [0], [0, 1, 0, 0, 1, 0], [1], [1]>} : vector<8x4x8xbf16>, vector<8x4x8xbf16>, vector<4x8x8xf32> -> vector<4x8x8xf32>
    %cst_14 = arith.constant dense<0xFF800000> : vector<4x8xf32>
    %10 = vector.multi_reduction <maximumf>, %9, %cst_14 [2] : vector<4x8x8xf32> to vector<4x8xf32>
    %11 = vector.shape_cast %10 : vector<4x8xf32> to vector<4x8x1xf32>
    %12 = vector.broadcast %11 : vector<4x8x1xf32> to vector<4x8x8xf32>
    %13 = arith.subf %9, %12 : vector<4x8x8xf32>
    %14 = math.exp %13 : vector<4x8x8xf32>
    %cst_15 = arith.constant dense<0.000000e+00> : vector<4x8xf32>
    %15 = vector.multi_reduction <add>, %14, %cst_15 [2] : vector<4x8x8xf32> to vector<4x8xf32>
    %16 = vector.shape_cast %15 : vector<4x8xf32> to vector<4x8x1xf32>
    %17 = arith.truncf %14 : vector<4x8x8xf32> to vector<4x8x8xbf16>
    %cst_16 = arith.constant dense<0.000000e+00> : vector<4x8x8xf32>
    %18 = tpu.matmul %17, %8, %cst_16 {dimension_numbers = #tpu.dot_dimension_numbers<[2], [0], [1], [2], [0, 0, 0, 1, 1, 2], [0], [1]>} : vector<4x8x8xbf16>, vector<8x4x8xbf16>, vector<4x8x8xf32> -> vector<4x8x8xf32>
    %19 = tpu.reciprocal %16 {approx = true} : vector<4x8x1xf32> -> vector<4x8x1xf32>
    %20 = vector.broadcast %19 : vector<4x8x1xf32> to vector<4x8x8xf32>
    %21 = arith.mulf %18, %20 : vector<4x8x8xf32>
    %22 = tpu.transpose %21, [1, 0, 2] : vector<4x8x8xf32> -> vector<8x4x8xf32>
    %23 = vector.shape_cast %22 : vector<8x4x8xf32> to vector<8x32xf32>
    %c0_17 = arith.constant 0 : index
    %c0_18 = arith.constant 0 : index
    %c0_19 = arith.constant 0 : index
    %24 = vector.load %arg4[%c0_17, %c0_18, %c0_19] : memref<1x8x32xf32, #tpu.memory_space<vmem>>, vector<1x8x32xf32>
    %25 = vector.shape_cast %24 : vector<1x8x32xf32> to vector<8x32xf32>
    %26 = vector.shape_cast %23 : vector<8x32xf32> to vector<1x8x32xf32>
    tpu.vector_store %arg4[%c0_17, %c0_18, %c0_19], %26 {strides = array<i32>} : memref<1x8x32xf32, #tpu.memory_space<vmem>>, vector<1x8x32xf32>,
    return
  }
  func.func @transform_0(%arg0: i32) -> (i32, i32, i32, i32, i32) {
    %c0_i32 = arith.constant 0 : i32
    %c0_i32_0 = arith.constant 0 : i32
    %c0_i32_1 = arith.constant 0 : i32
    %c0_i32_2 = arith.constant 0 : i32
    %c0_i32_3 = arith.constant 0 : i32
    return %arg0, %c0_i32, %c0_i32_0, %c0_i32_1, %c0_i32_2 : i32, i32, i32, i32, i32
  }
  func.func @transform_1(%arg0: i32) -> (i32, i32, i32, i32, i32) {
    %c0_i32 = arith.constant 0 : i32
    %c1_i32 = arith.constant 1 : i32
    %c0_i32_0 = arith.constant 0 : i32
    %c0_i32_1 = arith.constant 0 : i32
    %c0_i32_2 = arith.constant 0 : i32
    return %arg0, %c0_i32, %c1_i32, %c0_i32_0, %c0_i32_1 : i32, i32, i32, i32, i32
  }
  func.func @transform_2(%arg0: i32) -> (i32, i32, i32, i32, i32) {
    %c0_i32 = arith.constant 0 : i32
    %c2_i32 = arith.constant 2 : i32
    %c0_i32_0 = arith.constant 0 : i32
    %c0_i32_1 = arith.constant 0 : i32
    %c0_i32_2 = arith.constant 0 : i32
    return %arg0, %c0_i32, %c2_i32, %c0_i32_0, %c0_i32_1 : i32, i32, i32, i32, i32
  }
  func.func @transform_3(%arg0: i32) -> (i32, i32, i32) {
    %c0_i32 = arith.constant 0 : i32
    %c0_i32_0 = arith.constant 0 : i32
    %c0_i32_1 = arith.constant 0 : i32
    return %arg0, %c0_i32, %c0_i32_0 : i32, i32, i32
  }
}

module attributes {stable_mosaic.version = 11 : i64} {
  func.func @_linear_kernel(%arg0: i32, %arg1: i32, %arg2: i32, %arg3: memref<8x32xf32, #tpu.memory_space<vmem>>, %arg4: memref<32x96xbf16, #tpu.memory_space<vmem>>, %arg5: memref<1x96xf32, #tpu.memory_space<vmem>>, %arg6: memref<8x96xf32, #tpu.memory_space<vmem>>, %arg7: memref<8x96xf32, #tpu.memory_space<vmem>>) attributes {dimension_semantics = [#tpu.dimension_semantics<parallel>, #tpu.dimension_semantics<parallel>, #tpu.dimension_semantics<arbitrary>], iteration_bounds = array<i64: 2, 1, 1>, scalar_prefetch = 0 : i64, scratch_operands = 1 : i64, tpu.core_type = #tpu.core_type<tc>, window_params = [{transform_indices = @transform_0, window_bounds = array<i64: 8, 32>}, {transform_indices = @transform_1, window_bounds = array<i64: 32, 96>}, {transform_indices = @transform_2, window_bounds = array<i64: 1, 96>}, {transform_indices = @transform_3, window_bounds = array<i64: 8, 96>}]} {
    %c0_i32 = arith.constant 0 : i32
    %0 = arith.cmpi eq, %arg2, %c0_i32 : i32
    %1 = arith.extui %0 : i1 to i32
    %c0_i32_0 = arith.constant 0 : i32
    %2 = arith.cmpi ne, %1, %c0_i32_0 : i32
    scf.if %2 {
      %cst_10 = arith.constant 0.000000e+00 : f32
      %13 = vector.broadcast %cst_10 : f32 to vector<8x96xf32>
      %c0_11 = arith.constant 0 : index
      %c0_12 = arith.constant 0 : index
      %14 = vector.load %arg7[%c0_11, %c0_12] : memref<8x96xf32, #tpu.memory_space<vmem>>, vector<8x96xf32>
      tpu.vector_store %arg7[%c0_11, %c0_12], %13 {strides = array<i32>} : memref<8x96xf32, #tpu.memory_space<vmem>>, vector<8x96xf32>,
    } else {
    }
    %c0 = arith.constant 0 : index
    %c0_1 = arith.constant 0 : index
    %3 = vector.load %arg7[%c0, %c0_1] : memref<8x96xf32, #tpu.memory_space<vmem>>, vector<8x96xf32>
    %c0_2 = arith.constant 0 : index
    %c0_3 = arith.constant 0 : index
    %4 = vector.load %arg3[%c0_2, %c0_3] : memref<8x32xf32, #tpu.memory_space<vmem>>, vector<8x32xf32>
    %5 = arith.truncf %4 : vector<8x32xf32> to vector<8x32xbf16>
    %c0_4 = arith.constant 0 : index
    %c0_5 = arith.constant 0 : index
    %6 = vector.load %arg4[%c0_4, %c0_5] : memref<32x96xbf16, #tpu.memory_space<vmem>>, vector<32x96xbf16>
    %cst = arith.constant dense<0.000000e+00> : vector<8x96xf32>
    %7 = tpu.matmul %5, %6, %cst {dimension_numbers = #tpu.dot_dimension_numbers<[1], [0], [0], [1], [0, 0, 1, 1], [], []>} : vector<8x32xbf16>, vector<32x96xbf16>, vector<8x96xf32> -> vector<8x96xf32>
    %8 = arith.addf %3, %7 : vector<8x96xf32>
    %c0_6 = arith.constant 0 : index
    %c0_7 = arith.constant 0 : index
    %9 = vector.load %arg7[%c0_6, %c0_7] : memref<8x96xf32, #tpu.memory_space<vmem>>, vector<8x96xf32>
    tpu.vector_store %arg7[%c0_6, %c0_7], %8 {strides = array<i32>} : memref<8x96xf32, #tpu.memory_space<vmem>>, vector<8x96xf32>,
    %c0_i32_8 = arith.constant 0 : i32
    %10 = arith.cmpi eq, %arg2, %c0_i32_8 : i32
    %11 = arith.extui %10 : i1 to i32
    %c0_i32_9 = arith.constant 0 : i32
    %12 = arith.cmpi ne, %11, %c0_i32_9 : i32
    scf.if %12 {
      %c0_10 = arith.constant 0 : index
      %c0_11 = arith.constant 0 : index
      %13 = vector.load %arg7[%c0_10, %c0_11] : memref<8x96xf32, #tpu.memory_space<vmem>>, vector<8x96xf32>
      %c0_12 = arith.constant 0 : index
      %c0_13 = arith.constant 0 : index
      %14 = vector.load %arg5[%c0_12, %c0_13] : memref<1x96xf32, #tpu.memory_space<vmem>>, vector<1x96xf32>
      %15 = vector.broadcast %14 : vector<1x96xf32> to vector<8x96xf32>
      %16 = arith.addf %13, %15 : vector<8x96xf32>
      %c0_14 = arith.constant 0 : index
      %c0_15 = arith.constant 0 : index
      %17 = vector.load %arg6[%c0_14, %c0_15] : memref<8x96xf32, #tpu.memory_space<vmem>>, vector<8x96xf32>
      tpu.vector_store %arg6[%c0_14, %c0_15], %16 {strides = array<i32>} : memref<8x96xf32, #tpu.memory_space<vmem>>, vector<8x96xf32>,
    } else {
    }
    return
  }
  func.func @transform_0(%arg0: i32, %arg1: i32, %arg2: i32) -> (i32, i32) {
    %c0_i32 = arith.constant 0 : i32
    return %arg0, %arg2 : i32, i32
  }
  func.func @transform_1(%arg0: i32, %arg1: i32, %arg2: i32) -> (i32, i32) {
    %c0_i32 = arith.constant 0 : i32
    return %arg2, %arg1 : i32, i32
  }
  func.func @transform_2(%arg0: i32, %arg1: i32, %arg2: i32) -> (i32, i32) {
    %c0_i32 = arith.constant 0 : i32
    %c0_i32_0 = arith.constant 0 : i32
    return %c0_i32, %arg1 : i32, i32
  }
  func.func @transform_3(%arg0: i32, %arg1: i32, %arg2: i32) -> (i32, i32) {
    %c0_i32 = arith.constant 0 : i32
    return %arg0, %arg1 : i32, i32
  }
}

module attributes {stable_mosaic.version = 11 : i64} {
  func.func @_matmul_add_norm_kernel(%arg0: i32, %arg1: i32, %arg2: memref<8x32xf32, #tpu.memory_space<vmem>>, %arg3: memref<32x32xbf16, #tpu.memory_space<vmem>>, %arg4: memref<1x32xf32, #tpu.memory_space<vmem>>, %arg5: memref<8x32xf32, #tpu.memory_space<vmem>>, %arg6: memref<1x32xf32, #tpu.memory_space<vmem>>, %arg7: memref<1x32xf32, #tpu.memory_space<vmem>>, %arg8: memref<8x32xf32, #tpu.memory_space<vmem>>, %arg9: memref<8x32xf32, #tpu.memory_space<vmem>>) attributes {dimension_semantics = [#tpu.dimension_semantics<parallel>, #tpu.dimension_semantics<arbitrary>], iteration_bounds = array<i64: 2, 1>, scalar_prefetch = 0 : i64, scratch_operands = 1 : i64, tpu.core_type = #tpu.core_type<tc>, window_params = [{transform_indices = @transform_0, window_bounds = array<i64: 8, 32>}, {transform_indices = @transform_1, window_bounds = array<i64: 32, 32>}, {pipeline_mode = #tpu.pipeline_mode<synchronous>, transform_indices = @transform_2, window_bounds = array<i64: 1, 32>}, {transform_indices = @transform_3, window_bounds = array<i64: 8, 32>}, {pipeline_mode = #tpu.pipeline_mode<synchronous>, transform_indices = @transform_4, window_bounds = array<i64: 1, 32>}, {pipeline_mode = #tpu.pipeline_mode<synchronous>, transform_indices = @transform_5, window_bounds = array<i64: 1, 32>}, {transform_indices = @transform_6, window_bounds = array<i64: 8, 32>}]} {
    %c0_i32 = arith.constant 0 : i32
    %0 = arith.cmpi eq, %arg1, %c0_i32 : i32
    %1 = arith.extui %0 : i1 to i32
    %c0_i32_0 = arith.constant 0 : i32
    %2 = arith.cmpi ne, %1, %c0_i32_0 : i32
    scf.if %2 {
      %cst_10 = arith.constant 0.000000e+00 : f32
      %13 = vector.broadcast %cst_10 : f32 to vector<8x32xf32>
      %c0_11 = arith.constant 0 : index
      %c0_12 = arith.constant 0 : index
      %14 = vector.load %arg9[%c0_11, %c0_12] : memref<8x32xf32, #tpu.memory_space<vmem>>, vector<8x32xf32>
      tpu.vector_store %arg9[%c0_11, %c0_12], %13 {strides = array<i32>} : memref<8x32xf32, #tpu.memory_space<vmem>>, vector<8x32xf32>,
    } else {
    }
    %c0 = arith.constant 0 : index
    %c0_1 = arith.constant 0 : index
    %3 = vector.load %arg9[%c0, %c0_1] : memref<8x32xf32, #tpu.memory_space<vmem>>, vector<8x32xf32>
    %c0_2 = arith.constant 0 : index
    %c0_3 = arith.constant 0 : index
    %4 = vector.load %arg2[%c0_2, %c0_3] : memref<8x32xf32, #tpu.memory_space<vmem>>, vector<8x32xf32>
    %5 = arith.truncf %4 : vector<8x32xf32> to vector<8x32xbf16>
    %c0_4 = arith.constant 0 : index
    %c0_5 = arith.constant 0 : index
    %6 = vector.load %arg3[%c0_4, %c0_5] : memref<32x32xbf16, #tpu.memory_space<vmem>>, vector<32x32xbf16>
    %cst = arith.constant dense<0.000000e+00> : vector<8x32xf32>
    %7 = tpu.matmul %5, %6, %cst {dimension_numbers = #tpu.dot_dimension_numbers<[1], [0], [0], [1], [0, 0, 1, 1], [], []>} : vector<8x32xbf16>, vector<32x32xbf16>, vector<8x32xf32> -> vector<8x32xf32>
    %8 = arith.addf %3, %7 : vector<8x32xf32>
    %c0_6 = arith.constant 0 : index
    %c0_7 = arith.constant 0 : index
    %9 = vector.load %arg9[%c0_6, %c0_7] : memref<8x32xf32, #tpu.memory_space<vmem>>, vector<8x32xf32>
    tpu.vector_store %arg9[%c0_6, %c0_7], %8 {strides = array<i32>} : memref<8x32xf32, #tpu.memory_space<vmem>>, vector<8x32xf32>,
    %c0_i32_8 = arith.constant 0 : i32
    %10 = arith.cmpi eq, %arg1, %c0_i32_8 : i32
    %11 = arith.extui %10 : i1 to i32
    %c0_i32_9 = arith.constant 0 : i32
    %12 = arith.cmpi ne, %11, %c0_i32_9 : i32
    scf.if %12 {
      %c0_10 = arith.constant 0 : index
      %c0_11 = arith.constant 0 : index
      %13 = vector.load %arg9[%c0_10, %c0_11] : memref<8x32xf32, #tpu.memory_space<vmem>>, vector<8x32xf32>
      %c0_12 = arith.constant 0 : index
      %c0_13 = arith.constant 0 : index
      %14 = vector.load %arg4[%c0_12, %c0_13] : memref<1x32xf32, #tpu.memory_space<vmem>>, vector<1x32xf32>
      %15 = vector.broadcast %14 : vector<1x32xf32> to vector<8x32xf32>
      %16 = arith.addf %13, %15 : vector<8x32xf32>
      %c0_14 = arith.constant 0 : index
      %c0_15 = arith.constant 0 : index
      %17 = vector.load %arg5[%c0_14, %c0_15] : memref<8x32xf32, #tpu.memory_space<vmem>>, vector<8x32xf32>
      %18 = arith.addf %16, %17 : vector<8x32xf32>
      %c0_16 = arith.constant 0 : index
      %c0_17 = arith.constant 0 : index
      %19 = vector.load %arg6[%c0_16, %c0_17] : memref<1x32xf32, #tpu.memory_space<vmem>>, vector<1x32xf32>
      %c0_18 = arith.constant 0 : index
      %c0_19 = arith.constant 0 : index
      %20 = vector.load %arg7[%c0_18, %c0_19] : memref<1x32xf32, #tpu.memory_space<vmem>>, vector<1x32xf32>
      %cst_20 = arith.constant dense<0.000000e+00> : vector<8xf32>
      %21 = vector.multi_reduction <add>, %18, %cst_20 [1] : vector<8x32xf32> to vector<8xf32>
      %22 = vector.shape_cast %21 : vector<8xf32> to vector<8x1xf32>
      %cst_21 = arith.constant 3.200000e+01 : f32
      %23 = vector.broadcast %cst_21 : f32 to vector<8x1xf32>
      %24 = arith.divf %22, %23 : vector<8x1xf32>
      %25 = vector.broadcast %24 : vector<8x1xf32> to vector<8x32xf32>
      %26 = arith.subf %18, %25 : vector<8x32xf32>
      %27 = arith.mulf %26, %26 : vector<8x32xf32>
      %cst_22 = arith.constant dense<0.000000e+00> : vector<8xf32>
      %28 = vector.multi_reduction <add>, %27, %cst_22 [1] : vector<8x32xf32> to vector<8xf32>
      %29 = vector.shape_cast %28 : vector<8xf32> to vector<8x1xf32>
      %cst_23 = arith.constant 0.0322580636 : f32
      %30 = vector.broadcast %cst_23 : f32 to vector<8x1xf32>
      %31 = arith.mulf %29, %30 : vector<8x1xf32>
      %32 = math.sqrt %31 : vector<8x1xf32>
      %cst_24 = arith.constant 9.99999997E-7 : f32
      %33 = vector.broadcast %cst_24 : f32 to vector<8x1xf32>
      %34 = arith.addf %32, %33 : vector<8x1xf32>
      %35 = tpu.reciprocal %34 : vector<8x1xf32> -> vector<8x1xf32>
      %36 = vector.broadcast %19 : vector<1x32xf32> to vector<8x32xf32>
      %37 = arith.mulf %36, %26 : vector<8x32xf32>
      %38 = vector.broadcast %35 : vector<8x1xf32> to vector<8x32xf32>
      %39 = arith.mulf %37, %38 : vector<8x32xf32>
      %40 = vector.broadcast %20 : vector<1x32xf32> to vector<8x32xf32>
      %41 = arith.addf %39, %40 : vector<8x32xf32>
      %c0_25 = arith.constant 0 : index
      %c0_26 = arith.constant 0 : index
      %42 = vector.load %arg8[%c0_25, %c0_26] : memref<8x32xf32, #tpu.memory_space<vmem>>, vector<8x32xf32>
      tpu.vector_store %arg8[%c0_25, %c0_26], %41 {strides = array<i32>} : memref<8x32xf32, #tpu.memory_space<vmem>>, vector<8x32xf32>,
    } else {
    }
    return
  }
  func.func @transform_0(%arg0: i32, %arg1: i32) -> (i32, i32) {
    %c0_i32 = arith.constant 0 : i32
    return %arg0, %arg1 : i32, i32
  }
  func.func @transform_1(%arg0: i32, %arg1: i32) -> (i32, i32) {
    %c0_i32 = arith.constant 0 : i32
    %c0_i32_0 = arith.constant 0 : i32
    return %arg1, %c0_i32 : i32, i32
  }
  func.func @transform_2(%arg0: i32, %arg1: i32) -> (i32, i32) {
    %c0_i32 = arith.constant 0 : i32
    %c0_i32_0 = arith.constant 0 : i32
    %c0_i32_1 = arith.constant 0 : i32
    return %c0_i32, %c0_i32_0 : i32, i32
  }
  func.func @transform_3(%arg0: i32, %arg1: i32) -> (i32, i32) {
    %c0_i32 = arith.constant 0 : i32
    %c0_i32_0 = arith.constant 0 : i32
    return %arg0, %c0_i32 : i32, i32
  }
  func.func @transform_4(%arg0: i32, %arg1: i32) -> (i32, i32) {
    %c0_i32 = arith.constant 0 : i32
    %c0_i32_0 = arith.constant 0 : i32
    %c0_i32_1 = arith.constant 0 : i32
    return %c0_i32, %c0_i32_0 : i32, i32
  }
  func.func @transform_5(%arg0: i32, %arg1: i32) -> (i32, i32) {
    %c0_i32 = arith.constant 0 : i32
    %c0_i32_0 = arith.constant 0 : i32
    %c0_i32_1 = arith.constant 0 : i32
    return %c0_i32, %c0_i32_0 : i32, i32
  }
  func.func @transform_6(%arg0: i32, %arg1: i32) -> (i32, i32) {
    %c0_i32 = arith.constant 0 : i32
    %c0_i32_0 = arith.constant 0 : i32
    return %arg0, %c0_i32 : i32, i32
  }
}

module attributes {stable_mosaic.version = 11 : i64} {
  func.func @_linear_kernel(%arg0: i32, %arg1: i32, %arg2: i32, %arg3: memref<8x32xf32, #tpu.memory_space<vmem>>, %arg4: memref<32x32xbf16, #tpu.memory_space<vmem>>, %arg5: memref<1x32xf32, #tpu.memory_space<vmem>>, %arg6: memref<8x32xf32, #tpu.memory_space<vmem>>, %arg7: memref<8x32xf32, #tpu.memory_space<vmem>>) attributes {dimension_semantics = [#tpu.dimension_semantics<parallel>, #tpu.dimension_semantics<parallel>, #tpu.dimension_semantics<arbitrary>], iteration_bounds = array<i64: 2, 1, 1>, scalar_prefetch = 0 : i64, scratch_operands = 1 : i64, tpu.core_type = #tpu.core_type<tc>, window_params = [{transform_indices = @transform_0, window_bounds = array<i64: 8, 32>}, {transform_indices = @transform_1, window_bounds = array<i64: 32, 32>}, {transform_indices = @transform_2, window_bounds = array<i64: 1, 32>}, {transform_indices = @transform_3, window_bounds = array<i64: 8, 32>}]} {
    %c0_i32 = arith.constant 0 : i32
    %0 = arith.cmpi eq, %arg2, %c0_i32 : i32
    %1 = arith.extui %0 : i1 to i32
    %c0_i32_0 = arith.constant 0 : i32
    %2 = arith.cmpi ne, %1, %c0_i32_0 : i32
    scf.if %2 {
      %cst_10 = arith.constant 0.000000e+00 : f32
      %13 = vector.broadcast %cst_10 : f32 to vector<8x32xf32>
      %c0_11 = arith.constant 0 : index
      %c0_12 = arith.constant 0 : index
      %14 = vector.load %arg7[%c0_11, %c0_12] : memref<8x32xf32, #tpu.memory_space<vmem>>, vector<8x32xf32>
      tpu.vector_store %arg7[%c0_11, %c0_12], %13 {strides = array<i32>} : memref<8x32xf32, #tpu.memory_space<vmem>>, vector<8x32xf32>,
    } else {
    }
    %c0 = arith.constant 0 : index
    %c0_1 = arith.constant 0 : index
    %3 = vector.load %arg7[%c0, %c0_1] : memref<8x32xf32, #tpu.memory_space<vmem>>, vector<8x32xf32>
    %c0_2 = arith.constant 0 : index
    %c0_3 = arith.constant 0 : index
    %4 = vector.load %arg3[%c0_2, %c0_3] : memref<8x32xf32, #tpu.memory_space<vmem>>, vector<8x32xf32>
    %5 = arith.truncf %4 : vector<8x32xf32> to vector<8x32xbf16>
    %c0_4 = arith.constant 0 : index
    %c0_5 = arith.constant 0 : index
    %6 = vector.load %arg4[%c0_4, %c0_5] : memref<32x32xbf16, #tpu.memory_space<vmem>>, vector<32x32xbf16>
    %cst = arith.constant dense<0.000000e+00> : vector<8x32xf32>
    %7 = tpu.matmul %5, %6, %cst {dimension_numbers = #tpu.dot_dimension_numbers<[1], [0], [0], [1], [0, 0, 1, 1], [], []>} : vector<8x32xbf16>, vector<32x32xbf16>, vector<8x32xf32> -> vector<8x32xf32>
    %8 = arith.addf %3, %7 : vector<8x32xf32>
    %c0_6 = arith.constant 0 : index
    %c0_7 = arith.constant 0 : index
    %9 = vector.load %arg7[%c0_6, %c0_7] : memref<8x32xf32, #tpu.memory_space<vmem>>, vector<8x32xf32>
    tpu.vector_store %arg7[%c0_6, %c0_7], %8 {strides = array<i32>} : memref<8x32xf32, #tpu.memory_space<vmem>>, vector<8x32xf32>,
    %c0_i32_8 = arith.constant 0 : i32
    %10 = arith.cmpi eq, %arg2, %c0_i32_8 : i32
    %11 = arith.extui %10 : i1 to i32
    %c0_i32_9 = arith.constant 0 : i32
    %12 = arith.cmpi ne, %11, %c0_i32_9 : i32
    scf.if %12 {
      %c0_10 = arith.constant 0 : index
      %c0_11 = arith.constant 0 : index
      %13 = vector.load %arg7[%c0_10, %c0_11] : memref<8x32xf32, #tpu.memory_space<vmem>>, vector<8x32xf32>
      %c0_12 = arith.constant 0 : index
      %c0_13 = arith.constant 0 : index
      %14 = vector.load %arg5[%c0_12, %c0_13] : memref<1x32xf32, #tpu.memory_space<vmem>>, vector<1x32xf32>
      %15 = vector.broadcast %14 : vector<1x32xf32> to vector<8x32xf32>
      %16 = arith.addf %13, %15 : vector<8x32xf32>
      %c0_14 = arith.constant 0 : index
      %c0_15 = arith.constant 0 : index
      %17 = vector.load %arg6[%c0_14, %c0_15] : memref<8x32xf32, #tpu.memory_space<vmem>>, vector<8x32xf32>
      tpu.vector_store %arg6[%c0_14, %c0_15], %16 {strides = array<i32>} : memref<8x32xf32, #tpu.memory_space<vmem>>, vector<8x32xf32>,
    } else {
    }
    return
  }
  func.func @transform_0(%arg0: i32, %arg1: i32, %arg2: i32) -> (i32, i32) {
    %c0_i32 = arith.constant 0 : i32
    return %arg0, %arg2 : i32, i32
  }
  func.func @transform_1(%arg0: i32, %arg1: i32, %arg2: i32) -> (i32, i32) {
    %c0_i32 = arith.constant 0 : i32
    return %arg2, %arg1 : i32, i32
  }
  func.func @transform_2(%arg0: i32, %arg1: i32, %arg2: i32) -> (i32, i32) {
    %c0_i32 = arith.constant 0 : i32
    %c0_i32_0 = arith.constant 0 : i32
    return %c0_i32, %arg1 : i32, i32
  }
  func.func @transform_3(%arg0: i32, %arg1: i32, %arg2: i32) -> (i32, i32) {
    %c0_i32 = arith.constant 0 : i32
    return %arg0, %arg1 : i32, i32
  }
}

module attributes {stable_mosaic.version = 11 : i64} {
  func.func @_linear_kernel(%arg0: i32, %arg1: i32, %arg2: i32, %arg3: memref<8x32xf32, #tpu.memory_space<vmem>>, %arg4: memref<32x64xbf16, #tpu.memory_space<vmem>>, %arg5: memref<1x64xf32, #tpu.memory_space<vmem>>, %arg6: memref<8x64xf32, #tpu.memory_space<vmem>>, %arg7: memref<8x64xf32, #tpu.memory_space<vmem>>) attributes {dimension_semantics = [#tpu.dimension_semantics<parallel>, #tpu.dimension_semantics<parallel>, #tpu.dimension_semantics<arbitrary>], iteration_bounds = array<i64: 2, 1, 1>, scalar_prefetch = 0 : i64, scratch_operands = 1 : i64, tpu.core_type = #tpu.core_type<tc>, window_params = [{transform_indices = @transform_0, window_bounds = array<i64: 8, 32>}, {transform_indices = @transform_1, window_bounds = array<i64: 32, 64>}, {transform_indices = @transform_2, window_bounds = array<i64: 1, 64>}, {transform_indices = @transform_3, window_bounds = array<i64: 8, 64>}]} {
    %c0_i32 = arith.constant 0 : i32
    %0 = arith.cmpi eq, %arg2, %c0_i32 : i32
    %1 = arith.extui %0 : i1 to i32
    %c0_i32_0 = arith.constant 0 : i32
    %2 = arith.cmpi ne, %1, %c0_i32_0 : i32
    scf.if %2 {
      %cst_10 = arith.constant 0.000000e+00 : f32
      %13 = vector.broadcast %cst_10 : f32 to vector<8x64xf32>
      %c0_11 = arith.constant 0 : index
      %c0_12 = arith.constant 0 : index
      %14 = vector.load %arg7[%c0_11, %c0_12] : memref<8x64xf32, #tpu.memory_space<vmem>>, vector<8x64xf32>
      tpu.vector_store %arg7[%c0_11, %c0_12], %13 {strides = array<i32>} : memref<8x64xf32, #tpu.memory_space<vmem>>, vector<8x64xf32>,
    } else {
    }
    %c0 = arith.constant 0 : index
    %c0_1 = arith.constant 0 : index
    %3 = vector.load %arg7[%c0, %c0_1] : memref<8x64xf32, #tpu.memory_space<vmem>>, vector<8x64xf32>
    %c0_2 = arith.constant 0 : index
    %c0_3 = arith.constant 0 : index
    %4 = vector.load %arg3[%c0_2, %c0_3] : memref<8x32xf32, #tpu.memory_space<vmem>>, vector<8x32xf32>
    %5 = arith.truncf %4 : vector<8x32xf32> to vector<8x32xbf16>
    %c0_4 = arith.constant 0 : index
    %c0_5 = arith.constant 0 : index
    %6 = vector.load %arg4[%c0_4, %c0_5] : memref<32x64xbf16, #tpu.memory_space<vmem>>, vector<32x64xbf16>
    %cst = arith.constant dense<0.000000e+00> : vector<8x64xf32>
    %7 = tpu.matmul %5, %6, %cst {dimension_numbers = #tpu.dot_dimension_numbers<[1], [0], [0], [1], [0, 0, 1, 1], [], []>} : vector<8x32xbf16>, vector<32x64xbf16>, vector<8x64xf32> -> vector<8x64xf32>
    %8 = arith.addf %3, %7 : vector<8x64xf32>
    %c0_6 = arith.constant 0 : index
    %c0_7 = arith.constant 0 : index
    %9 = vector.load %arg7[%c0_6, %c0_7] : memref<8x64xf32, #tpu.memory_space<vmem>>, vector<8x64xf32>
    tpu.vector_store %arg7[%c0_6, %c0_7], %8 {strides = array<i32>} : memref<8x64xf32, #tpu.memory_space<vmem>>, vector<8x64xf32>,
    %c0_i32_8 = arith.constant 0 : i32
    %10 = arith.cmpi eq, %arg2, %c0_i32_8 : i32
    %11 = arith.extui %10 : i1 to i32
    %c0_i32_9 = arith.constant 0 : i32
    %12 = arith.cmpi ne, %11, %c0_i32_9 : i32
    scf.if %12 {
      %c0_10 = arith.constant 0 : index
      %c0_11 = arith.constant 0 : index
      %13 = vector.load %arg7[%c0_10, %c0_11] : memref<8x64xf32, #tpu.memory_space<vmem>>, vector<8x64xf32>
      %c0_12 = arith.constant 0 : index
      %c0_13 = arith.constant 0 : index
      %14 = vector.load %arg5[%c0_12, %c0_13] : memref<1x64xf32, #tpu.memory_space<vmem>>, vector<1x64xf32>
      %15 = vector.broadcast %14 : vector<1x64xf32> to vector<8x64xf32>
      %16 = arith.addf %13, %15 : vector<8x64xf32>
      %c0_14 = arith.constant 0 : index
      %c0_15 = arith.constant 0 : index
      %17 = vector.load %arg6[%c0_14, %c0_15] : memref<8x64xf32, #tpu.memory_space<vmem>>, vector<8x64xf32>
      tpu.vector_store %arg6[%c0_14, %c0_15], %16 {strides = array<i32>} : memref<8x64xf32, #tpu.memory_space<vmem>>, vector<8x64xf32>,
    } else {
    }
    return
  }
  func.func @transform_0(%arg0: i32, %arg1: i32, %arg2: i32) -> (i32, i32) {
    %c0_i32 = arith.constant 0 : i32
    return %arg0, %arg2 : i32, i32
  }
  func.func @transform_1(%arg0: i32, %arg1: i32, %arg2: i32) -> (i32, i32) {
    %c0_i32 = arith.constant 0 : i32
    return %arg2, %arg1 : i32, i32
  }
  func.func @transform_2(%arg0: i32, %arg1: i32, %arg2: i32) -> (i32, i32) {
    %c0_i32 = arith.constant 0 : i32
    %c0_i32_0 = arith.constant 0 : i32
    return %c0_i32, %arg1 : i32, i32
  }
  func.func @transform_3(%arg0: i32, %arg1: i32, %arg2: i32) -> (i32, i32) {
    %c0_i32 = arith.constant 0 : i32
    return %arg0, %arg1 : i32, i32
  }
}

module attributes {stable_mosaic.version = 11 : i64} {
  func.func @_attn_kernel(%arg0: i32, %arg1: memref<1x8x4x8xf32, #tpu.memory_space<vmem>>, %arg2: memref<1x8x1x4x8xf32, #tpu.memory_space<vmem>>, %arg3: memref<1x8x1x4x8xf32, #tpu.memory_space<vmem>>, %arg4: memref<1x8x32xf32, #tpu.memory_space<vmem>>) attributes {dimension_semantics = [#tpu.dimension_semantics<parallel>], iteration_bounds = array<i64: 2>, scalar_prefetch = 0 : i64, scratch_operands = 0 : i64, tpu.core_type = #tpu.core_type<tc>, window_params = [{transform_indices = @transform_0, window_bounds = array<i64: 1, 8, 4, 8>}, {transform_indices = @transform_1, window_bounds = array<i64: 1, 8, 1, 4, 8>}, {transform_indices = @transform_2, window_bounds = array<i64: 1, 8, 1, 4, 8>}, {transform_indices = @transform_3, window_bounds = array<i64: 1, 8, 32>}]} {
    %c0 = arith.constant 0 : index
    %c0_0 = arith.constant 0 : index
    %c0_1 = arith.constant 0 : index
    %c0_2 = arith.constant 0 : index
    %0 = vector.load %arg1[%c0, %c0_0, %c0_1, %c0_2] : memref<1x8x4x8xf32, #tpu.memory_space<vmem>>, vector<1x8x4x8xf32>
    %1 = vector.shape_cast %0 : vector<1x8x4x8xf32> to vector<8x4x8xf32>
    %2 = arith.truncf %1 : vector<8x4x8xf32> to vector<8x4x8xbf16>
    %c0_3 = arith.constant 0 : index
    %c0_4 = arith.constant 0 : index
    %c0_5 = arith.constant 0 : index
    %c0_6 = arith.constant 0 : index
    %c0_7 = arith.constant 0 : index
    %3 = vector.load %arg2[%c0_3, %c0_4, %c0_5, %c0_6, %c0_7] : memref<1x8x1x4x8xf32, #tpu.memory_space<vmem>>, vector<1x8x1x4x8xf32>
    %4 = vector.shape_cast %3 : vector<1x8x1x4x8xf32> to vector<8x4x8xf32>
    %5 = arith.truncf %4 : vector<8x4x8xf32> to vector<8x4x8xbf16>
    %c0_8 = arith.constant 0 : index
    %c0_9 = arith.constant 0 : index
    %c0_10 = arith.constant 0 : index
    %c0_11 = arith.constant 0 : index
    %c0_12 = arith.constant 0 : index
    %6 = vector.load %arg3[%c0_8, %c0_9, %c0_10, %c0_11, %c0_12] : memref<1x8x1x4x8xf32, #tpu.memory_space<vmem>>, vector<1x8x1x4x8xf32>
    %7 = vector.shape_cast %6 : vector<1x8x1x4x8xf32> to vector<8x4x8xf32>
    %8 = arith.truncf %7 : vector<8x4x8xf32> to vector<8x4x8xbf16>
    %cst = arith.constant dense<0.000000e+00> : vector<4x8x8xf32>
    %9 = tpu.matmul %2, %5, %cst {dimension_numbers = #tpu.dot_dimension_numbers<[2], [2], [0], [0], [0, 1, 0, 0, 1, 0], [1], [1]>} : vector<8x4x8xbf16>, vector<8x4x8xbf16>, vector<4x8x8xf32> -> vector<4x8x8xf32>
    %cst_13 = arith.constant dense<0xFF800000> : vector<4x8xf32>
    %10 = vector.multi_reduction <maximumf>, %9, %cst_13 [2] : vector<4x8x8xf32> to vector<4x8xf32>
    %11 = vector.shape_cast %10 : vector<4x8xf32> to vector<4x8x1xf32>
    %12 = vector.broadcast %11 : vector<4x8x1xf32> to vector<4x8x8xf32>
    %13 = arith.subf %9, %12 : vector<4x8x8xf32>
    %14 = math.exp %13 : vector<4x8x8xf32>
    %cst_14 = arith.constant dense<0.000000e+00> : vector<4x8xf32>
    %15 = vector.multi_reduction <add>, %14, %cst_14 [2] : vector<4x8x8xf32> to vector<4x8xf32>
    %16 = vector.shape_cast %15 : vector<4x8xf32> to vector<4x8x1xf32>
    %17 = arith.truncf %14 : vector<4x8x8xf32> to vector<4x8x8xbf16>
    %cst_15 = arith.constant dense<0.000000e+00> : vector<4x8x8xf32>
    %18 = tpu.matmul %17, %8, %cst_15 {dimension_numbers = #tpu.dot_dimension_numbers<[2], [0], [1], [2], [0, 0, 0, 1, 1, 2], [0], [1]>} : vector<4x8x8xbf16>, vector<8x4x8xbf16>, vector<4x8x8xf32> -> vector<4x8x8xf32>
    %19 = tpu.reciprocal %16 {approx = true} : vector<4x8x1xf32> -> vector<4x8x1xf32>
    %20 = vector.broadcast %19 : vector<4x8x1xf32> to vector<4x8x8xf32>
    %21 = arith.mulf %18, %20 : vector<4x8x8xf32>
    %22 = tpu.transpose %21, [1, 0, 2] : vector<4x8x8xf32> -> vector<8x4x8xf32>
    %23 = vector.shape_cast %22 : vector<8x4x8xf32> to vector<8x32xf32>
    %c0_16 = arith.constant 0 : index
    %c0_17 = arith.constant 0 : index
    %c0_18 = arith.constant 0 : index
    %24 = vector.load %arg4[%c0_16, %c0_17, %c0_18] : memref<1x8x32xf32, #tpu.memory_space<vmem>>, vector<1x8x32xf32>
    %25 = vector.shape_cast %24 : vector<1x8x32xf32> to vector<8x32xf32>
    %26 = vector.shape_cast %23 : vector<8x32xf32> to vector<1x8x32xf32>
    tpu.vector_store %arg4[%c0_16, %c0_17, %c0_18], %26 {strides = array<i32>} : memref<1x8x32xf32, #tpu.memory_space<vmem>>, vector<1x8x32xf32>,
    return
  }
  func.func @transform_0(%arg0: i32) -> (i32, i32, i32, i32) {
    %c0_i32 = arith.constant 0 : i32
    %c0_i32_0 = arith.constant 0 : i32
    %c0_i32_1 = arith.constant 0 : i32
    %c0_i32_2 = arith.constant 0 : i32
    return %arg0, %c0_i32, %c0_i32_0, %c0_i32_1 : i32, i32, i32, i32
  }
  func.func @transform_1(%arg0: i32) -> (i32, i32, i32, i32, i32) {
    %c0_i32 = arith.constant 0 : i32
    %c0_i32_0 = arith.constant 0 : i32
    %c0_i32_1 = arith.constant 0 : i32
    %c0_i32_2 = arith.constant 0 : i32
    %c0_i32_3 = arith.constant 0 : i32
    return %arg0, %c0_i32, %c0_i32_0, %c0_i32_1, %c0_i32_2 : i32, i32, i32, i32, i32
  }
  func.func @transform_2(%arg0: i32) -> (i32, i32, i32, i32, i32) {
    %c0_i32 = arith.constant 0 : i32
    %c1_i32 = arith.constant 1 : i32
    %c0_i32_0 = arith.constant 0 : i32
    %c0_i32_1 = arith.constant 0 : i32
    %c0_i32_2 = arith.constant 0 : i32
    return %arg0, %c0_i32, %c1_i32, %c0_i32_0, %c0_i32_1 : i32, i32, i32, i32, i32
  }
  func.func @transform_3(%arg0: i32) -> (i32, i32, i32) {
    %c0_i32 = arith.constant 0 : i32
    %c0_i32_0 = arith.constant 0 : i32
    %c0_i32_1 = arith.constant 0 : i32
    return %arg0, %c0_i32, %c0_i32_0 : i32, i32, i32
  }
}

module attributes {stable_mosaic.version = 11 : i64} {
  func.func @_log_softmax_kernel(%arg0: i32, %arg1: memref<8x32xf32, #tpu.memory_space<vmem>>, %arg2: memref<8x32xf32, #tpu.memory_space<vmem>>) attributes {dimension_semantics = [#tpu.dimension_semantics<parallel>], iteration_bounds = array<i64: 2>, scalar_prefetch = 0 : i64, scratch_operands = 0 : i64, tpu.core_type = #tpu.core_type<tc>, window_params = [{transform_indices = @transform_0, window_bounds = array<i64: 8, 32>}, {transform_indices = @transform_1, window_bounds = array<i64: 8, 32>}]} {
    %c0 = arith.constant 0 : index
    %c0_0 = arith.constant 0 : index
    %0 = vector.load %arg1[%c0, %c0_0] : memref<8x32xf32, #tpu.memory_space<vmem>>, vector<8x32xf32>
    %cst = arith.constant dense<0xFF800000> : vector<8xf32>
    %1 = vector.multi_reduction <maximumf>, %0, %cst [1] : vector<8x32xf32> to vector<8xf32>
    %2 = vector.shape_cast %1 : vector<8xf32> to vector<8x1xf32>
    %3 = vector.broadcast %2 : vector<8x1xf32> to vector<8x32xf32>
    %4 = arith.subf %0, %3 : vector<8x32xf32>
    %5 = math.exp %4 : vector<8x32xf32>
    %cst_1 = arith.constant dense<0.000000e+00> : vector<8xf32>
    %6 = vector.multi_reduction <add>, %5, %cst_1 [1] : vector<8x32xf32> to vector<8xf32>
    %7 = vector.shape_cast %6 : vector<8xf32> to vector<8x1xf32>
    %8 = math.log %7 : vector<8x1xf32>
    %9 = vector.broadcast %8 : vector<8x1xf32> to vector<8x32xf32>
    %10 = arith.subf %4, %9 : vector<8x32xf32>
    %c0_2 = arith.constant 0 : index
    %c0_3 = arith.constant 0 : index
    %11 = vector.load %arg2[%c0_2, %c0_3] : memref<8x32xf32, #tpu.memory_space<vmem>>, vector<8x32xf32>
    tpu.vector_store %arg2[%c0_2, %c0_3], %10 {strides = array<i32>} : memref<8x32xf32, #tpu.memory_space<vmem>>, vector<8x32xf32>,
    return
  }
  func.func @transform_0(%arg0: i32) -> (i32, i32) {
    %c0_i32 = arith.constant 0 : i32
    %c0_i32_0 = arith.constant 0 : i32
    return %arg0, %c0_i32 : i32, i32
  }
  func.func @transform_1(%arg0: i32) -> (i32, i32) {
    %c0_i32 = arith.constant 0 : i32
    %c0_i32_0 = arith.constant 0 : i32
    return %arg0, %c0_i32 : i32, i32
  }
}

module attributes {stable_mosaic.version = 11 : i64} {
  func.func @_ffn_add_norm_kernel(%arg0: i32, %arg1: i32, %arg2: memref<8x32xf32, #tpu.memory_space<vmem>>, %arg3: memref<32x128xbf16, #tpu.memory_space<vmem>>, %arg4: memref<1x128xf32, #tpu.memory_space<vmem>>, %arg5: memref<128x32xbf16, #tpu.memory_space<vmem>>, %arg6: memref<1x32xf32, #tpu.memory_space<vmem>>, %arg7: memref<8x32xf32, #tpu.memory_space<vmem>>, %arg8: memref<1x32xf32, #tpu.memory_space<vmem>>, %arg9: memref<1x32xf32, #tpu.memory_space<vmem>>, %arg10: memref<8x32xf32, #tpu.memory_space<vmem>>, %arg11: memref<8x32xf32, #tpu.memory_space<vmem>>) attributes {dimension_semantics = [#tpu.dimension_semantics<parallel>, #tpu.dimension_semantics<arbitrary>], iteration_bounds = array<i64: 2, 1>, scalar_prefetch = 0 : i64, scratch_operands = 1 : i64, tpu.core_type = #tpu.core_type<tc>, window_params = [{transform_indices = @transform_0, window_bounds = array<i64: 8, 32>}, {transform_indices = @transform_1, window_bounds = array<i64: 32, 128>}, {transform_indices = @transform_2, window_bounds = array<i64: 1, 128>}, {transform_indices = @transform_3, window_bounds = array<i64: 128, 32>}, {pipeline_mode = #tpu.pipeline_mode<synchronous>, transform_indices = @transform_4, window_bounds = array<i64: 1, 32>}, {transform_indices = @transform_5, window_bounds = array<i64: 8, 32>}, {pipeline_mode = #tpu.pipeline_mode<synchronous>, transform_indices = @transform_6, window_bounds = array<i64: 1, 32>}, {pipeline_mode = #tpu.pipeline_mode<synchronous>, transform_indices = @transform_7, window_bounds = array<i64: 1, 32>}, {transform_indices = @transform_8, window_bounds = array<i64: 8, 32>}]} {
    %c0_i32 = arith.constant 0 : i32
    %0 = arith.cmpi eq, %arg1, %c0_i32 : i32
    %1 = arith.extui %0 : i1 to i32
    %c0_i32_0 = arith.constant 0 : i32
    %2 = arith.cmpi ne, %1, %c0_i32_0 : i32
    scf.if %2 {
      %cst_16 = arith.constant 0.000000e+00 : f32
      %21 = vector.broadcast %cst_16 : f32 to vector<8x32xf32>
      %c0_17 = arith.constant 0 : index
      %c0_18 = arith.constant 0 : index
      %22 = vector.load %arg11[%c0_17, %c0_18] : memref<8x32xf32, #tpu.memory_space<vmem>>, vector<8x32xf32>
      tpu.vector_store %arg11[%c0_17, %c0_18], %21 {strides = array<i32>} : memref<8x32xf32, #tpu.memory_space<vmem>>, vector<8x32xf32>,
    } else {
    }
    %c0 = arith.constant 0 : index
    %c0_1 = arith.constant 0 : index
    %3 = vector.load %arg2[%c0, %c0_1] : memref<8x32xf32, #tpu.memory_space<vmem>>, vector<8x32xf32>
    %4 = arith.truncf %3 : vector<8x32xf32> to vector<8x32xbf16>
    %c0_2 = arith.constant 0 : index
    %c0_3 = arith.constant 0 : index
    %5 = vector.load %arg3[%c0_2, %c0_3] : memref<32x128xbf16, #tpu.memory_space<vmem>>, vector<32x128xbf16>
    %cst = arith.constant dense<0.000000e+00> : vector<8x128xf32>
    %6 = tpu.matmul %4, %5, %cst {dimension_numbers = #tpu.dot_dimension_numbers<[1], [0], [0], [1], [0, 0, 1, 1], [], []>} : vector<8x32xbf16>, vector<32x128xbf16>, vector<8x128xf32> -> vector<8x128xf32>
    %c0_4 = arith.constant 0 : index
    %c0_5 = arith.constant 0 : index
    %7 = vector.load %arg4[%c0_4, %c0_5] : memref<1x128xf32, #tpu.memory_space<vmem>>, vector<1x128xf32>
    %8 = vector.broadcast %7 : vector<1x128xf32> to vector<8x128xf32>
    %9 = arith.addf %6, %8 : vector<8x128xf32>
    %cst_6 = arith.constant 0.000000e+00 : f32
    %10 = vector.broadcast %cst_6 : f32 to vector<8x128xf32>
    %11 = arith.maximumf %9, %10 : vector<8x128xf32>
    %c0_7 = arith.constant 0 : index
    %c0_8 = arith.constant 0 : index
    %12 = vector.load %arg11[%c0_7, %c0_8] : memref<8x32xf32, #tpu.memory_space<vmem>>, vector<8x32xf32>
    %13 = arith.truncf %11 : vector<8x128xf32> to vector<8x128xbf16>
    %c0_9 = arith.constant 0 : index
    %c0_10 = arith.constant 0 : index
    %14 = vector.load %arg5[%c0_9, %c0_10] : memref<128x32xbf16, #tpu.memory_space<vmem>>, vector<128x32xbf16>
    %cst_11 = arith.constant dense<0.000000e+00> : vector<8x32xf32>
    %15 = tpu.matmul %13, %14, %cst_11 {dimension_numbers = #tpu.dot_dimension_numbers<[1], [0], [0], [1], [0, 0, 1, 1], [], []>} : vector<8x128xbf16>, vector<128x32xbf16>, vector<8x32xf32> -> vector<8x32xf32>
    %16 = arith.addf %12, %15 : vector<8x32xf32>
    %c0_12 = arith.constant 0 : index
    %c0_13 = arith.constant 0 : index
    %17 = vector.load %arg11[%c0_12, %c0_13] : memref<8x32xf32, #tpu.memory_space<vmem>>, vector<8x32xf32>
    tpu.vector_store %arg11[%c0_12, %c0_13], %16 {strides = array<i32>} : memref<8x32xf32, #tpu.memory_space<vmem>>, vector<8x32xf32>,
    %c0_i32_14 = arith.constant 0 : i32
    %18 = arith.cmpi eq, %arg1, %c0_i32_14 : i32
    %19 = arith.extui %18 : i1 to i32
    %c0_i32_15 = arith.constant 0 : i32
    %20 = arith.cmpi ne, %19, %c0_i32_15 : i32
    scf.if %20 {
      %c0_16 = arith.constant 0 : index
      %c0_17 = arith.constant 0 : index
      %21 = vector.load %arg11[%c0_16, %c0_17] : memref<8x32xf32, #tpu.memory_space<vmem>>, vector<8x32xf32>
      %c0_18 = arith.constant 0 : index
      %c0_19 = arith.constant 0 : index
      %22 = vector.load %arg6[%c0_18, %c0_19] : memref<1x32xf32, #tpu.memory_space<vmem>>, vector<1x32xf32>
      %23 = vector.broadcast %22 : vector<1x32xf32> to vector<8x32xf32>
      %24 = arith.addf %21, %23 : vector<8x32xf32>
      %c0_20 = arith.constant 0 : index
      %c0_21 = arith.constant 0 : index
      %25 = vector.load %arg7[%c0_20, %c0_21] : memref<8x32xf32, #tpu.memory_space<vmem>>, vector<8x32xf32>
      %26 = arith.addf %24, %25 : vector<8x32xf32>
      %c0_22 = arith.constant 0 : index
      %c0_23 = arith.constant 0 : index
      %27 = vector.load %arg8[%c0_22, %c0_23] : memref<1x32xf32, #tpu.memory_space<vmem>>, vector<1x32xf32>
      %c0_24 = arith.constant 0 : index
      %c0_25 = arith.constant 0 : index
      %28 = vector.load %arg9[%c0_24, %c0_25] : memref<1x32xf32, #tpu.memory_space<vmem>>, vector<1x32xf32>
      %cst_26 = arith.constant dense<0.000000e+00> : vector<8xf32>
      %29 = vector.multi_reduction <add>, %26, %cst_26 [1] : vector<8x32xf32> to vector<8xf32>
      %30 = vector.shape_cast %29 : vector<8xf32> to vector<8x1xf32>
      %cst_27 = arith.constant 3.200000e+01 : f32
      %31 = vector.broadcast %cst_27 : f32 to vector<8x1xf32>
      %32 = arith.divf %30, %31 : vector<8x1xf32>
      %33 = vector.broadcast %32 : vector<8x1xf32> to vector<8x32xf32>
      %34 = arith.subf %26, %33 : vector<8x32xf32>
      %35 = arith.mulf %34, %34 : vector<8x32xf32>
      %cst_28 = arith.constant dense<0.000000e+00> : vector<8xf32>
      %36 = vector.multi_reduction <add>, %35, %cst_28 [1] : vector<8x32xf32> to vector<8xf32>
      %37 = vector.shape_cast %36 : vector<8xf32> to vector<8x1xf32>
      %cst_29 = arith.constant 0.0322580636 : f32
      %38 = vector.broadcast %cst_29 : f32 to vector<8x1xf32>
      %39 = arith.mulf %37, %38 : vector<8x1xf32>
      %40 = math.sqrt %39 : vector<8x1xf32>
      %cst_30 = arith.constant 9.99999997E-7 : f32
      %41 = vector.broadcast %cst_30 : f32 to vector<8x1xf32>
      %42 = arith.addf %40, %41 : vector<8x1xf32>
      %43 = tpu.reciprocal %42 : vector<8x1xf32> -> vector<8x1xf32>
      %44 = vector.broadcast %27 : vector<1x32xf32> to vector<8x32xf32>
      %45 = arith.mulf %44, %34 : vector<8x32xf32>
      %46 = vector.broadcast %43 : vector<8x1xf32> to vector<8x32xf32>
      %47 = arith.mulf %45, %46 : vector<8x32xf32>
      %48 = vector.broadcast %28 : vector<1x32xf32> to vector<8x32xf32>
      %49 = arith.addf %47, %48 : vector<8x32xf32>
      %c0_31 = arith.constant 0 : index
      %c0_32 = arith.constant 0 : index
      %50 = vector.load %arg10[%c0_31, %c0_32] : memref<8x32xf32, #tpu.memory_space<vmem>>, vector<8x32xf32>
      tpu.vector_store %arg10[%c0_31, %c0_32], %49 {strides = array<i32>} : memref<8x32xf32, #tpu.memory_space<vmem>>, vector<8x32xf32>,
    } else {
    }
    return
  }
  func.func @transform_0(%arg0: i32, %arg1: i32) -> (i32, i32) {
    %c0_i32 = arith.constant 0 : i32
    %c0_i32_0 = arith.constant 0 : i32
    return %arg0, %c0_i32 : i32, i32
  }
  func.func @transform_1(%arg0: i32, %arg1: i32) -> (i32, i32) {
    %c0_i32 = arith.constant 0 : i32
    %c0_i32_0 = arith.constant 0 : i32
    return %c0_i32, %arg1 : i32, i32
  }
  func.func @transform_2(%arg0: i32, %arg1: i32) -> (i32, i32) {
    %c0_i32 = arith.constant 0 : i32
    %c0_i32_0 = arith.constant 0 : i32
    return %c0_i32, %arg1 : i32, i32
  }
  func.func @transform_3(%arg0: i32, %arg1: i32) -> (i32, i32) {
    %c0_i32 = arith.constant 0 : i32
    %c0_i32_0 = arith.constant 0 : i32
    return %arg1, %c0_i32 : i32, i32
  }
  func.func @transform_4(%arg0: i32, %arg1: i32) -> (i32, i32) {
    %c0_i32 = arith.constant 0 : i32
    %c0_i32_0 = arith.constant 0 : i32
    %c0_i32_1 = arith.constant 0 : i32
    return %c0_i32, %c0_i32_0 : i32, i32
  }
  func.func @transform_5(%arg0: i32, %arg1: i32) -> (i32, i32) {
    %c0_i32 = arith.constant 0 : i32
    %c0_i32_0 = arith.constant 0 : i32
    return %arg0, %c0_i32 : i32, i32
  }
  func.func @transform_6(%arg0: i32, %arg1: i32) -> (i32, i32) {
    %c0_i32 = arith.constant 0 : i32
    %c0_i32_0 = arith.constant 0 : i32
    %c0_i32_1 = arith.constant 0 : i32
    return %c0_i32, %c0_i32_0 : i32, i32
  }
  func.func @transform_7(%arg0: i32, %arg1: i32) -> (i32, i32) {
    %c0_i32 = arith.constant 0 : i32
    %c0_i32_0 = arith.constant 0 : i32
    %c0_i32_1 = arith.constant 0 : i32
    return %c0_i32, %c0_i32_0 : i32, i32
  }
  func.func @transform_8(%arg0: i32, %arg1: i32) -> (i32, i32) {
    %c0_i32 = arith.constant 0 : i32
    %c0_i32_0 = arith.constant 0 : i32
    return %arg0, %c0_i32 : i32, i32
  }
}

</mosaic_0001>

<bundles_post_ra>
// kernel: decoder_stack_forward.21
= control target key start
LH: loop header
LB: loop body
LE: loop exit
PB: predicated region body
PF: predicated region fallthrough
CT: control target
= control target key end

     0   :  { %s544_s12 = smov 0   ;;  %s546_s13 = smov 0   ;;  %s590_s0 = inlined_call_operand.vmem [shape: f32[16,32], index: 0, kind: input, shape index: {}]   ;;  %s591_s1 = inlined_call_operand.vmem [shape: bf16[32,32], index: 1, kind: input, shape index: {}]   ;;  %s592_s2 = inlined_call_operand.vmem [shape: f32[1,32], index: 2, kind: input, shape index: {}]   ;;  %s593_s3 = inlined_call_operand.vmem [shape: f32[16,32], index: 3, kind: output, shape index: {}]  }
   0x1   :  { %s548_s14 = smov 0  }
   0x2 LB: > { %s32_s15 = sadd.s32 1, %s516_s13  ;;  %p450_p0 = scmp.ge.s32.totalorder %s520_s14, 1  ;;  %s520_s14 = sphi %s548_s14, %s13_s14   ;;  %s516_s13 = sphi %s546_s13, %s595_s13   ;;  %s512_s12 = sphi %s544_s12, %s594_s12  }
   0x3   : > { %p34_p1 = scmp.ge.s32.totalorder %s32_s15, 2  ;;  %p186_p2 = scmp.lt.s32.totalorder %s520_s14, 3 }
   0x5   : > { %s597_s15 = smov (%p34_p1, %s32_s15), 0  ;;  %p187_p3 = pnand %p450_p0, %p186_p2 }
   0x6   : > { %v496_v0 = vld [vmem:[%s591_s1] sm:$0xff] (!%p187_p3)   ;;  %v522_v1 = vmov (!%p187_p3), 0.0   ;;  %v497_v2 = vld [vmem:[%s591_s1 + $0x8] sm:$0xff] (!%p187_p3)   ;;  %vm523_vm0 = vmmov (!%p187_p3), 0   ;;  %p225_p4 = scmp.lt.s32.totalorder (!%p187_p3), %s512_s12, 1  ;;  %vm256_vm1 = vcmask (!%p187_p3), 261120  }
   0x7   : > { %190 = sbr.rel (%p187_p3) target bundleno = 245 (0xf5), region = 32  ;;  %462 = vmatprep.subr.bf16.mxu0 (!%p187_p3), %v522_v1  ;;  %466 = vmatprep.mubr.msk.bf16.mxu0 (!%p187_p3), %vm523_vm0, %v522_v1  ;;  %257 = vst.msk [vmem:[#allocation2] sm:$0xff] (!%p187_p3), %vm256_vm1, %v522_v1  ;;  %v456_v11 = vld [vmem:[%s592_s2] ss:$0 sm:$0xff] (!%p187_p3) }
   0x8   : > { %463 = vmatpush3.bf16.msra.mxu0 (!%p187_p3), %v496_v0 }
   0x9   : > { %464 = vmatprep.subr.bf16.mxu0 (!%p187_p3), %v522_v1 }
   0xc   : > { %465 = vmatpush3.bf16.msra.mxu0 (!%p187_p3), %v497_v2 }
   0xe   : > { %s599_s12 = smov (!%p225_p4, %s512_s12), 1  ;;  %v258_v5 = vld [vmem:[#allocation2] sm:$0xff] }
   0xf   : > { %s451_s20 = sshll.u32 %s599_s12, 3 }
  0x10   : > { %s231_s23 = scalar_lea.vmem %s590_s0, %s451_s20  ;;  %s250_s28 = scalar_lea.vmem %s593_s3, %s451_s20 }
  0x11   : > { %v259_v3 = vld [vmem:[%s231_s23] sm:$0xff] }
  0x12   : > { %v260_v4 = vpack.c.bf16 %v259_v3, %v259_v3 }
  0x14   : > { %467 = vmatmul.mubr.msk.bf16.vlgmr.msra.gmra.mrb[0].mxu0 %vm256_vm1, %v260_v4 }
  0xe7   : > { %v315_v6 = vpop.f32.mrb[0].mxu0 }
  0xe8   : > { %v321_v7 = vadd.f32 %v315_v6, %v258_v5  ;;  %v468_v8 = vpop.f32.mrb[1].mxu0 }
  0xe9   : > { %v318_v9 = vpop.f32.mrb[2].mxu0 }
  0xea   : > { %322 = vst.msk [vmem:[#allocation2] sm:$0xff] %vm256_vm1, %v321_v7  ;;  %v469_v10 = vpop.f32.mrb[3].mxu0 }
  0xf1   : > { %v326_v12 = vld [vmem:[#allocation2] sm:$0xff] }
  0xf2   : > { %v334_v13 = vadd.f32 %v456_v11, %v326_v12 }
  0xf4   : > { %335 = vst.msk [vmem:[%s250_s28] sm:$0xff] %vm256_vm1, %v334_v13 }
  0xf5 PF: > { %s13_s14 = sadd.s32 1, %s520_s14   ;;  %s594_s12 = smov %s516_s13 }
  0xf6   : > { %p10_p5 = scmp.ge.s32.totalorder %s13_s14, 4   ;;  %s595_s13 = smov %s597_s15 }
  0xf8   :  { %12 = sbr.rel (!%p10_p5) target bundleno = 2 (0x2), region = 76 }

// kernel: decoder_stack_forward.18
= control target key start
LH: loop header
LB: loop body
LE: loop exit
PB: predicated region body
PF: predicated region fallthrough
CT: control target
= control target key end

     0   :  { %s545_s12 = smov 0   ;;  %s547_s13 = smov 0   ;;  %s590_s0 = inlined_call_operand.vmem [shape: f32[16,32], index: 0, kind: input, shape index: {}]   ;;  %s591_s1 = inlined_call_operand.vmem [shape: bf16[32,96], index: 1, kind: input, shape index: {}]   ;;  %s592_s2 = inlined_call_operand.vmem [shape: f32[1,96], index: 2, kind: input, shape index: {}]   ;;  %s593_s3 = inlined_call_operand.vmem [shape: f32[16,96], index: 3, kind: output, shape index: {}]  }
   0x1   :  { %s549_s14 = smov 0  }
   0x2 LB: > { %s32_s15 = sadd.s32 1, %s517_s13  ;;  %p451_p0 = scmp.ge.s32.totalorder %s521_s14, 1  ;;  %s521_s14 = sphi %s549_s14, %s13_s14   ;;  %s517_s13 = sphi %s547_s13, %s595_s13   ;;  %s513_s12 = sphi %s545_s12, %s594_s12  }
   0x3   : > { %p34_p1 = scmp.ge.s32.totalorder %s32_s15, 2  ;;  %p186_p2 = scmp.lt.s32.totalorder %s521_s14, 3 }
   0x5   : > { %s597_s15 = smov (%p34_p1, %s32_s15), 0  ;;  %p187_p3 = pnand %p451_p0, %p186_p2 }
   0x6   : > { %vm256_vm0 = vcmask (!%p187_p3), 785408   ;;  %v523_v0 = vmov (!%p187_p3), 0.0   ;;  %v497_v1 = vld [vmem:[%s591_s1] sm:$0xff] (!%p187_p3)   ;;  %vm524_vm1 = vmmov (!%p187_p3), 0   ;;  %p225_p4 = scmp.lt.s32.totalorder (!%p187_p3), %s513_s12, 1  ;;  %v498_v2 = vld [vmem:[%s591_s1 + $0x8] sm:$0xff] (!%p187_p3)  }
   0x7   : > { %190 = sbr.rel (%p187_p3) target bundleno = 245 (0xf5), region = 32  ;;  %257 = vst.msk [vmem:[#allocation2] sm:$0xff] (!%p187_p3), %vm256_vm0, %v523_v0  ;;  %463 = vmatprep.subr.bf16.mxu0 (!%p187_p3), %v523_v0  ;;  %467 = vmatprep.mubr.msk.bf16.mxu0 (!%p187_p3), %vm524_vm1, %v523_v0  ;;  %vm277_vm2 = vcmask (!%p187_p3), 261120   ;;  %v457_v11 = vld [vmem:[%s592_s2] ss:$0 sm:$0xff] (!%p187_p3) }
   0x8   : > { %464 = vmatpush3.bf16.msra.mxu0 (!%p187_p3), %v497_v1 }
   0x9   : > { %465 = vmatprep.subr.bf16.mxu0 (!%p187_p3), %v523_v0 }
   0xc   : > { %466 = vmatpush3.bf16.msra.mxu0 (!%p187_p3), %v498_v2 }
   0xe   : > { %s599_s12 = smov (!%p225_p4, %s513_s12), 1  ;;  %v258_v5 = vld [vmem:[#allocation2] sm:$0xff] }
   0xf   : > { %s452_s20 = sshll.u32 %s599_s12, 3 }
  0x10   : > { %s231_s23 = scalar_lea.vmem %s590_s0, %s452_s20  ;;  %s250_s28 = scalar_lea.vmem %s593_s3, %s452_s20 }
  0x11   : > { %v259_v3 = vld [vmem:[%s231_s23] sm:$0xff] }
  0x12   : > { %v260_v4 = vpack.c.bf16 %v259_v3, %v259_v3 }
  0x14   : > { %468 = vmatmul.mubr.msk.bf16.vlgmr.msra.gmra.mrb[0].mxu0 %vm277_vm2, %v260_v4 }
  0xe7   : > { %v315_v6 = vpop.f32.mrb[0].mxu0 }
  0xe8   : > { %v321_v7 = vadd.f32 %v315_v6, %v258_v5  ;;  %v469_v8 = vpop.f32.mrb[1].mxu0 }
  0xe9   : > { %v318_v9 = vpop.f32.mrb[2].mxu0 }
  0xea   : > { %323 = vst.msk [vmem:[#allocation2] sm:$0xff] %vm256_vm0, %v321_v7  ;;  %v470_v10 = vpop.f32.mrb[3].mxu0 }
  0xf1   : > { %v327_v12 = vld [vmem:[#allocation2] sm:$0xff] }
  0xf2   : > { %v335_v13 = vadd.f32 %v457_v11, %v327_v12 }
  0xf4   : > { %336 = vst.msk [vmem:[%s250_s28] sm:$0xff] %vm256_vm0, %v335_v13 }
  0xf5 PF: > { %s13_s14 = sadd.s32 1, %s521_s14   ;;  %s594_s12 = smov %s517_s13 }
  0xf6   : > { %p10_p5 = scmp.ge.s32.totalorder %s13_s14, 4   ;;  %s595_s13 = smov %s597_s15 }
  0xf8   :  { %12 = sbr.rel (!%p10_p5) target bundleno = 2 (0x2), region = 76 }

// kernel: decoder_stack_forward.20
= control target key start
LH: loop header
LB: loop body
LE: loop exit
PB: predicated region body
PF: predicated region fallthrough
CT: control target
= control target key end

     0   :  { %s646_s21 = smov 0   ;;  %s648_s22 = smov 0   ;;  %s708_s0 = inlined_call_operand.vmem [shape: f32[16,32], index: 0, kind: input, shape index: {}]   ;;  %s709_s1 = inlined_call_operand.vmem [shape: bf16[32,32], index: 1, kind: input, shape index: {}]   ;;  %s710_s2 = inlined_call_operand.vmem [shape: f32[1,32], index: 2, kind: input, shape index: {}]   ;;  %s711_s3 = inlined_call_operand.vmem [shape: f32[16,32], index: 3, kind: input, shape index: {}]   ;;  %s712_s4 = inlined_call_operand.vmem [shape: f32[1,32], index: 4, kind: input, shape index: {}]   ;;  %s713_s5 = inlined_call_operand.vmem [shape: f32[1,32], index: 5, kind: input, shape index: {}]   ;;  %s714_s6 = inlined_call_operand.vmem [shape: f32[16,32], index: 6, kind: output, shape index: {}]  }
   0x1   :  { %s650_s23 = smov 0  }
   0x2 LB: > { %s28_s24 = sadd.s32 1, %s603_s22  ;;  %p530_p0 = scmp.ge.s32.totalorder %s607_s23, 1  ;;  %s607_s23 = sphi %s650_s23, %s16_s23   ;;  %s603_s22 = sphi %s648_s22, %s716_s22   ;;  %s599_s21 = sphi %s646_s21, %s715_s21  }
   0x3   : > { %p30_p1 = scmp.ge.s32.totalorder %s28_s24, 2  ;;  %p248_p2 = scmp.lt.s32.totalorder %s607_s23, 3 }
   0x5   : > { %s718_s24 = smov (%p30_p1, %s28_s24), 0  ;;  %p249_p3 = pnand %p530_p0, %p248_p2 }
   0x6   : > { %vm314_vm0 = vcmask (!%p249_p3), 261120   ;;  %v609_v0 = vmov (!%p249_p3), 0.0   ;;  %v579_v1 = vld [vmem:[%s709_s1] sm:$0xff] (!%p249_p3)   ;;  %vm610_vm1 = vmmov (!%p249_p3), 0   ;;  %p288_p4 = scmp.lt.s32.totalorder (!%p249_p3), %s599_s21, 1  ;;  %v580_v2 = vld [vmem:[%s709_s1 + $0x8] sm:$0xff] (!%p249_p3)  }
   0x7   : > { %252 = sbr.rel (%p249_p3) target bundleno = 573 (0x23d), region = 44  ;;  %315 = vst.msk [vmem:[#allocation2] sm:$0xff] (!%p249_p3), %vm314_vm0, %v609_v0  ;;  %545 = vmatprep.subr.bf16.mxu0 (!%p249_p3), %v609_v0  ;;  %549 = vmatprep.mubr.msk.bf16.mxu0 (!%p249_p3), %vm610_vm1, %v609_v0  ;;  %v537_v11 = vld [vmem:[%s710_s2] ss:$0 sm:$0xff] (!%p249_p3) }
   0x8   : > { %546 = vmatpush3.bf16.msra.mxu0 (!%p249_p3), %v579_v1  ;;  %v538_v30 = vld [vmem:[%s712_s4] ss:$0 sm:$0xff] (!%p249_p3) }
   0x9   : > { %547 = vmatprep.subr.bf16.mxu0 (!%p249_p3), %v609_v0  ;;  %v539_v33 = vld [vmem:[%s713_s5] ss:$0 sm:$0xff] (!%p249_p3) }
   0xc   : > { %548 = vmatpush3.bf16.msra.mxu0 (!%p249_p3), %v580_v2 }
   0xe   : > { %s720_s21 = smov (!%p288_p4, %s599_s21), 1  ;;  %v316_v5 = vld [vmem:[#allocation2] sm:$0xff] }
   0xf   : > { %s671_s29 = sshll.u32 %s720_s21, 3 }
  0x10   : > { %s294_s8 = scalar_lea.vmem %s708_s0, %s671_s29  ;;  %s304_s11 = scalar_lea.vmem %s711_s3, %s671_s29 }
  0x11   : > { %v317_v3 = vld [vmem:[%s294_s8] sm:$0xff]  ;;  %s308_s20 = scalar_lea.vmem %s714_s6, %s671_s29 }
  0x12   : > { %v318_v4 = vpack.c.bf16 %v317_v3, %v317_v3  ;;  %v393_v13 = vld [vmem:[%s304_s11] sm:$0xff] }
  0x14   : > { %550 = vmatmul.mubr.msk.bf16.vlgmr.msra.gmra.mrb[0].mxu0 %vm314_vm0, %v318_v4 }
  0xe7   : > { %v373_v6 = vpop.f32.mrb[0].mxu0 }
  0xe8   : > { %v379_v7 = vadd.f32 %v373_v6, %v316_v5  ;;  %v551_v8 = vpop.f32.mrb[1].mxu0 }
  0xe9   : > { %v376_v9 = vpop.f32.mrb[2].mxu0 }
  0xea   : > { %380 = vst.msk [vmem:[#allocation2] sm:$0xff] %vm314_vm0, %v379_v7  ;;  %v552_v10 = vpop.f32.mrb[3].mxu0 }
  0xf1   : > { %v384_v12 = vld [vmem:[#allocation2] sm:$0xff] }
  0xf2   : > { %v392_v14 = vadd.f32 %v537_v11, %v384_v12 }
  0xf4   : > { %v394_v15 = vadd.f32 %v393_v13, %v392_v14 }
  0xf6   : > { %v397_v16 = vsel %vm314_vm0, %v394_v15, 0.0 }
  0xf7   : > { %398 = vadd.xlane.f32.xlu0 %v397_v16 }
 0x184   : > { %v399_v17 = vpop.xlane.xlu0 %398 }
 0x185   : > { %v401_v18 = vmul.f32 0.03125, %v399_v17 }
 0x187   : > { %v402_v19 = vsub.f32 %v394_v15, %v401_v18 }
 0x189   : > { %v403_v20 = vmul.f32 %v402_v19, %v402_v19  ;;  %v423_v31 = vmul.f32 %v538_v30, %v402_v19 }
 0x18b   : > { %v404_v21 = vsel %vm314_vm0, %v403_v20, 0.0 }
 0x18c   : > { %405 = vadd.xlane.f32.xlu0 %v404_v21 }
 0x219   : > { %v406_v22 = vpop.xlane.xlu0 %405 }
 0x21a   : > { %v407_v23 = vmul.f32 0.032258064, %v406_v22 }
 0x21c   : > { %581 = vrsqrt.f32 %v407_v23  ;;  %vm410_vm2 = vcmp.eq.f32.partialorder %v407_v23, inf  ;;  %v413_v26 = vand.u32 2147483648, %v407_v23  ;;  %vm412_vm3 = vcmp.eq.f32.partialorder %v407_v23, 0.0 }
 0x226   : > { %v582_v24 = vpop.eup %581 }
 0x227   : > { %v409_v25 = vmul.f32 %v582_v24, %v407_v23 }
 0x229   : > { %v411_v27 = vsel %vm410_vm2, %v407_v23, %v409_v25 }
 0x22a   : > { %v414_v28 = vsel %vm412_vm3, %v413_v26, %v411_v27 }
 0x22b   : > { %v415_v29 = vadd.f32 1e-06, %v414_v28 }
 0x22d   : > { %583 = vrcp.f32 %v415_v29 }
 0x237   : > { %v584_v32 = vpop.eup %583 }
 0x238   : > { %v424_v34 = vmul.f32 %v584_v32, %v423_v31 }
 0x23a   : > { %v431_v35 = vadd.f32 %v539_v33, %v424_v34 }
 0x23c   : > { %432 = vst.msk [vmem:[%s308_s20] sm:$0xff] %vm314_vm0, %v431_v35 }
 0x23d PF: > { %s16_s23 = sadd.s32 1, %s607_s23   ;;  %s715_s21 = smov %s603_s22 }
 0x23e   : > { %p13_p5 = scmp.ge.s32.totalorder %s16_s23, 4   ;;  %s716_s22 = smov %s718_s24 }
 0x240   :  { %15 = sbr.rel (!%p13_p5) target bundleno = 2 (0x2), region = 88 }

// kernel: decoder_stack_forward.19
= control target key start
LH: loop header
LB: loop body
LE: loop exit
PB: predicated region body
PF: predicated region fallthrough
CT: control target
= control target key end

     0   :  { %s1900_s12 = smov 0   ;;  %s1902_s13 = smov 0   ;;  %s2092_s0 = inlined_call_operand.vmem [shape: f32[2,8,3,4,8], index: 0, kind: input, shape index: {}, may-alias: {0,1,2}]   ;;  %s2093_s1 = inlined_call_operand.vmem [shape: f32[2,8,3,4,8], index: 1, kind: input, shape index: {}, may-alias: {0,1,2}]   ;;  %s2094_s2 = inlined_call_operand.vmem [shape: f32[2,8,3,4,8], index: 2, kind: input, shape index: {}, may-alias: {0,1,2}]   ;;  %s2095_s3 = inlined_call_operand.vmem [shape: f32[2,8,32], index: 3, kind: output, shape index: {}]  }
   0x1   :  { %s1904_s14 = smov 0  }
   0x2 LB: > { %s1684_s15 = sadd.s32 4294967295, %s1870_s14   ;;  %s1917_s16 = sadd.s32 1, %s1870_s14   ;;  %s1870_s14 = sphi %s1904_s14, %s2099_s14   ;;  %s1866_s13 = sphi %s1902_s13, %s2098_s13   ;;  %s1862_s12 = sphi %s1900_s12, %s2097_s12  }
   0x3   : > { %s17_s17 = ssub.s32 %s1870_s14, %s1917_s16  ;;  %s20_s18 = sadd.s32 1, %s1866_s13 }
   0x4   : > { %p18_p0 = scmp.eq.s32.totalorder %s17_s17, 0  ;;  %p27_p1 = scmp.ne.s32.totalorder %s1866_s13, %s1862_s12 }
   0x5   : > { %p28_p2 = scmp.eq.s32.totalorder %s1870_s14, 0  ;;  %p1687_p4 = scmp.ge.s32.totalorder %s1870_s14, 2 }
   0x6   : > { %s1926_s19 = scalar_select %p18_p0, %s1866_s13, %s20_s18  }
   0x7   : > { %p1928_p3 = por %p28_p2, %p27_p1  ;;  %131 = sbr.rel (%p1687_p4) target bundleno = 44 (0x2c), region = 16 }
   0xe   : > { %134 = sbr.rel (!%p1928_p3) target bundleno = 24 (0x18), region = 20  ;;  %s136_s21 = sand.u32 (%p1928_p3), 1, %s1866_s13  }
   0xf   : > { %s1799_s22 = smul.u32 (%p1928_p3), 96, %s1870_s14  ;;  %s1688_s23 = sshll.u32 (%p1928_p3), %s136_s21, 5 }
  0x10   : > { %s138_s27 = scalar_lea.vmem (%p1928_p3), [#allocation2], %s1688_s23 }
  0x11   : > { %s141_s26 = scalar_lea.vmem (%p1928_p3), %s2092_s0, %s1799_s22 }
  0x12   : > { %v157_v0 = vld [vmem:[%s141_s26] sm:$0xf] (%p1928_p3)  ;;  %v159_v1 = vld [vmem:[%s141_s26 + $0xc] sm:$0xf] (%p1928_p3)  ;;  %v161_v2 = vld [vmem:[%s141_s26 + $0x18] sm:$0xf] (%p1928_p3) }
  0x13   : > { %158 = vst [vmem:[%s138_s27] sm:$0xf] (%p1928_p3), %v157_v0  ;;  %160 = vst [vmem:[%s138_s27 + $0x4] sm:$0xf] (%p1928_p3), %v159_v1  ;;  %v163_v3 = vld [vmem:[%s141_s26 + $0x24] sm:$0xf] (%p1928_p3) }
  0x14   : > { %162 = vst [vmem:[%s138_s27 + $0x8] sm:$0xf] (%p1928_p3), %v161_v2  ;;  %v165_v4 = vld [vmem:[%s141_s26 + $0x30] sm:$0xf] (%p1928_p3)  ;;  %v167_v5 = vld [vmem:[%s141_s26 + $0x3c] sm:$0xf] (%p1928_p3) }
  0x15   : > { %164 = vst [vmem:[%s138_s27 + $0xc] sm:$0xf] %v163_v3  ;;  %166 = vst [vmem:[%s138_s27 + $0x10] sm:$0xf] %v165_v4  ;;  %v169_v6 = vld [vmem:[%s141_s26 + $0x48] sm:$0xf] }
  0x16   : > { %168 = vst [vmem:[%s138_s27 + $0x14] sm:$0xf] %v167_v5  ;;  %v171_v7 = vld [vmem:[%s141_s26 + $0x54] sm:$0xf]  ;;  %170 = vst [vmem:[%s138_s27 + $0x18] sm:$0xf] %v169_v6 }
  0x17   : > { %172 = vst [vmem:[%s138_s27 + $0x1c] sm:$0xf] %v171_v7 }
  0x18 PF: > { %211 = sbr.rel (!%p1928_p3) target bundleno = 34 (0x22), region = 61  ;;  %s213_s28 = sand.u32 (%p1928_p3), 1, %s1866_s13  }
  0x19   : > { %s1691_s29 = smul.u32 (%p1928_p3), 96, %s1870_s14  ;;  %s1690_s30 = sshll.u32 (%p1928_p3), %s213_s28, 5 }
  0x1a   : > { %s215_s7 = scalar_lea.vmem (%p1928_p3), [#allocation3], %s1690_s30 }
  0x1b   : > { %s1612_s6 = scalar_lea.vmem (%p1928_p3), %s2093_s1, %s1691_s29 }
  0x1c   : > { %v1692_v8 = vld [vmem:[%s1612_s6 + $0x4] sm:$0xf] (%p1928_p3)  ;;  %v1693_v9 = vld [vmem:[%s1612_s6 + $0x10] sm:$0xf] (%p1928_p3)  ;;  %v1694_v10 = vld [vmem:[%s1612_s6 + $0x1c] sm:$0xf] (%p1928_p3) }
  0x1d   : > { %236 = vst [vmem:[%s215_s7] sm:$0xf] (%p1928_p3), %v1692_v8  ;;  %238 = vst [vmem:[%s215_s7 + $0x4] sm:$0xf] (%p1928_p3), %v1693_v9  ;;  %v1695_v11 = vld [vmem:[%s1612_s6 + $0x28] sm:$0xf] (%p1928_p3) }
  0x1e   : > { %240 = vst [vmem:[%s215_s7 + $0x8] sm:$0xf] (%p1928_p3), %v1694_v10  ;;  %v1696_v12 = vld [vmem:[%s1612_s6 + $0x34] sm:$0xf] (%p1928_p3)  ;;  %v1697_v13 = vld [vmem:[%s1612_s6 + $0x40] sm:$0xf] (%p1928_p3) }
  0x1f   : > { %242 = vst [vmem:[%s215_s7 + $0xc] sm:$0xf] %v1695_v11  ;;  %244 = vst [vmem:[%s215_s7 + $0x10] sm:$0xf] %v1696_v12  ;;  %v1698_v14 = vld [vmem:[%s1612_s6 + $0x4c] sm:$0xf] }
  0x20   : > { %246 = vst [vmem:[%s215_s7 + $0x14] sm:$0xf] %v1697_v13  ;;  %v1699_v15 = vld [vmem:[%s1612_s6 + $0x58] sm:$0xf]  ;;  %248 = vst [vmem:[%s215_s7 + $0x18] sm:$0xf] %v1698_v14 }
  0x21   : > { %250 = vst [vmem:[%s215_s7 + $0x1c] sm:$0xf] %v1699_v15 }
  0x22 PF: > { %289 = sbr.rel (!%p1928_p3) target bundleno = 44 (0x2c), region = 102  ;;  %s291_s8 = sand.u32 (%p1928_p3), 1, %s1866_s13  }
  0x23   : > { %s1701_s9 = smul.u32 (%p1928_p3), 96, %s1870_s14  ;;  %s1700_s10 = sshll.u32 (%p1928_p3), %s291_s8, 5 }
  0x24   : > { %s293_s21 = scalar_lea.vmem (%p1928_p3), [#allocation4], %s1700_s10 }
  0x25   : > { %s1618_s18 = scalar_lea.vmem (%p1928_p3), %s2094_s2, %s1701_s9 }
  0x26   : > { %v1702_v16 = vld [vmem:[%s1618_s18 + $0x8] sm:$0xf] (%p1928_p3)  ;;  %v1703_v17 = vld [vmem:[%s1618_s18 + $0x14] sm:$0xf] (%p1928_p3)  ;;  %v1704_v18 = vld [vmem:[%s1618_s18 + $0x20] sm:$0xf] (%p1928_p3) }
  0x27   : > { %314 = vst [vmem:[%s293_s21] sm:$0xf] (%p1928_p3), %v1702_v16  ;;  %316 = vst [vmem:[%s293_s21 + $0x4] sm:$0xf] (%p1928_p3), %v1703_v17  ;;  %v1705_v19 = vld [vmem:[%s1618_s18 + $0x2c] sm:$0xf] (%p1928_p3) }
  0x28   : > { %318 = vst [vmem:[%s293_s21 + $0x8] sm:$0xf] (%p1928_p3), %v1704_v18  ;;  %v1706_v20 = vld [vmem:[%s1618_s18 + $0x38] sm:$0xf] (%p1928_p3)  ;;  %v1707_v21 = vld [vmem:[%s1618_s18 + $0x44] sm:$0xf] (%p1928_p3) }
  0x29   : > { %320 = vst [vmem:[%s293_s21 + $0xc] sm:$0xf] %v1705_v19  ;;  %322 = vst [vmem:[%s293_s21 + $0x10] sm:$0xf] %v1706_v20  ;;  %v1708_v22 = vld [vmem:[%s1618_s18 + $0x50] sm:$0xf] }
  0x2a   : > { %324 = vst [vmem:[%s293_s21 + $0x14] sm:$0xf] %v1707_v21  ;;  %v1709_v23 = vld [vmem:[%s1618_s18 + $0x5c] sm:$0xf]  ;;  %326 = vst [vmem:[%s293_s21 + $0x18] sm:$0xf] %v1708_v22 }
  0x2b   : > { %328 = vst [vmem:[%s293_s21 + $0x1c] sm:$0xf] %v1709_v23 }
  0x2c PF: > { %p1710_p5 = scmp.ge.s32.totalorder %s1870_s14, 1  ;;  %p366_p6 = scmp.lt.s32.totalorder %s1870_s14, 3 }
  0x2e   : > { %p367_p7 = pnand %p1710_p5, %p366_p6 }
  0x2f   : > { %s373_s20 = sand.u32 (!%p367_p7), 1, %s1862_s12   ;;  %v1872_v42 = vmov (!%p367_p7), 1983009808   ;;  %v474_v44 = vlaneseq (!%p367_p7)  ;;  %v1873_v47 = vmov (!%p367_p7), 1934713408   ;;  %v1874_v10 = vmov (!%p367_p7), 0.0  }
  0x30   : > { %370 = sbr.rel (%p367_p7) target bundleno = 1044 (0x414), region = 143  ;;  %s1957_s22 = sshll.u32 (!%p367_p7), %s373_s20, 5  ;;  %v472_v43 = vunpack.c.l.s4 (!%p367_p7), %v1872_v42  ;;  %v488_v48 = vunpack.c.l.s4 (!%p367_p7), %v1873_v47  ;;  %1751 = vmatprep.subr.bf16.mxu0 (!%p367_p7), %v1874_v10  ;;  %1757 = vmatprep.subr.bf16.mxu1 (!%p367_p7), %v1874_v10  ;;  %v1875_v17 = vmov (!%p367_p7), 0   ;;  %vm1876_vm0 = vmmov (!%p367_p7), 0  }
  0x31   : > { %s382_s23 = scalar_lea.vmem (!%p367_p7), [#allocation3], %s1957_s22  ;;  %v475_v50 = vshrl.u32 (!%p367_p7), %v474_v44, 7  ;;  %1753 = vmatprep.mubr.msk.bf16.mxu0 (!%p367_p7), %vm1876_vm0, %v1874_v10  ;;  %1759 = vmatprep.mubr.msk.bf16.mxu1 (!%p367_p7), %vm1876_vm0, %v1874_v10  ;;  %s375_s12 = scalar_lea.vmem (!%p367_p7), [#allocation2], %s1957_s22  ;;  %vm954_vm1 = vcmask (!%p367_p7), 1043456   ;;  %vm950_vm2 = vcmask (!%p367_p7), 64512   ;;  %vm1579_vm3 = vcmask (!%p367_p7), 130048  }
  0x32   : > { %v440_v24 = vld [vmem:[%s382_s23 + $0x8] sm:$0xf] (!%p367_p7)  ;;  %v438_v25 = vld [vmem:[%s382_s23] sm:$0xf] (!%p367_p7)  ;;  %v441_v28 = vld [vmem:[%s382_s23 + $0xc] sm:$0xf] (!%p367_p7)  ;;  %v473_v49 = vunpack.c.0.s8 (!%p367_p7), %v472_v43  ;;  %v489_v53 = vunpack.c.0.s8 (!%p367_p7), %v488_v48 }
  0x33   : > { %v448_v26 = vpack.c.bf16 (!%p367_p7), %v440_v24, %v440_v24  ;;  %v446_v27 = vpack.c.bf16 (!%p367_p7), %v438_v25, %v438_v25  ;;  %v439_v29 = vld [vmem:[%s382_s23 + $0x4] sm:$0xf] (!%p367_p7)  ;;  %v449_v30 = vpack.c.bf16 (!%p367_p7), %v441_v28, %v441_v28  ;;  %v443_v32 = vld [vmem:[%s382_s23 + $0x14] sm:$0xf] (!%p367_p7)  ;;  %v442_v33 = vld [vmem:[%s382_s23 + $0x10] sm:$0xf] (!%p367_p7) }
  0x34   : > { %v447_v31 = vpack.c.bf16 (!%p367_p7), %v439_v29, %v439_v29  ;;  %v451_v34 = vpack.c.bf16 (!%p367_p7), %v443_v32, %v443_v32  ;;  %v450_v35 = vpack.c.bf16 (!%p367_p7), %v442_v33, %v442_v33  ;;  %v445_v36 = vld [vmem:[%s382_s23 + $0x1c] sm:$0xf] (!%p367_p7)  ;;  %v444_v37 = vld [vmem:[%s382_s23 + $0x18] sm:$0xf] (!%p367_p7)  ;;  %v1960_v54 = vsub.s32 (!%p367_p7), %v473_v49, %v475_v50  ;;  %v422_v33 = vld [vmem:[%s375_s12] sm:$0xf] (!%p367_p7) }
  0x35   : > { %564 = vxpose.xlu1.c.b16.start.end [1/1] (short) (narrow) (!%p367_p7), %v448_v26, 16  ;;  %532 = vxpose.xlu0.c.b16.start.end [1/1] (short) (narrow) (!%p367_p7), %v446_v27, 16  ;;  %v453_v38 = vpack.c.bf16 (!%p367_p7), %v445_v36, %v445_v36  ;;  %v452_v39 = vpack.c.bf16 (!%p367_p7), %v444_v37, %v444_v37  ;;  %v1962_v61 = vsub.s32 (!%p367_p7), %v489_v53, %v475_v50  ;;  %v424_v36 = vld [vmem:[%s375_s12 + $0x8] sm:$0xf] (!%p367_p7)  ;;  %v425_v37 = vld [vmem:[%s375_s12 + $0xc] sm:$0xf] (!%p367_p7) }
  0x36   : > { %s389_s24 = scalar_lea.vmem (!%p367_p7), [#allocation4], %s1957_s22  ;;  %s1877_s25 = smov (!%p367_p7), 16   ;;  %vm1581_vm4 = vcmask (!%p367_p7), 195584   ;;  %vm1583_vm5 = vcmask (!%p367_p7), 261120  }
  0x37   : > { %s1878_s26 = smov 8   ;;  %s1879_s27 = smov 24  }
  0x38   : > { %p417_p8 = scmp.lt.s32.totalorder %s1684_s15, 1 }
  0x39   : > { %580 = vxpose.xlu1.c.b16.start.end [1/1] (short) (narrow) %v449_v30, 16  ;;  %548 = vxpose.xlu0.c.b16.start.end [1/1] (short) (narrow) %v447_v31, 16 }
  0x3a   : > { %s2101_s15 = smov (!%p417_p8, %s1684_s15), 1 }
  0x3b   : > { %s1714_s28 = sshll.u32 %s2101_s15, 3 }
  0x3c   : > { %s420_s4 = scalar_lea.vmem %s2095_s3, %s1714_s28 }
  0x3d   : > { %612 = vxpose.xlu1.c.b16.start.end [1/1] (short) (narrow) %v451_v34, 16  ;;  %596 = vxpose.xlu0.c.b16.start.end [1/1] (short) (narrow) %v450_v35, 16  ;;  %v423_v34 = vld [vmem:[%s375_s12 + $0x4] sm:$0xf] }
  0x41   : > { %644 = vxpose.xlu1.c.b16.start.end [1/1] (short) (narrow) %v453_v38, 16  ;;  %628 = vxpose.xlu0.c.b16.start.end [1/1] (short) (narrow) %v452_v39, 16  ;;  %v426_v38 = vld [vmem:[%s375_s12 + $0x10] sm:$0xf]  ;;  %v427_v39 = vld [vmem:[%s375_s12 + $0x14] sm:$0xf] }
  0x42   : > { %v1715_v44 = vpack.c.bf16 %v426_v38, %v422_v33 }
  0x44   : > { %v477_v50 = vrot.slane %v1715_v44, %v1960_v54 }
  0x9b   : > { %v572_v40 = vpop.trf.xlu1  ;;  %v540_v41 = vpop.trf.xlu0 }
  0x9f   : > { %v588_v45 = vpop.trf.xlu1  ;;  %v556_v46 = vpop.trf.xlu0 }
  0xa3   : > { %v620_v51 = vpop.trf.xlu1  ;;  %v604_v52 = vpop.trf.xlu0 }
  0xa4   : > { %v694_v55 = vcombine.low %v556_v46, %v620_v51  ;;  %v660_v56 = vcombine.low %v540_v41, %v604_v52  ;;  %v429_v41 = vld [vmem:[%s375_s12 + $0x1c] sm:$0xf]  ;;  %v1717_v46 = vpack.c.bf16 %v427_v39, %v423_v34 }
  0xa5   : > { %v1718_v47 = vpack.c.bf16 %v429_v41, %v425_v37 }
  0xa6   : > { %v701_v62 = vrot.slane %v694_v55, %v1960_v54  ;;  %v667_v63 = vrot.slane %v660_v56, %v1960_v54  ;;  %v502_v52 = vrot.slane %v1717_v46, %v1960_v54 }
  0xa7   : > { %v652_v57 = vpop.trf.xlu1  ;;  %v636_v58 = vpop.trf.xlu0  ;;  %v510_v53 = vrot.slane %v1718_v47, %v1960_v54 }
  0xa8   : > { %v702_v59 = vcombine.low %v588_v45, %v652_v57  ;;  %v668_v60 = vcombine.low %v572_v40, %v636_v58  ;;  %v428_v40 = vld [vmem:[%s375_s12 + $0x18] sm:$0xf] }
  0xa9   : > { %v1716_v45 = vpack.c.bf16 %v428_v40, %v424_v36 }
  0xaa   : > { %v709_v0 = vrot.slane %v702_v59, %v1960_v54  ;;  %v675_v1 = vrot.slane %v668_v60, %v1960_v54 }
  0xab   : > { %v485_v51 = vrot.slane %v1716_v45, %v1960_v54 }
  0xac   : > { %v710_v2 = vcombine.low %v701_v62, %v709_v0  ;;  %v711_v3 = vcombine.high %v701_v62, %v709_v0  ;;  %v676_v4 = vcombine.low %v667_v63, %v675_v1  ;;  %v677_v5 = vcombine.high %v667_v63, %v675_v1 }
  0xad   : > { %v486_v60 = vcombine.low %v477_v50, %v485_v51  ;;  %v511_v62 = vcombine.low %v502_v52, %v510_v53 }
  0xae   : > { %v684_v6 = vrot.slane %v676_v4, %v1962_v61  ;;  %v718_v7 = vrot.slane %v710_v2, %v1962_v61  ;;  %v691_v8 = vrot.slane %v677_v5, %v1962_v61  ;;  %v725_v9 = vrot.slane %v711_v3, %v1962_v61 }
  0xaf   : > { %v493_v5 = vrot.slane %v486_v60, %v1962_v61  ;;  %v457_v60 = vld [vmem:[%s389_s24 + $0xc] sm:$0xf] }
  0xb0   : > { %v730_v11 = vpack.i.b16 %v718_v7, %v684_v6  ;;  %v732_v12 = vshrl.u32 %v684_v6, 16  ;;  %v733_v13 = vshrl.u32 %v718_v7, 16  ;;  %v748_v14 = vshrl.u32 %v691_v8, 16 }
  0xb1   : > { %v749_v15 = vshrl.u32 %v725_v9, 16  ;;  %v692_v18 = vcombine.high %v684_v6, %v1875_v17  ;;  %v726_v19 = vcombine.high %v718_v7, %v1875_v17  ;;  %v746_v20 = vpack.i.b16 %v725_v9, %v691_v8 }
  0xb2   : > { %760 = vxpose.xlu0.c.b16.start.end [1/1] (short) (narrow) %v730_v11, 16  ;;  %v734_v16 = vpack.i.b16 %v733_v13, %v732_v12  ;;  %v693_v21 = vcombine.high %v691_v8, %v1875_v17  ;;  %v727_v25 = vcombine.high %v725_v9, %v1875_v17  ;;  %v518_v6 = vrot.slane %v511_v62, %v1962_v61  ;;  %v458_v62 = vld [vmem:[%s389_s24 + $0x10] sm:$0xf] }
  0xb3   : > { %v750_v22 = vpack.i.b16 %v749_v15, %v748_v14  ;;  %v740_v23 = vshrl.u32 %v692_v18, 16  ;;  %v741_v24 = vshrl.u32 %v726_v19, 16  ;;  %v738_v26 = vpack.i.b16 %v726_v19, %v692_v18 }
  0xb4   : > { %776 = vxpose.xlu1.c.b16.start.end [1/1] (short) (narrow) %v734_v16, 16  ;;  %v756_v28 = vshrl.u32 %v693_v21, 16  ;;  %v757_v29 = vshrl.u32 %v727_v25, 16  ;;  %v754_v30 = vpack.i.b16 %v727_v25, %v693_v21  ;;  %v523_v12 = vshrl.u32 %v493_v5, 16 }
  0xb5   : > { %v742_v27 = vpack.i.b16 %v741_v24, %v740_v23  ;;  %v524_v13 = vshrl.u32 %v518_v6, 16  ;;  %v522_v19 = vpack.i.b16 %v518_v6, %v493_v5  ;;  %v494_v25 = vcombine.high %v493_v5, %v1875_v17 }
  0xb6   : > { %824 = vxpose.xlu0.c.b16.start.end [1/1] (short) (narrow) %v746_v20, 16  ;;  %v758_v31 = vpack.i.b16 %v757_v29, %v756_v28  ;;  %v519_v29 = vcombine.high %v518_v6, %v1875_v17 }
  0xb8   : > { %840 = vxpose.xlu1.c.b16.start.end [1/1] (short) (narrow) %v750_v22, 16  ;;  %v530_v33 = vshrl.u32 %v519_v29, 16  ;;  %v528_v34 = vpack.i.b16 %v519_v29, %v494_v25 }
  0xba   : > { %792 = vxpose.xlu0.c.b16.start.end [1/1] (short) (narrow) %v738_v26, 16 }
  0xbc   : > { %808 = vxpose.xlu1.c.b16.start.end [1/1] (short) (narrow) %v742_v27, 16  ;;  %v525_v27 = vpack.i.b16 %v524_v13, %v523_v12 }
  0xbe   : > { %856 = vxpose.xlu0.c.b16.start.end [1/1] (short) (narrow) %v754_v30, 16 }
  0xc0   : > { %872 = vxpose.xlu1.c.b16.start.end [1/1] (short) (narrow) %v758_v31, 16 }
 0x118   : > { %v768_v32 = vpop.trf.xlu0 }
 0x11a   : > { %v784_v35 = vpop.trf.xlu1 }
 0x11c   : > { %v832_v42 = vpop.trf.xlu0 }
 0x11d   : > { %v888_v55 = vcombine.low %v768_v32, %v832_v42  ;;  %v529_v32 = vshrl.u32 %v494_v25, 16 }
 0x11e   : > { %v848_v43 = vpop.trf.xlu1 }
 0x11f   : > { %v913_v57 = vcombine.low %v784_v35, %v848_v43  ;;  %v895_v63 = vrot.slane %v888_v55, %v1960_v54  ;;  %v531_v35 = vpack.i.b16 %v530_v33, %v529_v32 }
 0x120   : > { %v800_v48 = vpop.trf.xlu0 }
 0x121   : > { %v920_v2 = vrot.slane %v913_v57, %v1960_v54  ;;  %v454_v57 = vld [vmem:[%s389_s24] sm:$0xf] }
 0x122   : > { %v816_v49 = vpop.trf.xlu1 }
 0x124   : > { %v864_v56 = vpop.trf.xlu0 }
 0x125   : > { %v896_v58 = vcombine.low %v800_v48, %v864_v56 }
 0x126   : > { %v880_v59 = vpop.trf.xlu1 }
 0x127   : > { %v903_v0 = vrot.slane %v896_v58, %v1960_v54  ;;  %v921_v1 = vcombine.low %v816_v49, %v880_v59  ;;  %v455_v58 = vld [vmem:[%s389_s24 + $0x4] sm:$0xf]  ;;  %v456_v59 = vld [vmem:[%s389_s24 + $0x8] sm:$0xf] }
 0x129   : > { %v904_v3 = vcombine.low %v895_v63, %v903_v0  ;;  %v928_v4 = vrot.slane %v921_v1, %v1960_v54  ;;  %v459_v63 = vld [vmem:[%s389_s24 + $0x14] sm:$0xf]  ;;  %v460_v0 = vld [vmem:[%s389_s24 + $0x18] sm:$0xf]  ;;  %v461_v1 = vld [vmem:[%s389_s24 + $0x1c] sm:$0xf] }
 0x12a   : > { %v1726_v5 = vpack.c.bf16 %v461_v1, %v457_v60 }
 0x12b   : > { %v911_v7 = vrot.slane %v904_v3, %v1962_v61  ;;  %v929_v8 = vcombine.low %v920_v2, %v928_v4  ;;  %v1723_v2 = vpack.c.bf16 %v458_v62, %v454_v57  ;;  %v1725_v3 = vpack.c.bf16 %v459_v63, %v455_v58 }
 0x12c   : > { %v1724_v4 = vpack.c.bf16 %v460_v0, %v456_v59 }
 0x12d   : > { %v936_v9 = vrot.slane %v929_v8, %v1962_v61  ;;  %v912_v11 = vcombine.high %v911_v7, %v1875_v17  ;;  %v941_v15 = vshrl.u32 %v911_v7, 16  ;;  %v1183_v6 = vrot.slane %v1723_v2, %v1960_v54 }
 0x12e   : > { %v1191_v8 = vrot.slane %v1724_v4, %v1960_v54 }
 0x12f   : > { %v940_v14 = vpack.i.b16 %v936_v9, %v911_v7  ;;  %v942_v16 = vshrl.u32 %v936_v9, 16  ;;  %v937_v18 = vcombine.high %v936_v9, %v1875_v17  ;;  %v947_v20 = vshrl.u32 %v912_v11, 16 }
 0x130   : > { %v1208_v7 = vrot.slane %v1725_v3, %v1960_v54  ;;  %v1216_v9 = vrot.slane %v1726_v5, %v1960_v54 }
 0x131   : > { %v956_v21 = vsel %vm954_vm1, %v940_v14, 0  ;;  %v943_v22 = vpack.i.b16 %v942_v16, %v941_v15  ;;  %v946_v23 = vpack.i.b16 %v937_v18, %v912_v11  ;;  %v948_v24 = vshrl.u32 %v937_v18, 16 }
 0x132   : > { %1752 = vmatpush3.bf16.msra.mxu0 %v956_v21  ;;  %v1192_v11 = vcombine.low %v1183_v6, %v1191_v8  ;;  %v1217_v12 = vcombine.low %v1208_v7, %v1216_v9 }
 0x133   : > { %v1002_v26 = vsel %vm954_vm1, %v943_v22, 0  ;;  %1763 = vmatprep.subr.bf16.mxu0 %v1874_v10  ;;  %v949_v28 = vpack.i.b16 %v948_v24, %v947_v20  ;;  %v1048_v30 = vsel %vm954_vm1, %v946_v23, 0 }
 0x134   : > { %1758 = vmatpush3.bf16.msra.mxu1 %v1002_v26  ;;  %v1199_v13 = vrot.slane %v1192_v11, %v1962_v61  ;;  %v1224_v14 = vrot.slane %v1217_v12, %v1962_v61 }
 0x135   : > { %1754 = vmatmul.mubr.msk.bf16.vlgmr.msra.gmra.mrb[0].mxu0 %vm950_vm2, %v522_v19  ;;  %1769 = vmatprep.subr.bf16.mxu1 %v1874_v10  ;;  %v1094_v31 = vsel %vm954_vm1, %v949_v28, 0 }
 0x136   : > { %1764 = vmatpush3.bf16.msra.mxu0 %v1048_v30  ;;  %1765 = vmatprep.mubr.msk.bf16.mxu0 %vm1876_vm0, %v1874_v10  ;;  %v1228_v15 = vpack.i.b16 %v1224_v14, %v1199_v13  ;;  %v1229_v16 = vshrl.u32 %v1199_v13, 16  ;;  %v1230_v18 = vshrl.u32 %v1224_v14, 16  ;;  %v1200_v22 = vcombine.high %v1199_v13, %v1875_v17 }
 0x137   : > { %1760 = vmatmul.mubr.msk.bf16.vlgmr.msra.gmra.mrb[0].mxu1 %vm950_vm2, %v525_v27  ;;  %1775 = vmatprep.subr.bf16.mxu0 %v1874_v10  ;;  %v1225_v23 = vcombine.high %v1224_v14, %v1875_v17 }
 0x138   : > { %1770 = vmatpush3.bf16.msra.mxu1 %v1094_v31  ;;  %1771 = vmatprep.mubr.msk.bf16.mxu1 %vm1876_vm0, %v1874_v10  ;;  %v1242_v19 = vsel %vm954_vm1, %v1228_v15, 0  ;;  %v1231_v20 = vpack.i.b16 %v1230_v18, %v1229_v16  ;;  %v1235_v25 = vshrl.u32 %v1200_v22, 16 }
 0x139   : > { %1781 = vmatprep.subr.bf16.mxu1 %v1874_v10  ;;  %v1234_v24 = vpack.i.b16 %v1225_v23, %v1200_v22  ;;  %v1236_v26 = vshrl.u32 %v1225_v23, 16 }
 0x13a   : > { %v1288_v21 = vsel %vm954_vm1, %v1231_v20, 0 }
 0x13b   : > { %v1237_v27 = vpack.i.b16 %v1236_v26, %v1235_v25 }
 0x13d   : > { %1766 = vmatmul.mubr.msk.bf16.vlgmr.msra.gmra.mrb[4].mxu0 %vm950_vm2, %v528_v34 }
 0x13e   : > { %1777 = vmatprep.mubr.msk.bf16.mxu0 %vm1876_vm0, %v1874_v10  ;;  %1776 = vmatpush3.bf16.msra.mxu0 %v1242_v19 }
 0x13f   : > { %1772 = vmatmul.mubr.msk.bf16.vlgmr.msra.gmra.mrb[4].mxu1 %vm950_vm2, %v531_v35  ;;  %1787 = vmatprep.subr.bf16.mxu0 %v1874_v10 }
 0x140   : > { %1783 = vmatprep.mubr.msk.bf16.mxu1 %vm1876_vm0, %v1874_v10  ;;  %1782 = vmatpush3.bf16.msra.mxu1 %v1288_v21 }
 0x141   : > { %1793 = vmatprep.subr.bf16.mxu1 %v1874_v10 }
 0x208   : > { %v2019_v36 = vpop.f32.mrb[0].mxu0 }
 0x209   : > { %v1755_v37 = vpop.f32.mrb[1].mxu0  ;;  %v1136_v38 = vsel %vm950_vm2, %v2019_v36, -inf }
 0x20a   : > { %v2023_v39 = vpop.f32.mrb[0].mxu1  ;;  %1137 = vmax.xlane.f32.xlu0 %v1136_v38  ;;  %v995_v40 = vpop.f32.mrb[2].mxu0 }
 0x20b   : > { %v1756_v41 = vpop.f32.mrb[3].mxu0  ;;  %v1761_v42 = vpop.f32.mrb[1].mxu1  ;;  %v1139_v43 = vsel %vm950_vm2, %v2023_v39, -inf }
 0x20c   : > { %1140 = vmax.xlane.f32.xlu1 %v1139_v43  ;;  %v1041_v44 = vpop.f32.mrb[2].mxu1 }
 0x20d   : > { %v1762_v45 = vpop.f32.mrb[3].mxu1 }
 0x210   : > { %v1084_v46 = vpop.f32.mrb[4].mxu0 }
 0x211   : > { %v1767_v47 = vpop.f32.mrb[5].mxu0  ;;  %v1142_v48 = vsel %vm950_vm2, %v1084_v46, -inf }
 0x212   : > { %v1130_v49 = vpop.f32.mrb[4].mxu1  ;;  %1143 = vmax.xlane.f32.xlu0 %v1142_v48  ;;  %v1087_v50 = vpop.f32.mrb[6].mxu0 }
 0x213   : > { %v1768_v51 = vpop.f32.mrb[7].mxu0  ;;  %v1773_v52 = vpop.f32.mrb[5].mxu1  ;;  %v1145_v53 = vsel %vm950_vm2, %v1130_v49, -inf }
 0x214   : > { %1146 = vmax.xlane.f32.xlu1 %v1145_v53  ;;  %v1133_v55 = vpop.f32.mrb[6].mxu1 }
 0x215   : > { %v1774_v56 = vpop.f32.mrb[7].mxu1 }
 0x297   : > { %v1138_v28 = vpop.xlane.xlu0 %1137 }
 0x298   : > { %v1148_v29 = vsub.f32 %v2019_v36, %v1138_v28  ;;  %v1334_v36 = vsel %vm954_vm1, %v1234_v24, 0 }
 0x299   : > { %v1141_v30 = vpop.xlane.xlu1 %1140 }
 0x29a   : > { %v1152_v31 = vmul.f32 1.442695, %v1148_v29  ;;  %v1149_v32 = vsub.f32 %v2023_v39, %v1141_v30 }
 0x29c   : > { %1832 = vpow2.f32 %v1152_v31  ;;  %v1154_v33 = vmul.f32 1.442695, %v1149_v32 }
 0x29e   : > { %1834 = vpow2.f32 %v1154_v33 }
 0x29f   : > { %v1144_v34 = vpop.xlane.xlu0 %1143 }
 0x2a0   : > { %v1150_v35 = vsub.f32 %v1084_v46, %v1144_v34  ;;  %v1380_v46 = vsel %vm954_vm1, %v1237_v27, 0 }
 0x2a1   : > { %v1147_v17 = vpop.xlane.xlu1 %1146 }
 0x2a2   : > { %v1156_v37 = vmul.f32 1.442695, %v1150_v35  ;;  %v1151_v38 = vsub.f32 %v1130_v49, %v1147_v17 }
 0x2a4   : > { %1836 = vpow2.f32 %v1156_v37  ;;  %v1158_v40 = vmul.f32 1.442695, %v1151_v38 }
 0x2a6   : > { %v1833_v41 = vpop.eup %1832  ;;  %1838 = vpow2.f32 %v1158_v40 }
 0x2a7   : > { %v1160_v42 = vsel %vm950_vm2, %v1833_v41, 0.0  ;;  %v1172_v43 = vpack.c.bf16 %v1833_v41, %v1833_v41 }
 0x2a8   : > { %v1835_v44 = vpop.eup %1834  ;;  %1161 = vadd.xlane.f32.xlu0 %v1160_v42 }
 0x2a9   : > { %1778 = vmatmul.mubr.msk.bf16.vlgmr.msra.gmra.mrb[8].mxu0 %vm950_vm2, %v1172_v43  ;;  %v1163_v39 = vsel %vm950_vm2, %v1835_v44, 0.0  ;;  %v1173_v45 = vpack.c.bf16 %v1835_v44, %v1835_v44 }
 0x2aa   : > { %1164 = vadd.xlane.f32.xlu1 %v1163_v39  ;;  %1788 = vmatpush3.bf16.msra.mxu0 %v1334_v36 }
 0x2ab   : > { %1784 = vmatmul.mubr.msk.bf16.vlgmr.msra.gmra.mrb[8].mxu1 %vm950_vm2, %v1173_v45  ;;  %1789 = vmatprep.mubr.msk.bf16.mxu0 %vm1876_vm0, %v1874_v10 }
 0x2ac   : > { %1794 = vmatpush3.bf16.msra.mxu1 %v1380_v46  ;;  %1795 = vmatprep.mubr.msk.bf16.mxu1 %vm1876_vm0, %v1874_v10 }
 0x2ae   : > { %v1837_v47 = vpop.eup %1836 }
 0x2af   : > { %v1166_v48 = vsel %vm950_vm2, %v1837_v47, 0.0  ;;  %v1174_v49 = vpack.c.bf16 %v1837_v47, %v1837_v47 }
 0x2b0   : > { %v1839_v50 = vpop.eup %1838  ;;  %1167 = vadd.xlane.f32.xlu0 %v1166_v48 }
 0x2b1   : > { %1790 = vmatmul.mubr.msk.bf16.vlgmr.msra.gmra.mrb[12].mxu0 %vm950_vm2, %v1174_v49  ;;  %v1169_v51 = vsel %vm950_vm2, %v1839_v50, 0.0  ;;  %v1175_v52 = vpack.c.bf16 %v1839_v50, %v1839_v50 }
 0x2b2   : > { %1170 = vadd.xlane.f32.xlu1 %v1169_v51 }
 0x2b3   : > { %1796 = vmatmul.mubr.msk.bf16.vlgmr.msra.gmra.mrb[12].mxu1 %vm950_vm2, %v1175_v52 }
 0x335   : > { %v1162_v53 = vpop.xlane.xlu0 %1161 }
 0x336   : > { %1840 = vrcp.f32 %v1162_v53 }
 0x337   : > { %v1165_v55 = vpop.xlane.xlu1 %1164 }
 0x33d   : > { %v1168_v56 = vpop.xlane.xlu0 %1167 }
 0x33e   : > { %1842 = vrcp.f32 %v1168_v56 }
 0x33f   : > { %v1171_v57 = vpop.xlane.xlu1 %1170  ;;  %1844 = vrcp.f32 %v1165_v55 }
 0x340   : > { %1846 = vrcp.f32 %v1171_v57  ;;  %v1841_v2 = vpop.eup %1840 }
 0x348   : > { %v1843_v3 = vpop.eup %1842 }
 0x349   : > { %v1845_v5 = vpop.eup %1844 }
 0x34a   : > { %v1847_v9 = vpop.eup %1846 }
 0x37c   : > { %v1278_v10 = vpop.f32.mrb[8].mxu0 }
 0x37d   : > { %v1779_v58 = vpop.f32.mrb[9].mxu0  ;;  %v1426_v6 = vmul.f32 %v1841_v2, %v1278_v10 }
 0x37e   : > { %v1281_v59 = vpop.f32.mrb[10].mxu0  ;;  %v1324_v60 = vpop.f32.mrb[8].mxu1 }
 0x37f   : > { %v1780_v62 = vpop.f32.mrb[11].mxu0  ;;  %v1785_v63 = vpop.f32.mrb[9].mxu1  ;;  %v1427_v13 = vmul.f32 %v1845_v5, %v1324_v60 }
 0x380   : > { %v1327_v0 = vpop.f32.mrb[10].mxu1 }
 0x381   : > { %v1786_v1 = vpop.f32.mrb[11].mxu1 }
 0x384   : > { %v1370_v4 = vpop.f32.mrb[12].mxu0 }
 0x385   : > { %v1428_v7 = vmul.f32 %v1843_v3, %v1370_v4  ;;  %v1791_v8 = vpop.f32.mrb[13].mxu0 }
 0x386   : > { %v1373_v11 = vpop.f32.mrb[14].mxu0  ;;  %v1416_v12 = vpop.f32.mrb[12].mxu1 }
 0x387   : > { %v1430_v14 = vcombine.low %v1426_v6, %v1428_v7  ;;  %v1431_v15 = vcombine.high %v1426_v6, %v1428_v7  ;;  %v1429_v16 = vmul.f32 %v1847_v9, %v1416_v12  ;;  %v1792_v18 = vpop.f32.mrb[15].mxu0  ;;  %v1797_v19 = vpop.f32.mrb[13].mxu1 }
 0x388   : > { %v1419_v20 = vpop.f32.mrb[14].mxu1 }
 0x389   : > { %v1446_v21 = vcombine.low %v1427_v13, %v1429_v16  ;;  %v1447_v22 = vcombine.high %v1427_v13, %v1429_v16  ;;  %v1798_v23 = vpop.f32.mrb[15].mxu1  ;;  %v1438_v24 = vrot.slane %v1430_v14, %v1960_v54  ;;  %v1445_v25 = vrot.slane %v1431_v15, %v1960_v54 }
 0x38b   : > { %v1454_v26 = vrot.slane %v1446_v21, %v1960_v54  ;;  %v1461_v27 = vrot.slane %v1447_v22, %v1960_v54 }
 0x38d   : > { %v1462_v28 = vcombine.low %v1438_v24, %v1454_v26  ;;  %v1463_v29 = vcombine.high %v1438_v24, %v1454_v26  ;;  %v1478_v30 = vcombine.low %v1445_v25, %v1461_v27  ;;  %v1479_v31 = vcombine.high %v1445_v25, %v1461_v27 }
 0x38f   : > { %v1470_v32 = vrot.slane %v1462_v28, %v1962_v61  ;;  %v1477_v33 = vrot.slane %v1463_v29, %v1962_v61  ;;  %v1486_v34 = vrot.slane %v1478_v30, %v1962_v61  ;;  %v1493_v35 = vrot.slane %v1479_v31, %v1962_v61 }
 0x391   : > { %v1498_v17 = vcombine.low %v1470_v32, %v1477_v33  ;;  %v1731_v37 = vcombine.high %v1470_v32, %v1477_v33  ;;  %v1514_v38 = vcombine.low %v1486_v34, %v1493_v35  ;;  %v1732_v40 = vcombine.high %v1486_v34, %v1493_v35 }
 0x393   : > { %v1505_v41 = vrot.slane %v1498_v17, %v1960_v54  ;;  %v1513_v42 = vrot.slane %v1731_v37, %v1960_v54  ;;  %v1521_v43 = vrot.slane %v1514_v38, %v1960_v54  ;;  %v1529_v36 = vrot.slane %v1732_v40, %v1960_v54 }
 0x395   : > { %v1531_v44 = vcombine.high %v1505_v41, %v1513_v42  ;;  %v1547_v39 = vcombine.high %v1521_v43, %v1529_v36  ;;  %v1530_v45 = vcombine.low %v1505_v41, %v1513_v42  ;;  %v1546_v46 = vcombine.low %v1521_v43, %v1529_v36 }
 0x397   : > { %v1545_v47 = vrot.slane %v1531_v44, %v1962_v61  ;;  %v1561_v48 = vrot.slane %v1547_v39, %v1962_v61  ;;  %v1538_v49 = vrot.slane %v1530_v45, %v1962_v61  ;;  %v1554_v50 = vrot.slane %v1546_v46, %v1962_v61 }
 0x399   : > { %v1564_v51 = vcombine.low %v1545_v47, %v1561_v48  ;;  %v1563_v52 = vcombine.high %v1538_v49, %v1554_v50  ;;  %v1565_v53 = vcombine.high %v1545_v47, %v1561_v48  ;;  %v1562_v55 = vcombine.low %v1538_v49, %v1554_v50 }
 0x39b   : > { %1571 = vrot.lane.b32.xlu1 %v1564_v51, %s1877_s25  ;;  %1567 = vrot.lane.b32.xlu0 %v1563_v52, %s1878_s26 }
 0x39f   : > { %1575 = vrot.lane.b32.xlu1 %v1565_v53, %s1879_s27 }
 0x40d   : > { %v1572_v54 = vpop.permute.xlu1 %1571  ;;  %v1568_v56 = vpop.permute.xlu0 %1567 }
 0x40e   : > { %v1578_v57 = vsel %vm950_vm2, %v1562_v55, %v1568_v56 }
 0x40f   : > { %v1580_v10 = vsel %vm1579_vm3, %v1578_v57, %v1572_v54 }
 0x411   : > { %v1576_v61 = vpop.permute.xlu1 %1575 }
 0x412   : > { %v1582_v58 = vsel %vm1581_vm4, %v1580_v10, %v1576_v61 }
 0x413   : > { %1584 = vst.msk [vmem:[%s420_s4] sm:$0xff] %vm1583_vm5, %v1582_v58 }
 0x414 PF: > { %p10_p9 = scmp.ge.s32.totalorder %s1917_s16, 4   ;;  %s2097_s12 = smov %s1866_s13 }
 0x415   : > { %s2098_s13 = smov %s1926_s19  ;;  %s2099_s14 = smov %s1917_s16 }
 0x416   :  { %12 = sbr.rel (!%p10_p9) target bundleno = 2 (0x2), region = 206 }

// kernel: decoder_stack_forward.22
= control target key start
LH: loop header
LB: loop body
LE: loop exit
PB: predicated region body
PF: predicated region fallthrough
CT: control target
= control target key end

     0   :  { %s545_s12 = smov 0   ;;  %s547_s13 = smov 0   ;;  %s590_s0 = inlined_call_operand.vmem [shape: f32[16,32], index: 0, kind: input, shape index: {}]   ;;  %s591_s1 = inlined_call_operand.vmem [shape: bf16[32,64], index: 1, kind: input, shape index: {}]   ;;  %s592_s2 = inlined_call_operand.vmem [shape: f32[1,64], index: 2, kind: input, shape index: {}]   ;;  %s593_s3 = inlined_call_operand.vmem [shape: f32[16,64], index: 3, kind: output, shape index: {}]  }
   0x1   :  { %s549_s14 = smov 0  }
   0x2 LB: > { %s32_s15 = sadd.s32 1, %s517_s13  ;;  %p451_p0 = scmp.ge.s32.totalorder %s521_s14, 1  ;;  %s521_s14 = sphi %s549_s14, %s13_s14   ;;  %s517_s13 = sphi %s547_s13, %s595_s13   ;;  %s513_s12 = sphi %s545_s12, %s594_s12  }
   0x3   : > { %p34_p1 = scmp.ge.s32.totalorder %s32_s15, 2  ;;  %p186_p2 = scmp.lt.s32.totalorder %s521_s14, 3 }
   0x5   : > { %s597_s15 = smov (%p34_p1, %s32_s15), 0  ;;  %p187_p3 = pnand %p451_p0, %p186_p2 }
   0x6   : > { %vm256_vm0 = vcmask (!%p187_p3), 523264   ;;  %v523_v0 = vmov (!%p187_p3), 0.0   ;;  %v497_v1 = vld [vmem:[%s591_s1] sm:$0xff] (!%p187_p3)   ;;  %vm524_vm1 = vmmov (!%p187_p3), 0   ;;  %p225_p4 = scmp.lt.s32.totalorder (!%p187_p3), %s513_s12, 1  ;;  %v498_v2 = vld [vmem:[%s591_s1 + $0x8] sm:$0xff] (!%p187_p3)  }
   0x7   : > { %190 = sbr.rel (%p187_p3) target bundleno = 245 (0xf5), region = 32  ;;  %257 = vst.msk [vmem:[#allocation2] sm:$0xff] (!%p187_p3), %vm256_vm0, %v523_v0  ;;  %463 = vmatprep.subr.bf16.mxu0 (!%p187_p3), %v523_v0  ;;  %467 = vmatprep.mubr.msk.bf16.mxu0 (!%p187_p3), %vm524_vm1, %v523_v0  ;;  %vm277_vm2 = vcmask (!%p187_p3), 261120   ;;  %v457_v11 = vld [vmem:[%s592_s2] ss:$0 sm:$0xff] (!%p187_p3) }
   0x8   : > { %464 = vmatpush3.bf16.msra.mxu0 (!%p187_p3), %v497_v1 }
   0x9   : > { %465 = vmatprep.subr.bf16.mxu0 (!%p187_p3), %v523_v0 }
   0xc   : > { %466 = vmatpush3.bf16.msra.mxu0 (!%p187_p3), %v498_v2 }
   0xe   : > { %s599_s12 = smov (!%p225_p4, %s513_s12), 1  ;;  %v258_v5 = vld [vmem:[#allocation2] sm:$0xff] }
   0xf   : > { %s452_s20 = sshll.u32 %s599_s12, 3 }
  0x10   : > { %s231_s23 = scalar_lea.vmem %s590_s0, %s452_s20  ;;  %s250_s28 = scalar_lea.vmem %s593_s3, %s452_s20 }
  0x11   : > { %v259_v3 = vld [vmem:[%s231_s23] sm:$0xff] }
  0x12   : > { %v260_v4 = vpack.c.bf16 %v259_v3, %v259_v3 }
  0x14   : > { %468 = vmatmul.mubr.msk.bf16.vlgmr.msra.gmra.mrb[0].mxu0 %vm277_vm2, %v260_v4 }
  0xe7   : > { %v315_v6 = vpop.f32.mrb[0].mxu0 }
  0xe8   : > { %v321_v7 = vadd.f32 %v315_v6, %v258_v5  ;;  %v469_v8 = vpop.f32.mrb[1].mxu0 }
  0xe9   : > { %v318_v9 = vpop.f32.mrb[2].mxu0 }
  0xea   : > { %323 = vst.msk [vmem:[#allocation2] sm:$0xff] %vm256_vm0, %v321_v7  ;;  %v470_v10 = vpop.f32.mrb[3].mxu0 }
  0xf1   : > { %v327_v12 = vld [vmem:[#allocation2] sm:$0xff] }
  0xf2   : > { %v335_v13 = vadd.f32 %v457_v11, %v327_v12 }
  0xf4   : > { %336 = vst.msk [vmem:[%s250_s28] sm:$0xff] %vm256_vm0, %v335_v13 }
  0xf5 PF: > { %s13_s14 = sadd.s32 1, %s521_s14   ;;  %s594_s12 = smov %s517_s13 }
  0xf6   : > { %p10_p5 = scmp.ge.s32.totalorder %s13_s14, 4   ;;  %s595_s13 = smov %s597_s15 }
  0xf8   :  { %12 = sbr.rel (!%p10_p5) target bundleno = 2 (0x2), region = 76 }

// kernel: decoder_stack_forward.35
= control target key start
LH: loop header
LB: loop body
LE: loop exit
PB: predicated region body
PF: predicated region fallthrough
CT: control target
= control target key end

     0   :  { %6 = vsyncpa [#allocation3], 0  ;;  %s431_s0 = inlined_call_operand.vmem [shape: f32[16,32], index: 0, kind: input, shape index: {}]   ;;  %s432_s1 = inlined_call_operand.hbm [shape: f32[16,32], index: 1, kind: output, shape index: {}]  }
   0x1   :  { %8 = vsyncpa [#allocation3 + $0x1], 0  ;;  %s328_s6 = smov 0   ;;  %s330_s7 = smov 0  }
   0x2   :  { %s332_s8 = smov 0   ;;  %s334_s9 = smov 0  }
   0x3 LB: > { %s349_s10 = sadd.s32 4294967295, %s315_s9   ;;  %s200_s11 = sadd.s32 4294967294, %s315_s9   ;;  %s315_s9 = sphi %s334_s9, %s438_s9   ;;  %s311_s8 = sphi %s332_s8, %s437_s8   ;;  %s307_s7 = sphi %s330_s7, %s436_s7   ;;  %s303_s6 = sphi %s328_s6, %s435_s6  }
   0x4   : > { %s353_s12 = sadd.s32 1, %s315_s9   ;;  %s47_s13 = sadd.s32 1, %s311_s8 }
   0x5   : > { %s44_s14 = ssub.s32 %s315_s9, %s353_s12  ;;  %p57_p0 = scmp.ne.s32.totalorder %s311_s8, %s307_s7 }
   0x6   : > { %p45_p1 = scmp.eq.s32.totalorder %s44_s14, 0  ;;  %p58_p2 = scmp.eq.s32.totalorder %s349_s10, 1 }
   0x7   : > { %p63_p3 = scmp.ne.s32.totalorder %s307_s7, %s303_s6  ;;  %p64_p4 = scmp.eq.s32.totalorder %s200_s11, 1 }
   0x8   : > { %s364_s15 = scalar_select %p45_p1, %s311_s8, %s47_s13  }
   0x9   : > { %p366_p5 = por %p58_p2, %p57_p0  ;;  %p370_p6 = por %p64_p4, %p63_p3 }
   0xa   : > { %p203_p7 = scmp.ge.s32.totalorder %s315_s9, 1  ;;  %p89_p8 = scmp.lt.s32.totalorder %s315_s9, 3 }
   0xc   : > { %p90_p9 = pnand %p203_p7, %p89_p8 }
   0xd   : > { %p108_p10 = scmp.lt.s32.totalorder (!%p90_p9), %s349_s10, 1  ;;  %vm113_vm0 = vcmask (!%p90_p9), 261120   ;;  %s105_s23 = sand.u32 (!%p90_p9), 1, %s307_s7  }
   0xe   : > { %93 = sbr.rel (%p90_p9) target bundleno = 356 (0x164), region = 24  ;;  %s204_s24 = sshll.u32 (!%p90_p9), %s105_s23, 3 }
   0xf   : > { %s207_s25 = sshll.u32 (!%p90_p9), %s349_s10, 7  ;;  %s107_s26 = scalar_lea.vmem (!%p90_p9), [#allocation2], %s204_s24 }
  0x10   : > { %s141_s27 = sshll.u32 (!%p90_p9), %s107_s26, 4  ;;  %s388_s30 = scalar_lea.hbm (!%p90_p9), %s432_s1, %s207_s25  ;;  %s390_s27 = int_to_ptr.vmem [resolvable:$true] %s141_s27 }
  0x11   : > { %s128_s2 = scalar_lea.sflag (!%p90_p9), [#allocation3], %s105_s23  ;;  %s253_s3 = scalar_lea.vmem (!%p90_p9), %s390_s27, 128 }
  0x12   : > { %p254_p11 = scmp.ne.s32.totalorder (!%p90_p9), %s390_s27, %s253_s3  ;;  %s317_s4 = smov (!%p90_p9), [#allocation2]  }
  0x13   : > { %s257_s5 = sshll.u32 (!%p90_p9), %s317_s4, 4  ;;  %s258_s5 = int_to_ptr.vmem [resolvable:$false] %s257_s5 }
  0x14   : > { %p255_p12 = pnand (!%p90_p9), %p254_p11, %p366_p5  ;;  %p260_p0 = scmp.lt.s32.totalorder (!%p90_p9), %s390_s27, %s258_s5 }
  0x15   : > { %s109_s18 = scalar_select %p108_p10, %s349_s10, 1 }
  0x16   : > { %p256_p13 = pneg %p255_p12  ;;  %s259_s10 = scalar_lea.vmem %s258_s5, 256 }
  0x17   : > { %s205_s19 = sshll.u32 %s109_s18, 3  ;;  %p261_p1 = scmp.lt.s32.totalorder %s259_s10, %s253_s3 }
  0x18   : > { %s111_s22 = scalar_lea.vmem %s431_s0, %s205_s19 }
  0x19   : > { %v112_v0 = vld [vmem:[%s111_s22] sm:$0xff]  ;;  %p262_p2 = por %p261_p1, %p260_p0 }
  0x1a   : > { %v114_v1 = vsel %vm113_vm0, %v112_v0, -inf }
  0x1b   : > { %115 = vmax.xlane.f32.xlu0 %v114_v1  ;;  %p263_p3 = pnand %p262_p2, %p256_p13 }
  0xa8   : > { %v116_v2 = vpop.xlane.xlu0 %115 }
  0xa9   : > { %v117_v3 = vsub.f32 %v112_v0, %v116_v2 }
  0xab   : > { %v118_v4 = vmul.f32 1.442695, %v117_v3 }
  0xad   : > { %249 = vpow2.f32 %v118_v4 }
  0xb7   : > { %v250_v5 = vpop.eup %249 }
  0xb8   : > { %v120_v6 = vsel %vm113_vm0, %v250_v5, 0.0 }
  0xb9   : > { %121 = vadd.xlane.f32.xlu0 %v120_v6 }
 0x146   : > { %v122_v7 = vpop.xlane.xlu0 %121 }
 0x147   : > { %251 = vlog2.f32 %v122_v7 }
 0x151   : > { %v252_v8 = vpop.eup %251 }
 0x152   : > { %v124_v9 = vmul.f32 0.6931472, %v252_v8 }
 0x154   : > { %v125_v10 = vsub.f32 %v117_v3, %v124_v9 }
 0x156   : > { %126 = vst.msk [vmem:[%s107_s26] sm:$0xff] %vm113_vm0, %v125_v10 }
 0x157   : > { %266 = shalt.err (!%p263_p3)
}
 0x158   : > { %s267_s11 = scalar_lea.hbm %s388_s30, 128  ;;  %s271_s18 = scalar_lea.hbm %s432_s1, 256 }
 0x159   : > { %p268_p4 = scmp.ne.s32.totalorder %s388_s30, %s267_s11  ;;  %p272_p9 = scmp.lt.u32.totalorder %s388_s30, %s432_s1 }
 0x15a   : > { %p273_p10 = scmp.lt.u32.totalorder %s271_s18, %s267_s11  ;;  %p275_p12 = scmp.lt.u32.totalorder %s267_s11, %s388_s30 }
 0x15b   : > { %p269_p7 = pnand %p268_p4, %p366_p5 }
 0x15c   : > { %p274_p11 = por %p273_p10, %p272_p9 }
 0x15d   : > { %p270_p8 = pneg %p269_p7 }
 0x15e   : > { %p276_p13 = por %p275_p12, %p274_p11 }
 0x160   : > { %p277_p0 = pnand %p276_p13, %p270_p8 }
 0x162   : > { %280 = shalt.err (!%p277_p0)
}
 0x163   : > { %210 = dma.vmem_to_hbm [thread:$0]  (%p366_p5), %s390_s27, 128, %s388_s30, %s128_s2  }
 0x164 PF: > { %p216_p1 = scmp.ge.s32.totalorder %s315_s9, 2  ;;  %s153_s21 = sand.u32 1, %s303_s6  }
 0x165   : > { %s154_s22 = scalar_lea.sflag [#allocation3], %s153_s21 }
 0x166   : > { %p213_p2 = pnand %p216_p1, %p370_p6 }
 0x168   : > { %298 = dma.done.wait (!%p213_p2), %s154_s22, 128  }
 0x169   : > { %300 = vsyncadd (!%p213_p2), %s154_s22, 4294967168  ;;  %p11_p3 = scmp.ge.s32.totalorder %s353_s12, 4   ;;  %s435_s6 = smov %s307_s7 }
 0x16a   : > { %s436_s7 = smov %s311_s8  ;;  %s437_s8 = smov %s364_s15 }
 0x16b   : > { %s438_s9 = smov %s353_s12  ;;  %13 = sbr.rel (!%p11_p3) target bundleno = 3 (0x3), region = 59 }
 0x172   :  { %159 = vsyncpa [#allocation3], 1 }
 0x173   :  { %161 = vsyncpa [#allocation3 + $0x1], 1 }

// kernel: decoder_stack_forward.25
= control target key start
LH: loop header
LB: loop body
LE: loop exit
PB: predicated region body
PF: predicated region fallthrough
CT: control target
= control target key end

     0   :  { %s915_s27 = smov 0   ;;  %s917_s28 = smov 0   ;;  %s1004_s0 = inlined_call_operand.vmem [shape: f32[16,32], index: 0, kind: input, shape index: {}, may-alias: {0,5}]   ;;  %s1005_s1 = inlined_call_operand.vmem [shape: bf16[32,128], index: 1, kind: input, shape index: {}]   ;;  %s1006_s2 = inlined_call_operand.vmem [shape: f32[1,128], index: 2, kind: input, shape index: {}]   ;;  %s1007_s3 = inlined_call_operand.vmem [shape: bf16[128,32], index: 3, kind: input, shape index: {}]   ;;  %s1008_s4 = inlined_call_operand.vmem [shape: f32[1,32], index: 4, kind: input, shape index: {}]   ;;  %s1009_s5 = inlined_call_operand.vmem [shape: f32[16,32], index: 5, kind: input, shape index: {}, may-alias: {0,5}]   ;;  %s1010_s6 = inlined_call_operand.vmem [shape: f32[1,32], index: 6, kind: input, shape index: {}]   ;;  %s1011_s7 = inlined_call_operand.vmem [shape: f32[1,32], index: 7, kind: input, shape index: {}]   ;;  %s1012_s8 = inlined_call_operand.vmem [shape: f32[16,32], index: 8, kind: output, shape index: {}]  }
   0x1   :  { %s919_s29 = smov 0  }
   0x2 LB: > { %s30_s30 = sadd.s32 1, %s862_s28  ;;  %p743_p0 = scmp.ge.s32.totalorder %s866_s29, 1  ;;  %s866_s29 = sphi %s919_s29, %s18_s29   ;;  %s862_s28 = sphi %s917_s28, %s1014_s28   ;;  %s858_s27 = sphi %s915_s27, %s1013_s27  }
   0x3   : > { %p32_p1 = scmp.ge.s32.totalorder %s30_s30, 2  ;;  %p310_p2 = scmp.lt.s32.totalorder %s866_s29, 3 }
   0x5   : > { %s1016_s30 = smov (%p32_p1, %s30_s30), 0  ;;  %p311_p3 = pnand %p743_p0, %p310_p2 }
   0x6   : > { %v830_v0 = vld [vmem:[%s1005_s1] sm:$0xff] (!%p311_p3)   ;;  %v868_v1 = vmov (!%p311_p3), 0.0   ;;  %v831_v2 = vld [vmem:[%s1005_s1 + $0x8] sm:$0xff] (!%p311_p3)   ;;  %vm869_vm0 = vmmov (!%p311_p3), 0   ;;  %p358_p4 = scmp.lt.s32.totalorder (!%p311_p3), %s858_s27, 1  ;;  %vm388_vm1 = vcmask (!%p311_p3), 261120  }
   0x7   : > { %314 = sbr.rel (%p311_p3) target bundleno = 791 (0x317), region = 52  ;;  %776 = vmatprep.subr.bf16.mxu0 (!%p311_p3), %v868_v1  ;;  %784 = vmatprep.subr.bf16.mxu1 (!%p311_p3), %v868_v1  ;;  %389 = vst.msk [vmem:[#allocation2] sm:$0xff] (!%p311_p3), %vm388_vm1, %v868_v1  ;;  %v832_v3 = vld [vmem:[%s1007_s3] sm:$0xff] (!%p311_p3)   ;;  %v833_v4 = vld [vmem:[%s1007_s3 + $0x8] sm:$0xff] (!%p311_p3)   ;;  %v834_v6 = vld [vmem:[%s1007_s3 + $0x10] sm:$0xff] (!%p311_p3)  }
   0x8   : > { %777 = vmatpush3.bf16.msra.mxu0 (!%p311_p3), %v830_v0  ;;  %780 = vmatprep.mubr.msk.bf16.mxu0 (!%p311_p3), %vm869_vm0, %v868_v1  ;;  %v835_v8 = vld [vmem:[%s1007_s3 + $0x18] sm:$0xff] (!%p311_p3)   ;;  %v836_v9 = vld [vmem:[%s1007_s3 + $0x20] sm:$0xff] (!%p311_p3)   ;;  %v837_v10 = vld [vmem:[%s1007_s3 + $0x28] sm:$0xff] (!%p311_p3)  }
   0x9   : > { %778 = vmatprep.subr.bf16.mxu0 (!%p311_p3), %v868_v1  ;;  %800 = vmatprep.mubr.msk.bf16.mxu1 (!%p311_p3), %vm869_vm0, %v868_v1  ;;  %v838_v11 = vld [vmem:[%s1007_s3 + $0x30] sm:$0xff] (!%p311_p3)   ;;  %v839_v12 = vld [vmem:[%s1007_s3 + $0x38] sm:$0xff] (!%p311_p3)   ;;  %v747_v13 = vld [vmem:[%s1006_s2] ss:$0 sm:$0xff] (!%p311_p3) }
   0xa   : > { %785 = vmatpush3.bf16.msra.mxu1 (!%p311_p3), %v832_v3  ;;  %v759_v27 = vld [vmem:[%s1008_s4] ss:$0 sm:$0xff] (!%p311_p3) }
   0xb   : > { %786 = vmatprep.subr.bf16.mxu1 (!%p311_p3), %v868_v1  ;;  %v760_v46 = vld [vmem:[%s1010_s6] ss:$0 sm:$0xff] (!%p311_p3) }
   0xc   : > { %779 = vmatpush3.bf16.msra.mxu0 (!%p311_p3), %v831_v2  ;;  %v761_v49 = vld [vmem:[%s1011_s7] ss:$0 sm:$0xff] (!%p311_p3) }
   0xe   : > { %s1018_s27 = smov (!%p358_p4, %s858_s27), 1  ;;  %787 = vmatpush3.bf16.msra.mxu1 %v833_v4  ;;  %v460_v21 = vld [vmem:[#allocation2] sm:$0xff] }
   0xf   : > { %s946_s17 = sshll.u32 %s1018_s27, 3  ;;  %788 = vmatprep.subr.bf16.mxu1 %v868_v1 }
  0x10   : > { %s361_s20 = scalar_lea.vmem %s1004_s0, %s946_s17  ;;  %s378_s19 = scalar_lea.vmem %s1009_s5, %s946_s17 }
  0x11   : > { %v390_v5 = vld [vmem:[%s361_s20] sm:$0xff]  ;;  %s382_s9 = scalar_lea.vmem %s1012_s8, %s946_s17 }
  0x12   : > { %v391_v7 = vpack.c.bf16 %v390_v5, %v390_v5  ;;  %789 = vmatpush3.bf16.msra.mxu1 %v834_v6  ;;  %v580_v29 = vld [vmem:[%s378_s19] sm:$0xff] }
  0x13   : > { %790 = vmatprep.subr.bf16.mxu1 %v868_v1 }
  0x14   : > { %781 = vmatmul.mubr.msk.bf16.vlgmr.msra.gmra.mrb[0].mxu0 %vm388_vm1, %v391_v7 }
  0x16   : > { %791 = vmatpush3.bf16.msra.mxu1 %v835_v8 }
  0x17   : > { %792 = vmatprep.subr.bf16.mxu1 %v868_v1 }
  0x1a   : > { %793 = vmatpush3.bf16.msra.mxu1 %v836_v9 }
  0x1b   : > { %794 = vmatprep.subr.bf16.mxu1 %v868_v1 }
  0x1e   : > { %795 = vmatpush3.bf16.msra.mxu1 %v837_v10 }
  0x1f   : > { %796 = vmatprep.subr.bf16.mxu1 %v868_v1 }
  0x22   : > { %797 = vmatpush3.bf16.msra.mxu1 %v838_v11 }
  0x23   : > { %798 = vmatprep.subr.bf16.mxu1 %v868_v1 }
  0x26   : > { %799 = vmatpush3.bf16.msra.mxu1 %v839_v12 }
  0xe7   : > { %v453_v14 = vpop.f32.mrb[0].mxu0 }
  0xe8   : > { %v454_v15 = vadd.f32 %v747_v13, %v453_v14  ;;  %v782_v16 = vpop.f32.mrb[1].mxu0 }
  0xe9   : > { %v456_v17 = vpop.f32.mrb[2].mxu0 }
  0xea   : > { %v459_v18 = vmax.f32 %v454_v15, 0.0  ;;  %v783_v19 = vpop.f32.mrb[3].mxu0 }
  0xec   : > { %v461_v20 = vpack.c.bf16 %v459_v18, %v459_v18 }
  0xee   : > { %801 = vmatmul.mubr.bf16.vlgmr.msra.gmra.mrb[0].mxu1 %v461_v20 }
 0x1c1   : > { %v560_v22 = vpop.f32.mrb[0].mxu1 }
 0x1c2   : > { %v566_v23 = vadd.f32 %v560_v22, %v460_v21  ;;  %v802_v24 = vpop.f32.mrb[1].mxu1 }
 0x1c3   : > { %v563_v25 = vpop.f32.mrb[2].mxu1 }
 0x1c4   : > { %567 = vst.msk [vmem:[#allocation2] sm:$0xff] %vm388_vm1, %v566_v23  ;;  %v803_v26 = vpop.f32.mrb[3].mxu1 }
 0x1cb   : > { %v571_v28 = vld [vmem:[#allocation2] sm:$0xff] }
 0x1cc   : > { %v579_v30 = vadd.f32 %v759_v27, %v571_v28 }
 0x1ce   : > { %v581_v31 = vadd.f32 %v580_v29, %v579_v30 }
 0x1d0   : > { %v584_v32 = vsel %vm388_vm1, %v581_v31, 0.0 }
 0x1d1   : > { %585 = vadd.xlane.f32.xlu0 %v584_v32 }
 0x25e   : > { %v586_v33 = vpop.xlane.xlu0 %585 }
 0x25f   : > { %v588_v34 = vmul.f32 0.03125, %v586_v33 }
 0x261   : > { %v589_v35 = vsub.f32 %v581_v31, %v588_v34 }
 0x263   : > { %v590_v36 = vmul.f32 %v589_v35, %v589_v35  ;;  %v610_v47 = vmul.f32 %v760_v46, %v589_v35 }
 0x265   : > { %v591_v37 = vsel %vm388_vm1, %v590_v36, 0.0 }
 0x266   : > { %592 = vadd.xlane.f32.xlu0 %v591_v37 }
 0x2f3   : > { %v593_v38 = vpop.xlane.xlu0 %592 }
 0x2f4   : > { %v594_v39 = vmul.f32 0.032258064, %v593_v38 }
 0x2f6   : > { %840 = vrsqrt.f32 %v594_v39  ;;  %vm597_vm2 = vcmp.eq.f32.partialorder %v594_v39, inf  ;;  %v600_v42 = vand.u32 2147483648, %v594_v39  ;;  %vm599_vm3 = vcmp.eq.f32.partialorder %v594_v39, 0.0 }
 0x300   : > { %v841_v40 = vpop.eup %840 }
 0x301   : > { %v596_v41 = vmul.f32 %v841_v40, %v594_v39 }
 0x303   : > { %v598_v43 = vsel %vm597_vm2, %v594_v39, %v596_v41 }
 0x304   : > { %v601_v44 = vsel %vm599_vm3, %v600_v42, %v598_v43 }
 0x305   : > { %v602_v45 = vadd.f32 1e-06, %v601_v44 }
 0x307   : > { %842 = vrcp.f32 %v602_v45 }
 0x311   : > { %v843_v48 = vpop.eup %842 }
 0x312   : > { %v611_v50 = vmul.f32 %v843_v48, %v610_v47 }
 0x314   : > { %v618_v51 = vadd.f32 %v761_v49, %v611_v50 }
 0x316   : > { %619 = vst.msk [vmem:[%s382_s9] sm:$0xff] %vm388_vm1, %v618_v51 }
 0x317 PF: > { %s18_s29 = sadd.s32 1, %s866_s29   ;;  %s1013_s27 = smov %s862_s28 }
 0x318   : > { %p15_p5 = scmp.ge.s32.totalorder %s18_s29, 4   ;;  %s1014_s28 = smov %s1016_s30 }
 0x31a   :  { %17 = sbr.rel (!%p15_p5) target bundleno = 2 (0x2), region = 102 }

// kernel: decoder_stack_forward.23
= control target key start
LH: loop header
LB: loop body
LE: loop exit
PB: predicated region body
PF: predicated region fallthrough
CT: control target
= control target key end

     0   :  { %s1816_s12 = smov 0   ;;  %s1818_s13 = smov 0   ;;  %s2007_s0 = inlined_call_operand.vmem [shape: f32[2,8,4,8], index: 0, kind: input, shape index: {}]   ;;  %s2008_s1 = inlined_call_operand.vmem [shape: f32[2,8,2,4,8], index: 1, kind: input, shape index: {}, may-alias: {1,2}]   ;;  %s2009_s2 = inlined_call_operand.vmem [shape: f32[2,8,2,4,8], index: 2, kind: input, shape index: {}, may-alias: {1,2}]   ;;  %s2010_s3 = inlined_call_operand.vmem [shape: f32[2,8,32], index: 3, kind: output, shape index: {}]  }
   0x1   :  { %s1820_s14 = smov 0  }
   0x2 LB: > { %s1605_s15 = sadd.s32 4294967295, %s1786_s14   ;;  %s1833_s16 = sadd.s32 1, %s1786_s14   ;;  %s1786_s14 = sphi %s1820_s14, %s2014_s14   ;;  %s1782_s13 = sphi %s1818_s13, %s2013_s13   ;;  %s1778_s12 = sphi %s1816_s12, %s2012_s12  }
   0x3   : > { %s43_s17 = ssub.s32 %s1786_s14, %s1833_s16  ;;  %s46_s18 = sadd.s32 1, %s1782_s13 }
   0x4   : > { %p44_p0 = scmp.eq.s32.totalorder %s43_s17, 0  ;;  %p53_p1 = scmp.ne.s32.totalorder %s1782_s13, %s1778_s12 }
   0x5   : > { %p54_p2 = scmp.eq.s32.totalorder %s1786_s14, 0  ;;  %p1608_p4 = scmp.ge.s32.totalorder %s1786_s14, 2 }
   0x6   : > { %s1842_s19 = scalar_select %p44_p0, %s1782_s13, %s46_s18  }
   0x7   : > { %p1844_p3 = por %p54_p2, %p53_p1  ;;  %131 = sbr.rel (%p1608_p4) target bundleno = 32 (0x20), region = 16 }
   0xe   : > { %142 = sbr.rel (!%p1844_p3) target bundleno = 23 (0x17), region = 24  ;;  %s144_s21 = sand.u32 (%p1844_p3), 1, %s1782_s13  }
   0xf   : > { %s1649_s22 = sshll.u32 (%p1844_p3), %s1786_s14, 6  ;;  %s1609_s23 = sshll.u32 (%p1844_p3), %s144_s21, 5 }
  0x10   : > { %s149_s26 = scalar_lea.vmem (%p1844_p3), %s2008_s1, %s1649_s22  ;;  %s146_s27 = scalar_lea.vmem (%p1844_p3), [#allocation2], %s1609_s23 }
  0x11   : > { %v165_v0 = vld [vmem:[%s149_s26] sm:$0xf] (%p1844_p3)  ;;  %v167_v1 = vld [vmem:[%s149_s26 + $0x8] sm:$0xf] (%p1844_p3)  ;;  %v169_v2 = vld [vmem:[%s149_s26 + $0x10] sm:$0xf] (%p1844_p3) }
  0x12   : > { %166 = vst [vmem:[%s146_s27] sm:$0xf] (%p1844_p3), %v165_v0  ;;  %168 = vst [vmem:[%s146_s27 + $0x4] sm:$0xf] (%p1844_p3), %v167_v1  ;;  %v171_v3 = vld [vmem:[%s149_s26 + $0x18] sm:$0xf] (%p1844_p3) }
  0x13   : > { %v173_v4 = vld [vmem:[%s149_s26 + $0x20] sm:$0xf] (%p1844_p3)  ;;  %170 = vst [vmem:[%s146_s27 + $0x8] sm:$0xf] (%p1844_p3), %v169_v2  ;;  %172 = vst [vmem:[%s146_s27 + $0xc] sm:$0xf] (%p1844_p3), %v171_v3 }
  0x14   : > { %174 = vst [vmem:[%s146_s27 + $0x10] sm:$0xf] (%p1844_p3), %v173_v4  ;;  %v175_v5 = vld [vmem:[%s149_s26 + $0x28] sm:$0xf] (%p1844_p3)  ;;  %v177_v6 = vld [vmem:[%s149_s26 + $0x30] sm:$0xf] (%p1844_p3) }
  0x15   : > { %v179_v7 = vld [vmem:[%s149_s26 + $0x38] sm:$0xf]  ;;  %176 = vst [vmem:[%s146_s27 + $0x14] sm:$0xf] %v175_v5  ;;  %178 = vst [vmem:[%s146_s27 + $0x18] sm:$0xf] %v177_v6 }
  0x16   : > { %180 = vst [vmem:[%s146_s27 + $0x1c] sm:$0xf] %v179_v7 }
  0x17 PF: > { %219 = sbr.rel (!%p1844_p3) target bundleno = 32 (0x20), region = 65  ;;  %s221_s28 = sand.u32 (%p1844_p3), 1, %s1782_s13  }
  0x18   : > { %s1650_s29 = sshll.u32 (%p1844_p3), %s1786_s14, 6  ;;  %s1612_s30 = sshll.u32 (%p1844_p3), %s221_s28, 5 }
  0x19   : > { %s1543_s6 = scalar_lea.vmem (%p1844_p3), %s2009_s2, %s1650_s29  ;;  %s223_s7 = scalar_lea.vmem (%p1844_p3), [#allocation3], %s1612_s30 }
  0x1a   : > { %v1615_v8 = vld [vmem:[%s1543_s6 + $0x4] sm:$0xf] (%p1844_p3)  ;;  %v1616_v9 = vld [vmem:[%s1543_s6 + $0xc] sm:$0xf] (%p1844_p3)  ;;  %v1617_v10 = vld [vmem:[%s1543_s6 + $0x14] sm:$0xf] (%p1844_p3) }
  0x1b   : > { %244 = vst [vmem:[%s223_s7] sm:$0xf] (%p1844_p3), %v1615_v8  ;;  %246 = vst [vmem:[%s223_s7 + $0x4] sm:$0xf] (%p1844_p3), %v1616_v9  ;;  %v1618_v11 = vld [vmem:[%s1543_s6 + $0x1c] sm:$0xf] (%p1844_p3) }
  0x1c   : > { %v1619_v12 = vld [vmem:[%s1543_s6 + $0x24] sm:$0xf] (%p1844_p3)  ;;  %248 = vst [vmem:[%s223_s7 + $0x8] sm:$0xf] (%p1844_p3), %v1617_v10  ;;  %250 = vst [vmem:[%s223_s7 + $0xc] sm:$0xf] (%p1844_p3), %v1618_v11 }
  0x1d   : > { %252 = vst [vmem:[%s223_s7 + $0x10] sm:$0xf] (%p1844_p3), %v1619_v12  ;;  %v1620_v13 = vld [vmem:[%s1543_s6 + $0x2c] sm:$0xf] (%p1844_p3)  ;;  %v1621_v14 = vld [vmem:[%s1543_s6 + $0x34] sm:$0xf] (%p1844_p3) }
  0x1e   : > { %v1622_v15 = vld [vmem:[%s1543_s6 + $0x3c] sm:$0xf]  ;;  %254 = vst [vmem:[%s223_s7 + $0x14] sm:$0xf] %v1620_v13  ;;  %256 = vst [vmem:[%s223_s7 + $0x18] sm:$0xf] %v1621_v14 }
  0x1f   : > { %258 = vst [vmem:[%s223_s7 + $0x1c] sm:$0xf] %v1622_v15 }
  0x20 PF: > { %p1623_p5 = scmp.ge.s32.totalorder %s1786_s14, 1  ;;  %p296_p6 = scmp.lt.s32.totalorder %s1786_s14, 3 }
  0x22   : > { %p297_p7 = pnand %p1623_p5, %p296_p6 }
  0x23   : > { %s303_s8 = sand.u32 (!%p297_p7), 1, %s1778_s12   ;;  %v1788_v34 = vmov (!%p297_p7), 1983009808   ;;  %v403_v36 = vlaneseq (!%p297_p7)  ;;  %v1789_v39 = vmov (!%p297_p7), 1934713408   ;;  %v1790_v2 = vmov (!%p297_p7), 0.0  }
  0x24   : > { %300 = sbr.rel (%p297_p7) target bundleno = 1032 (0x408), region = 106  ;;  %s1866_s9 = sshll.u32 (!%p297_p7), %s303_s8, 5  ;;  %v401_v35 = vunpack.c.l.s4 (!%p297_p7), %v1788_v34  ;;  %v417_v40 = vunpack.c.l.s4 (!%p297_p7), %v1789_v39  ;;  %1668 = vmatprep.subr.bf16.mxu0 (!%p297_p7), %v1790_v2  ;;  %1674 = vmatprep.subr.bf16.mxu1 (!%p297_p7), %v1790_v2  ;;  %v1791_v9 = vmov (!%p297_p7), 0   ;;  %vm1792_vm0 = vmmov (!%p297_p7), 0  }
  0x25   : > { %s305_s10 = scalar_lea.vmem (!%p297_p7), [#allocation2], %s1866_s9  ;;  %v404_v42 = vshrl.u32 (!%p297_p7), %v403_v36, 7  ;;  %1670 = vmatprep.mubr.msk.bf16.mxu0 (!%p297_p7), %vm1792_vm0, %v1790_v2  ;;  %1676 = vmatprep.mubr.msk.bf16.mxu1 (!%p297_p7), %vm1792_vm0, %v1790_v2  ;;  %p341_p8 = scmp.lt.s32.totalorder (!%p297_p7), %s1605_s15, 1  ;;  %vm883_vm1 = vcmask (!%p297_p7), 1043456   ;;  %vm879_vm2 = vcmask (!%p297_p7), 64512   ;;  %vm1508_vm3 = vcmask (!%p297_p7), 130048  }
  0x26   : > { %v369_v16 = vld [vmem:[%s305_s10 + $0x8] sm:$0xf] (!%p297_p7)  ;;  %v367_v17 = vld [vmem:[%s305_s10] sm:$0xf] (!%p297_p7)  ;;  %v370_v18 = vld [vmem:[%s305_s10 + $0xc] sm:$0xf] (!%p297_p7)  ;;  %v402_v41 = vunpack.c.0.s8 (!%p297_p7), %v401_v35  ;;  %v418_v45 = vunpack.c.0.s8 (!%p297_p7), %v417_v40 }
  0x27   : > { %v377_v19 = vpack.c.bf16 (!%p297_p7), %v369_v16, %v369_v16  ;;  %v375_v20 = vpack.c.bf16 (!%p297_p7), %v367_v17, %v367_v17  ;;  %v368_v21 = vld [vmem:[%s305_s10 + $0x4] sm:$0xf] (!%p297_p7)  ;;  %v378_v22 = vpack.c.bf16 (!%p297_p7), %v370_v18, %v370_v18  ;;  %v372_v24 = vld [vmem:[%s305_s10 + $0x14] sm:$0xf] (!%p297_p7)  ;;  %v371_v25 = vld [vmem:[%s305_s10 + $0x10] sm:$0xf] (!%p297_p7) }
  0x28   : > { %v376_v23 = vpack.c.bf16 (!%p297_p7), %v368_v21, %v368_v21  ;;  %v380_v26 = vpack.c.bf16 (!%p297_p7), %v372_v24, %v372_v24  ;;  %v379_v27 = vpack.c.bf16 (!%p297_p7), %v371_v25, %v371_v25  ;;  %v374_v28 = vld [vmem:[%s305_s10 + $0x1c] sm:$0xf] (!%p297_p7)  ;;  %v373_v29 = vld [vmem:[%s305_s10 + $0x18] sm:$0xf] (!%p297_p7)  ;;  %v1869_v46 = vsub.s32 (!%p297_p7), %v402_v41, %v404_v42  ;;  %s312_s14 = scalar_lea.vmem (!%p297_p7), [#allocation3], %s1866_s9  ;;  %s1793_s20 = smov (!%p297_p7), 16  }
  0x29   : > { %493 = vxpose.xlu1.c.b16.start.end [1/1] (short) (narrow) (!%p297_p7), %v377_v19, 16  ;;  %461 = vxpose.xlu0.c.b16.start.end [1/1] (short) (narrow) (!%p297_p7), %v375_v20, 16  ;;  %v382_v30 = vpack.c.bf16 (!%p297_p7), %v374_v28, %v374_v28  ;;  %v381_v31 = vpack.c.bf16 (!%p297_p7), %v373_v29, %v373_v29  ;;  %v1871_v53 = vsub.s32 (!%p297_p7), %v418_v45, %v404_v42  ;;  %s1794_s21 = smov (!%p297_p7), 8   ;;  %s1795_s22 = smov (!%p297_p7), 24   ;;  %vm1510_vm4 = vcmask (!%p297_p7), 195584  }
  0x2a   : > { %vm1512_vm5 = vcmask (!%p297_p7), 261120  }
  0x2b   : > { %s2016_s15 = smov (!%p341_p8, %s1605_s15), 1 }
  0x2c   : > { %s1651_s11 = sshll.u32 %s2016_s15, 5  ;;  %s1628_s23 = sshll.u32 %s2016_s15, 3 }
  0x2d   : > { %509 = vxpose.xlu1.c.b16.start.end [1/1] (short) (narrow) %v378_v22, 16  ;;  %477 = vxpose.xlu0.c.b16.start.end [1/1] (short) (narrow) %v376_v23, 16  ;;  %s345_s18 = scalar_lea.vmem %s2007_s0, %s1651_s11  ;;  %s349_s26 = scalar_lea.vmem %s2010_s3, %s1628_s23 }
  0x2e   : > { %v351_v25 = vld [vmem:[%s345_s18] sm:$0xf]  ;;  %v353_v28 = vld [vmem:[%s345_s18 + $0x8] sm:$0xf]  ;;  %v354_v29 = vld [vmem:[%s345_s18 + $0xc] sm:$0xf] }
  0x31   : > { %541 = vxpose.xlu1.c.b16.start.end [1/1] (short) (narrow) %v380_v26, 16  ;;  %525 = vxpose.xlu0.c.b16.start.end [1/1] (short) (narrow) %v379_v27, 16  ;;  %v352_v26 = vld [vmem:[%s345_s18 + $0x4] sm:$0xf] }
  0x35   : > { %573 = vxpose.xlu1.c.b16.start.end [1/1] (short) (narrow) %v382_v30, 16  ;;  %557 = vxpose.xlu0.c.b16.start.end [1/1] (short) (narrow) %v381_v31, 16  ;;  %v355_v30 = vld [vmem:[%s345_s18 + $0x10] sm:$0xf]  ;;  %v356_v31 = vld [vmem:[%s345_s18 + $0x14] sm:$0xf] }
  0x36   : > { %v1629_v36 = vpack.c.bf16 %v355_v30, %v351_v25 }
  0x38   : > { %v406_v42 = vrot.slane %v1629_v36, %v1869_v46 }
  0x8f   : > { %v501_v32 = vpop.trf.xlu1  ;;  %v469_v33 = vpop.trf.xlu0 }
  0x93   : > { %v517_v37 = vpop.trf.xlu1  ;;  %v485_v38 = vpop.trf.xlu0 }
  0x97   : > { %v549_v43 = vpop.trf.xlu1  ;;  %v533_v44 = vpop.trf.xlu0 }
  0x98   : > { %v623_v47 = vcombine.low %v485_v38, %v549_v43  ;;  %v589_v48 = vcombine.low %v469_v33, %v533_v44  ;;  %v358_v33 = vld [vmem:[%s345_s18 + $0x1c] sm:$0xf]  ;;  %v1631_v38 = vpack.c.bf16 %v356_v31, %v352_v26 }
  0x99   : > { %v1632_v39 = vpack.c.bf16 %v358_v33, %v354_v29 }
  0x9a   : > { %v630_v54 = vrot.slane %v623_v47, %v1869_v46  ;;  %v596_v55 = vrot.slane %v589_v48, %v1869_v46  ;;  %v431_v44 = vrot.slane %v1631_v38, %v1869_v46 }
  0x9b   : > { %v581_v49 = vpop.trf.xlu1  ;;  %v565_v50 = vpop.trf.xlu0  ;;  %v439_v45 = vrot.slane %v1632_v39, %v1869_v46 }
  0x9c   : > { %v631_v51 = vcombine.low %v517_v37, %v581_v49  ;;  %v597_v52 = vcombine.low %v501_v32, %v565_v50  ;;  %v357_v32 = vld [vmem:[%s345_s18 + $0x18] sm:$0xf] }
  0x9d   : > { %v1630_v37 = vpack.c.bf16 %v357_v32, %v353_v28 }
  0x9e   : > { %v638_v56 = vrot.slane %v631_v51, %v1869_v46  ;;  %v604_v57 = vrot.slane %v597_v52, %v1869_v46 }
  0x9f   : > { %v414_v43 = vrot.slane %v1630_v37, %v1869_v46 }
  0xa0   : > { %v639_v58 = vcombine.low %v630_v54, %v638_v56  ;;  %v640_v59 = vcombine.high %v630_v54, %v638_v56  ;;  %v605_v60 = vcombine.low %v596_v55, %v604_v57  ;;  %v606_v61 = vcombine.high %v596_v55, %v604_v57 }
  0xa1   : > { %v415_v52 = vcombine.low %v406_v42, %v414_v43  ;;  %v440_v54 = vcombine.low %v431_v44, %v439_v45 }
  0xa2   : > { %v613_v62 = vrot.slane %v605_v60, %v1871_v53  ;;  %v647_v63 = vrot.slane %v639_v58, %v1871_v53  ;;  %v620_v0 = vrot.slane %v606_v61, %v1871_v53  ;;  %v654_v1 = vrot.slane %v640_v59, %v1871_v53 }
  0xa3   : > { %v422_v61 = vrot.slane %v415_v52, %v1871_v53  ;;  %v386_v52 = vld [vmem:[%s312_s14 + $0xc] sm:$0xf] }
  0xa4   : > { %v659_v3 = vpack.i.b16 %v647_v63, %v613_v62  ;;  %v661_v4 = vshrl.u32 %v613_v62, 16  ;;  %v662_v5 = vshrl.u32 %v647_v63, 16  ;;  %v677_v6 = vshrl.u32 %v620_v0, 16 }
  0xa5   : > { %v678_v7 = vshrl.u32 %v654_v1, 16  ;;  %v621_v10 = vcombine.high %v613_v62, %v1791_v9  ;;  %v655_v11 = vcombine.high %v647_v63, %v1791_v9  ;;  %v675_v12 = vpack.i.b16 %v654_v1, %v620_v0 }
  0xa6   : > { %689 = vxpose.xlu0.c.b16.start.end [1/1] (short) (narrow) %v659_v3, 16  ;;  %v663_v8 = vpack.i.b16 %v662_v5, %v661_v4  ;;  %v622_v13 = vcombine.high %v620_v0, %v1791_v9  ;;  %v656_v17 = vcombine.high %v654_v1, %v1791_v9  ;;  %v447_v62 = vrot.slane %v440_v54, %v1871_v53  ;;  %v387_v54 = vld [vmem:[%s312_s14 + $0x10] sm:$0xf] }
  0xa7   : > { %v679_v14 = vpack.i.b16 %v678_v7, %v677_v6  ;;  %v669_v15 = vshrl.u32 %v621_v10, 16  ;;  %v670_v16 = vshrl.u32 %v655_v11, 16  ;;  %v667_v18 = vpack.i.b16 %v655_v11, %v621_v10 }
  0xa8   : > { %705 = vxpose.xlu1.c.b16.start.end [1/1] (short) (narrow) %v663_v8, 16  ;;  %v685_v20 = vshrl.u32 %v622_v13, 16  ;;  %v686_v21 = vshrl.u32 %v656_v17, 16  ;;  %v683_v22 = vpack.i.b16 %v656_v17, %v622_v13  ;;  %v452_v4 = vshrl.u32 %v422_v61, 16 }
  0xa9   : > { %v671_v19 = vpack.i.b16 %v670_v16, %v669_v15  ;;  %v453_v5 = vshrl.u32 %v447_v62, 16  ;;  %v451_v11 = vpack.i.b16 %v447_v62, %v422_v61  ;;  %v423_v17 = vcombine.high %v422_v61, %v1791_v9 }
  0xaa   : > { %753 = vxpose.xlu0.c.b16.start.end [1/1] (short) (narrow) %v675_v12, 16  ;;  %v687_v23 = vpack.i.b16 %v686_v21, %v685_v20  ;;  %v448_v21 = vcombine.high %v447_v62, %v1791_v9 }
  0xac   : > { %769 = vxpose.xlu1.c.b16.start.end [1/1] (short) (narrow) %v679_v14, 16  ;;  %v459_v25 = vshrl.u32 %v448_v21, 16  ;;  %v457_v26 = vpack.i.b16 %v448_v21, %v423_v17 }
  0xae   : > { %721 = vxpose.xlu0.c.b16.start.end [1/1] (short) (narrow) %v667_v18, 16 }
  0xb0   : > { %737 = vxpose.xlu1.c.b16.start.end [1/1] (short) (narrow) %v671_v19, 16  ;;  %v454_v19 = vpack.i.b16 %v453_v5, %v452_v4 }
  0xb2   : > { %785 = vxpose.xlu0.c.b16.start.end [1/1] (short) (narrow) %v683_v22, 16 }
  0xb4   : > { %801 = vxpose.xlu1.c.b16.start.end [1/1] (short) (narrow) %v687_v23, 16 }
 0x10c   : > { %v697_v24 = vpop.trf.xlu0 }
 0x10e   : > { %v713_v27 = vpop.trf.xlu1 }
 0x110   : > { %v761_v34 = vpop.trf.xlu0 }
 0x111   : > { %v817_v47 = vcombine.low %v697_v24, %v761_v34  ;;  %v458_v24 = vshrl.u32 %v423_v17, 16 }
 0x112   : > { %v777_v35 = vpop.trf.xlu1 }
 0x113   : > { %v842_v49 = vcombine.low %v713_v27, %v777_v35  ;;  %v824_v55 = vrot.slane %v817_v47, %v1869_v46  ;;  %v460_v27 = vpack.i.b16 %v459_v25, %v458_v24 }
 0x114   : > { %v729_v40 = vpop.trf.xlu0 }
 0x115   : > { %v849_v58 = vrot.slane %v842_v49, %v1869_v46  ;;  %v383_v49 = vld [vmem:[%s312_s14] sm:$0xf] }
 0x116   : > { %v745_v41 = vpop.trf.xlu1 }
 0x118   : > { %v793_v48 = vpop.trf.xlu0 }
 0x119   : > { %v825_v50 = vcombine.low %v729_v40, %v793_v48 }
 0x11a   : > { %v809_v51 = vpop.trf.xlu1 }
 0x11b   : > { %v832_v56 = vrot.slane %v825_v50, %v1869_v46  ;;  %v850_v57 = vcombine.low %v745_v41, %v809_v51  ;;  %v384_v50 = vld [vmem:[%s312_s14 + $0x4] sm:$0xf]  ;;  %v385_v51 = vld [vmem:[%s312_s14 + $0x8] sm:$0xf] }
 0x11d   : > { %v833_v59 = vcombine.low %v824_v55, %v832_v56  ;;  %v857_v60 = vrot.slane %v850_v57, %v1869_v46  ;;  %v388_v55 = vld [vmem:[%s312_s14 + $0x14] sm:$0xf]  ;;  %v389_v56 = vld [vmem:[%s312_s14 + $0x18] sm:$0xf]  ;;  %v390_v57 = vld [vmem:[%s312_s14 + $0x1c] sm:$0xf] }
 0x11e   : > { %v1640_v61 = vpack.c.bf16 %v390_v57, %v386_v52 }
 0x11f   : > { %v840_v63 = vrot.slane %v833_v59, %v1871_v53  ;;  %v858_v0 = vcombine.low %v849_v58, %v857_v60  ;;  %v1637_v58 = vpack.c.bf16 %v387_v54, %v383_v49  ;;  %v1639_v59 = vpack.c.bf16 %v388_v55, %v384_v50 }
 0x120   : > { %v1638_v60 = vpack.c.bf16 %v389_v56, %v385_v51 }
 0x121   : > { %v865_v1 = vrot.slane %v858_v0, %v1871_v53  ;;  %v841_v3 = vcombine.high %v840_v63, %v1791_v9  ;;  %v870_v7 = vshrl.u32 %v840_v63, 16  ;;  %v1112_v62 = vrot.slane %v1637_v58, %v1869_v46 }
 0x122   : > { %v1120_v0 = vrot.slane %v1638_v60, %v1869_v46 }
 0x123   : > { %v869_v6 = vpack.i.b16 %v865_v1, %v840_v63  ;;  %v871_v8 = vshrl.u32 %v865_v1, 16  ;;  %v866_v10 = vcombine.high %v865_v1, %v1791_v9  ;;  %v876_v12 = vshrl.u32 %v841_v3, 16 }
 0x124   : > { %v1137_v63 = vrot.slane %v1639_v59, %v1869_v46  ;;  %v1145_v1 = vrot.slane %v1640_v61, %v1869_v46 }
 0x125   : > { %v885_v13 = vsel %vm883_vm1, %v869_v6, 0  ;;  %v872_v14 = vpack.i.b16 %v871_v8, %v870_v7  ;;  %v875_v15 = vpack.i.b16 %v866_v10, %v841_v3  ;;  %v877_v16 = vshrl.u32 %v866_v10, 16 }
 0x126   : > { %1669 = vmatpush3.bf16.msra.mxu0 %v885_v13  ;;  %v1121_v3 = vcombine.low %v1112_v62, %v1120_v0  ;;  %v1146_v4 = vcombine.low %v1137_v63, %v1145_v1 }
 0x127   : > { %v931_v18 = vsel %vm883_vm1, %v872_v14, 0  ;;  %1680 = vmatprep.subr.bf16.mxu0 %v1790_v2  ;;  %v878_v20 = vpack.i.b16 %v877_v16, %v876_v12  ;;  %v977_v22 = vsel %vm883_vm1, %v875_v15, 0 }
 0x128   : > { %1675 = vmatpush3.bf16.msra.mxu1 %v931_v18  ;;  %v1128_v5 = vrot.slane %v1121_v3, %v1871_v53  ;;  %v1153_v6 = vrot.slane %v1146_v4, %v1871_v53 }
 0x129   : > { %1671 = vmatmul.mubr.msk.bf16.vlgmr.msra.gmra.mrb[0].mxu0 %vm879_vm2, %v451_v11  ;;  %1686 = vmatprep.subr.bf16.mxu1 %v1790_v2  ;;  %v1023_v23 = vsel %vm883_vm1, %v878_v20, 0 }
 0x12a   : > { %1681 = vmatpush3.bf16.msra.mxu0 %v977_v22  ;;  %1682 = vmatprep.mubr.msk.bf16.mxu0 %vm1792_vm0, %v1790_v2  ;;  %v1157_v7 = vpack.i.b16 %v1153_v6, %v1128_v5  ;;  %v1158_v8 = vshrl.u32 %v1128_v5, 16  ;;  %v1159_v10 = vshrl.u32 %v1153_v6, 16  ;;  %v1129_v14 = vcombine.high %v1128_v5, %v1791_v9 }
 0x12b   : > { %1677 = vmatmul.mubr.msk.bf16.vlgmr.msra.gmra.mrb[0].mxu1 %vm879_vm2, %v454_v19  ;;  %1692 = vmatprep.subr.bf16.mxu0 %v1790_v2  ;;  %v1154_v15 = vcombine.high %v1153_v6, %v1791_v9 }
 0x12c   : > { %1687 = vmatpush3.bf16.msra.mxu1 %v1023_v23  ;;  %1688 = vmatprep.mubr.msk.bf16.mxu1 %vm1792_vm0, %v1790_v2  ;;  %v1171_v11 = vsel %vm883_vm1, %v1157_v7, 0  ;;  %v1160_v12 = vpack.i.b16 %v1159_v10, %v1158_v8  ;;  %v1164_v17 = vshrl.u32 %v1129_v14, 16 }
 0x12d   : > { %1698 = vmatprep.subr.bf16.mxu1 %v1790_v2  ;;  %v1163_v16 = vpack.i.b16 %v1154_v15, %v1129_v14  ;;  %v1165_v18 = vshrl.u32 %v1154_v15, 16 }
 0x12e   : > { %v1217_v13 = vsel %vm883_vm1, %v1160_v12, 0 }
 0x12f   : > { %v1166_v19 = vpack.i.b16 %v1165_v18, %v1164_v17 }
 0x131   : > { %1683 = vmatmul.mubr.msk.bf16.vlgmr.msra.gmra.mrb[4].mxu0 %vm879_vm2, %v457_v26 }
 0x132   : > { %1694 = vmatprep.mubr.msk.bf16.mxu0 %vm1792_vm0, %v1790_v2  ;;  %1693 = vmatpush3.bf16.msra.mxu0 %v1171_v11 }
 0x133   : > { %1689 = vmatmul.mubr.msk.bf16.vlgmr.msra.gmra.mrb[4].mxu1 %vm879_vm2, %v460_v27  ;;  %1704 = vmatprep.subr.bf16.mxu0 %v1790_v2 }
 0x134   : > { %1700 = vmatprep.mubr.msk.bf16.mxu1 %vm1792_vm0, %v1790_v2  ;;  %1699 = vmatpush3.bf16.msra.mxu1 %v1217_v13 }
 0x135   : > { %1710 = vmatprep.subr.bf16.mxu1 %v1790_v2 }
 0x1fc   : > { %v1937_v28 = vpop.f32.mrb[0].mxu0 }
 0x1fd   : > { %v1672_v29 = vpop.f32.mrb[1].mxu0  ;;  %v1065_v30 = vsel %vm879_vm2, %v1937_v28, -inf }
 0x1fe   : > { %v1941_v31 = vpop.f32.mrb[0].mxu1  ;;  %1066 = vmax.xlane.f32.xlu0 %v1065_v30  ;;  %v924_v32 = vpop.f32.mrb[2].mxu0 }
 0x1ff   : > { %v1673_v33 = vpop.f32.mrb[3].mxu0  ;;  %v1678_v34 = vpop.f32.mrb[1].mxu1  ;;  %v1068_v35 = vsel %vm879_vm2, %v1941_v31, -inf }
 0x200   : > { %1069 = vmax.xlane.f32.xlu1 %v1068_v35  ;;  %v970_v36 = vpop.f32.mrb[2].mxu1 }
 0x201   : > { %v1679_v37 = vpop.f32.mrb[3].mxu1 }
 0x204   : > { %v1013_v38 = vpop.f32.mrb[4].mxu0 }
 0x205   : > { %v1684_v39 = vpop.f32.mrb[5].mxu0  ;;  %v1071_v40 = vsel %vm879_vm2, %v1013_v38, -inf }
 0x206   : > { %v1059_v41 = vpop.f32.mrb[4].mxu1  ;;  %1072 = vmax.xlane.f32.xlu0 %v1071_v40  ;;  %v1016_v42 = vpop.f32.mrb[6].mxu0 }
 0x207   : > { %v1685_v43 = vpop.f32.mrb[7].mxu0  ;;  %v1690_v44 = vpop.f32.mrb[5].mxu1  ;;  %v1074_v45 = vsel %vm879_vm2, %v1059_v41, -inf }
 0x208   : > { %1075 = vmax.xlane.f32.xlu1 %v1074_v45  ;;  %v1062_v47 = vpop.f32.mrb[6].mxu1 }
 0x209   : > { %v1691_v48 = vpop.f32.mrb[7].mxu1 }
 0x28b   : > { %v1067_v20 = vpop.xlane.xlu0 %1066 }
 0x28c   : > { %v1077_v21 = vsub.f32 %v1937_v28, %v1067_v20  ;;  %v1263_v28 = vsel %vm883_vm1, %v1163_v16, 0 }
 0x28d   : > { %v1070_v22 = vpop.xlane.xlu1 %1069 }
 0x28e   : > { %v1081_v23 = vmul.f32 1.442695, %v1077_v21  ;;  %v1078_v24 = vsub.f32 %v1941_v31, %v1070_v22 }
 0x290   : > { %1748 = vpow2.f32 %v1081_v23  ;;  %v1083_v25 = vmul.f32 1.442695, %v1078_v24 }
 0x292   : > { %1750 = vpow2.f32 %v1083_v25 }
 0x293   : > { %v1073_v26 = vpop.xlane.xlu0 %1072 }
 0x294   : > { %v1079_v27 = vsub.f32 %v1013_v38, %v1073_v26  ;;  %v1309_v38 = vsel %vm883_vm1, %v1166_v19, 0 }
 0x295   : > { %v1076_v9 = vpop.xlane.xlu1 %1075 }
 0x296   : > { %v1085_v29 = vmul.f32 1.442695, %v1079_v27  ;;  %v1080_v30 = vsub.f32 %v1059_v41, %v1076_v9 }
 0x298   : > { %1752 = vpow2.f32 %v1085_v29  ;;  %v1087_v32 = vmul.f32 1.442695, %v1080_v30 }
 0x29a   : > { %v1749_v33 = vpop.eup %1748  ;;  %1754 = vpow2.f32 %v1087_v32 }
 0x29b   : > { %v1089_v34 = vsel %vm879_vm2, %v1749_v33, 0.0  ;;  %v1101_v35 = vpack.c.bf16 %v1749_v33, %v1749_v33 }
 0x29c   : > { %v1751_v36 = vpop.eup %1750  ;;  %1090 = vadd.xlane.f32.xlu0 %v1089_v34 }
 0x29d   : > { %1695 = vmatmul.mubr.msk.bf16.vlgmr.msra.gmra.mrb[8].mxu0 %vm879_vm2, %v1101_v35  ;;  %v1092_v31 = vsel %vm879_vm2, %v1751_v36, 0.0  ;;  %v1102_v37 = vpack.c.bf16 %v1751_v36, %v1751_v36 }
 0x29e   : > { %1093 = vadd.xlane.f32.xlu1 %v1092_v31  ;;  %1705 = vmatpush3.bf16.msra.mxu0 %v1263_v28 }
 0x29f   : > { %1701 = vmatmul.mubr.msk.bf16.vlgmr.msra.gmra.mrb[8].mxu1 %vm879_vm2, %v1102_v37  ;;  %1706 = vmatprep.mubr.msk.bf16.mxu0 %vm1792_vm0, %v1790_v2 }
 0x2a0   : > { %1711 = vmatpush3.bf16.msra.mxu1 %v1309_v38  ;;  %1712 = vmatprep.mubr.msk.bf16.mxu1 %vm1792_vm0, %v1790_v2 }
 0x2a2   : > { %v1753_v39 = vpop.eup %1752 }
 0x2a3   : > { %v1095_v40 = vsel %vm879_vm2, %v1753_v39, 0.0  ;;  %v1103_v41 = vpack.c.bf16 %v1753_v39, %v1753_v39 }
 0x2a4   : > { %v1755_v42 = vpop.eup %1754  ;;  %1096 = vadd.xlane.f32.xlu0 %v1095_v40 }
 0x2a5   : > { %1707 = vmatmul.mubr.msk.bf16.vlgmr.msra.gmra.mrb[12].mxu0 %vm879_vm2, %v1103_v41  ;;  %v1098_v43 = vsel %vm879_vm2, %v1755_v42, 0.0  ;;  %v1104_v44 = vpack.c.bf16 %v1755_v42, %v1755_v42 }
 0x2a6   : > { %1099 = vadd.xlane.f32.xlu1 %v1098_v43 }
 0x2a7   : > { %1713 = vmatmul.mubr.msk.bf16.vlgmr.msra.gmra.mrb[12].mxu1 %vm879_vm2, %v1104_v44 }
 0x329   : > { %v1091_v45 = vpop.xlane.xlu0 %1090 }
 0x32a   : > { %1756 = vrcp.f32 %v1091_v45 }
 0x32b   : > { %v1094_v47 = vpop.xlane.xlu1 %1093 }
 0x331   : > { %v1097_v48 = vpop.xlane.xlu0 %1096 }
 0x332   : > { %1758 = vrcp.f32 %v1097_v48 }
 0x333   : > { %v1100_v49 = vpop.xlane.xlu1 %1099  ;;  %1760 = vrcp.f32 %v1094_v47 }
 0x334   : > { %1762 = vrcp.f32 %v1100_v49  ;;  %v1757_v58 = vpop.eup %1756 }
 0x33c   : > { %v1759_v59 = vpop.eup %1758 }
 0x33d   : > { %v1761_v61 = vpop.eup %1760 }
 0x33e   : > { %v1763_v1 = vpop.eup %1762 }
 0x370   : > { %v1207_v2 = vpop.f32.mrb[8].mxu0 }
 0x371   : > { %v1696_v50 = vpop.f32.mrb[9].mxu0  ;;  %v1355_v62 = vmul.f32 %v1757_v58, %v1207_v2 }
 0x372   : > { %v1210_v51 = vpop.f32.mrb[10].mxu0  ;;  %v1253_v52 = vpop.f32.mrb[8].mxu1 }
 0x373   : > { %v1697_v54 = vpop.f32.mrb[11].mxu0  ;;  %v1702_v55 = vpop.f32.mrb[9].mxu1  ;;  %v1356_v5 = vmul.f32 %v1761_v61, %v1253_v52 }
 0x374   : > { %v1256_v56 = vpop.f32.mrb[10].mxu1 }
 0x375   : > { %v1703_v57 = vpop.f32.mrb[11].mxu1 }
 0x378   : > { %v1299_v60 = vpop.f32.mrb[12].mxu0 }
 0x379   : > { %v1357_v63 = vmul.f32 %v1759_v59, %v1299_v60  ;;  %v1708_v0 = vpop.f32.mrb[13].mxu0 }
 0x37a   : > { %v1302_v3 = vpop.f32.mrb[14].mxu0  ;;  %v1345_v4 = vpop.f32.mrb[12].mxu1 }
 0x37b   : > { %v1359_v6 = vcombine.low %v1355_v62, %v1357_v63  ;;  %v1360_v7 = vcombine.high %v1355_v62, %v1357_v63  ;;  %v1358_v8 = vmul.f32 %v1763_v1, %v1345_v4  ;;  %v1709_v10 = vpop.f32.mrb[15].mxu0  ;;  %v1714_v11 = vpop.f32.mrb[13].mxu1 }
 0x37c   : > { %v1348_v12 = vpop.f32.mrb[14].mxu1 }
 0x37d   : > { %v1375_v13 = vcombine.low %v1356_v5, %v1358_v8  ;;  %v1376_v14 = vcombine.high %v1356_v5, %v1358_v8  ;;  %v1715_v15 = vpop.f32.mrb[15].mxu1  ;;  %v1367_v16 = vrot.slane %v1359_v6, %v1869_v46  ;;  %v1374_v17 = vrot.slane %v1360_v7, %v1869_v46 }
 0x37f   : > { %v1383_v18 = vrot.slane %v1375_v13, %v1869_v46  ;;  %v1390_v19 = vrot.slane %v1376_v14, %v1869_v46 }
 0x381   : > { %v1391_v20 = vcombine.low %v1367_v16, %v1383_v18  ;;  %v1392_v21 = vcombine.high %v1367_v16, %v1383_v18  ;;  %v1407_v22 = vcombine.low %v1374_v17, %v1390_v19  ;;  %v1408_v23 = vcombine.high %v1374_v17, %v1390_v19 }
 0x383   : > { %v1399_v24 = vrot.slane %v1391_v20, %v1871_v53  ;;  %v1406_v25 = vrot.slane %v1392_v21, %v1871_v53  ;;  %v1415_v26 = vrot.slane %v1407_v22, %v1871_v53  ;;  %v1422_v27 = vrot.slane %v1408_v23, %v1871_v53 }
 0x385   : > { %v1427_v9 = vcombine.low %v1399_v24, %v1406_v25  ;;  %v1645_v29 = vcombine.high %v1399_v24, %v1406_v25  ;;  %v1443_v30 = vcombine.low %v1415_v26, %v1422_v27  ;;  %v1646_v32 = vcombine.high %v1415_v26, %v1422_v27 }
 0x387   : > { %v1434_v33 = vrot.slane %v1427_v9, %v1869_v46  ;;  %v1442_v34 = vrot.slane %v1645_v29, %v1869_v46  ;;  %v1450_v35 = vrot.slane %v1443_v30, %v1869_v46  ;;  %v1458_v28 = vrot.slane %v1646_v32, %v1869_v46 }
 0x389   : > { %v1460_v36 = vcombine.high %v1434_v33, %v1442_v34  ;;  %v1476_v31 = vcombine.high %v1450_v35, %v1458_v28  ;;  %v1459_v37 = vcombine.low %v1434_v33, %v1442_v34  ;;  %v1475_v38 = vcombine.low %v1450_v35, %v1458_v28 }
 0x38b   : > { %v1474_v39 = vrot.slane %v1460_v36, %v1871_v53  ;;  %v1490_v40 = vrot.slane %v1476_v31, %v1871_v53  ;;  %v1467_v41 = vrot.slane %v1459_v37, %v1871_v53  ;;  %v1483_v42 = vrot.slane %v1475_v38, %v1871_v53 }
 0x38d   : > { %v1493_v43 = vcombine.low %v1474_v39, %v1490_v40  ;;  %v1492_v44 = vcombine.high %v1467_v41, %v1483_v42  ;;  %v1494_v45 = vcombine.high %v1474_v39, %v1490_v40  ;;  %v1491_v47 = vcombine.low %v1467_v41, %v1483_v42 }
 0x38f   : > { %1500 = vrot.lane.b32.xlu1 %v1493_v43, %s1793_s20  ;;  %1496 = vrot.lane.b32.xlu0 %v1492_v44, %s1794_s21 }
 0x393   : > { %1504 = vrot.lane.b32.xlu1 %v1494_v45, %s1795_s22 }
 0x401   : > { %v1501_v46 = vpop.permute.xlu1 %1500  ;;  %v1497_v48 = vpop.permute.xlu0 %1496 }
 0x402   : > { %v1507_v49 = vsel %vm879_vm2, %v1491_v47, %v1497_v48 }
 0x403   : > { %v1509_v2 = vsel %vm1508_vm3, %v1507_v49, %v1501_v46 }
 0x405   : > { %v1505_v53 = vpop.permute.xlu1 %1504 }
 0x406   : > { %v1511_v50 = vsel %vm1510_vm4, %v1509_v2, %v1505_v53 }
 0x407   : > { %1513 = vst.msk [vmem:[%s349_s26] sm:$0xff] %vm1512_vm5, %v1511_v50 }
 0x408 PF: > { %p10_p9 = scmp.ge.s32.totalorder %s1833_s16, 4   ;;  %s2012_s12 = smov %s1782_s13 }
 0x409   : > { %s2013_s13 = smov %s1842_s19  ;;  %s2014_s14 = smov %s1833_s16 }
 0x40a   :  { %12 = sbr.rel (!%p10_p9) target bundleno = 2 (0x2), region = 160 }

</bundles_post_ra>
